<compile_context>
chip_gen: v7x
topology: tpu7x:2x2x1
jax: 0.10.0
libtpu: 0.0.40
codegen_flags: <defaults>
</compile_context>

<pallas_src>
import functools
import math

import jax
import jax.numpy as jnp
import numpy as np
from jax.experimental import pallas as pl
from jax.experimental.pallas import tpu as pltpu

VOCAB = 30000
MAX_SEQ = 128
FC_TILE = 15360                     # 120 * 128 lanes per vocab tile (2 tiles)

_ENC_KEYS = ('wqkv', 'bqkv', 'wo', 'bo', 'ln1_g', 'ln1_b',
             'w1', 'b1', 'w2', 'b2', 'ln2_g', 'ln2_b')
_CROSS_KEYS = ('wqkv', 'bqkv', 'wo', 'bo')


# --------------------------------------------------------------------------
# Shared math helpers.  Traced INSIDE the Pallas kernels (hot path) and also
# reused by the pure-JAX reference (with approx=False).
# --------------------------------------------------------------------------
def _layernorm(x, g, b, eps=1e-5):
    mu = jnp.mean(x, axis=-1, keepdims=True)
    var = jnp.mean((x - mu) ** 2, axis=-1, keepdims=True)
    return (x - mu) * jax.lax.rsqrt(var + eps) * g + b


def _softmax_lastdim(s, approx):
    s = s - jnp.max(s, axis=-1, keepdims=True)
    p = jnp.exp(s)
    denom = jnp.sum(p, axis=-1, keepdims=True)
    if approx:
        return p * pl.reciprocal(denom, approx=True)   # EUP slot (in-kernel only)
    return p / denom


def _mha(xq, xkv, wqkv, bqkv, wo, bo, num_heads, *, need_weights, approx):
    """nn.MultiheadAttention semantics (eval mode, no dropout).

    Fused QKV weights (e, 3e); dense matmuls on batch-collapsed operands.
    Returns (output, attention weights averaged over heads | None).
    The per-head loop is kept (instead of a 4-D einsum) for Mosaic lowering
    robustness; at these shapes its cost is negligible."""
    b, sq, e = xq.shape
    skv = xkv.shape[1]
    d = e // num_heads
    scale = 1.0 / math.sqrt(d)

    xq2 = xq.reshape(b * sq, e)
    if xq is xkv:                               # self-attention: one fused matmul
        qkv = jnp.dot(xq2, wqkv, preferred_element_type=jnp.float32) + bqkv
        q = qkv[:, :e].reshape(b, sq, e)
        k = qkv[:, e:2 * e].reshape(b, skv, e)
        v = qkv[:, 2 * e:].reshape(b, skv, e)
    else:                                       # cross-attention: Q, fused KV
        xkv2 = xkv.reshape(b * skv, e)
        q = (jnp.dot(xq2, wqkv[:, :e], preferred_element_type=jnp.float32)
             + bqkv[:, :e]).reshape(b, sq, e)
        kv = (jnp.dot(xkv2, wqkv[:, e:], preferred_element_type=jnp.float32)
              + bqkv[:, e:])
        k = kv[:, :e].reshape(b, skv, e)
        v = kv[:, e:].reshape(b, skv, e)

    out2 = jnp.zeros((b * sq, e), jnp.float32)
    wsum = jnp.zeros((b, sq, skv), jnp.float32) if need_weights else None
    for h in range(num_heads):                  # static python loop over heads
        sl = slice(h * d, (h + 1) * d)
        s = jnp.einsum('bqd,bkd->bqk', q[:, :, sl], k[:, :, sl],
                       preferred_element_type=jnp.float32) * scale
        p = _softmax_lastdim(s, approx)
        oh = jnp.einsum('bqk,bkd->bqd', p, v[:, :, sl],
                        preferred_element_type=jnp.float32)
        # concat(heads) @ Wo == sum_h head_h @ Wo[h*d:(h+1)*d, :]
        out2 = out2 + jnp.dot(oh.reshape(b * sq, d), wo[sl, :],
                              preferred_element_type=jnp.float32)
        if need_weights:
            wsum = wsum + p
    out = out2.reshape(b, sq, e) + bo
    if need_weights:
        return out, wsum * (1.0 / num_heads)
    return out, None


def _encoder_stack(x, p, num_layers, num_heads, approx):
    """num_layers post-norm nn.TransformerEncoderLayer (relu, eval mode).

    `p` maps _ENC_KEYS to (L, ...) stacked arrays OR Pallas Refs; indexing [l]
    works identically for both."""
    b, s, e = x.shape
    out = x
    for l in range(num_layers):
        attn, _ = _mha(out, out, p['wqkv'][l], p['bqkv'][l],
                       p['wo'][l], p['bo'][l], num_heads,
                       need_weights=False, approx=approx)
        h = _layernorm(out + attn, p['ln1_g'][l], p['ln1_b'][l])
        h2 = h.reshape(b * s, e)
        ff = jnp.maximum(
            jnp.dot(h2, p['w1'][l], preferred_element_type=jnp.float32)
            + p['b1'][l], 0.0)
        ff2 = jnp.dot(ff, p['w2'][l], preferred_element_type=jnp.float32) + p['b2'][l]
        out = _layernorm(h + ff2.reshape(b, s, e), p['ln2_g'][l], p['ln2_b'][l])
    return out


# --------------------------------------------------------------------------
# Pallas kernels
# --------------------------------------------------------------------------
def _encoder_only_kernel(num_layers, num_heads, *refs):
    src_ref = refs[0]
    enc = dict(zip(_ENC_KEYS, refs[1:1 + len(_ENC_KEYS)]))
    o_ref = refs[-1]
    o_ref[...] = _encoder_stack(src_ref[...], enc, num_layers, num_heads,
                                approx=True)


def _encoder_cross_kernel(num_layers, num_heads, *refs):
    src_ref, prev_ref = refs[0], refs[1]
    n_enc = len(_ENC_KEYS)
    enc = dict(zip(_ENC_KEYS, refs[2:2 + n_enc]))
    cross = {k: r[...] for k, r in
             zip(_CROSS_KEYS, refs[2 + n_enc:2 + n_enc + len(_CROSS_KEYS)])}
    o_ref, aw_ref = refs[-2], refs[-1]

    encoded = _encoder_stack(src_ref[...], enc, num_layers, num_heads,
                             approx=True)
    prev = prev_ref[...]
    out, aw = _mha(encoded, prev, cross['wqkv'], cross['bqkv'],
                   cross['wo'], cross['bo'], num_heads,
                   need_weights=True, approx=True)
    o_ref[...] = out + prev
    aw_ref[...] = aw


def _fc_out_kernel(x_ref, w_ref, b2_ref, o_ref):
    # x_ref: (B, S, E) f32   w_ref: (E, FC_TILE) bf16 (pre-tiled, squeezed)
    # b2_ref: (1, FC_TILE) f32 (already doubled)      o_ref: (B, S, FC_TILE) bf16
    bsz, s, e = x_ref.shape
    x2 = x_ref[...].reshape(bsz * s, e).astype(w_ref.dtype)
    acc = jnp.dot(x2, w_ref[...], preferred_element_type=jnp.float32)
    b2 = b2_ref[...]
    for bi in range(bsz):                       # static; per-batch sublane store
        o_ref[bi] = (acc[bi * s:(bi + 1) * s, :] + b2).astype(o_ref.dtype)


# --------------------------------------------------------------------------
# pallas_call wrappers
# --------------------------------------------------------------------------
def _vmem_spec():
    return pl.BlockSpec(memory_space=pltpu.MemorySpace.VMEM)


def encoder_forward(src, enc_p, num_layers, num_heads):
    args = (src,) + tuple(enc_p[k] for k in _ENC_KEYS)
    return pl.pallas_call(
        functools.partial(_encoder_only_kernel, num_layers, num_heads),
        out_shape=jax.ShapeDtypeStruct(src.shape, jnp.float32),
        in_specs=[_vmem_spec() for _ in args],
        out_specs=_vmem_spec(),
    )(*args)


def encoder_cross_forward(src, prev, enc_p, cross_p, num_layers, num_heads):
    args = ((src, prev) + tuple(enc_p[k] for k in _ENC_KEYS)
            + tuple(cross_p[k] for k in _CROSS_KEYS))
    b, sq, e = src.shape
    skv = prev.shape[1]
    return pl.pallas_call(
        functools.partial(_encoder_cross_kernel, num_layers, num_heads),
        out_shape=(jax.ShapeDtypeStruct((b, sq, e), jnp.float32),
                   jax.ShapeDtypeStruct((b, sq, skv), jnp.float32)),
        in_specs=[_vmem_spec() for _ in args],
        out_specs=(_vmem_spec(), _vmem_spec()),
    )(*args)


def fc_out(x, w_tiles, b2_tiles, vocab):
    """Final vocab projection.

    * weight is bf16 pre-tiled (n_tiles, E, FC_TILE): each grid step fetches
      one fully contiguous ~1 MB block (helps v5e the most).
    * 2 vocab tiles of 15360 lanes -> few grid steps (step overhead rivals the
      per-TC DMA floor on v7x); even count so "parallel" can shard across TCs.
    * output is written directly as the exact (B, S, 30000) bf16 logits
      (partial last block, masked stores) -> no post-kernel un-pad copy."""
    bsz, s, e = x.shape
    n_tiles = w_tiles.shape[0]
    return pl.pallas_call(
        _fc_out_kernel,
        out_shape=jax.ShapeDtypeStruct((bsz, s, vocab), jnp.bfloat16),
        grid=(n_tiles,),
        in_specs=[pl.BlockSpec((bsz, s, e), lambda j: (0, 0, 0)),
                  pl.BlockSpec((None, e, FC_TILE), lambda j: (j, 0, 0)),
                  pl.BlockSpec((None, 1, FC_TILE), lambda j: (j, 0, 0))],
        out_specs=pl.BlockSpec((bsz, s, FC_TILE), lambda j: (0, 0, j)),
        compiler_params=pltpu.CompilerParams(
            dimension_semantics=("parallel",)),
    )(x, w_tiles, b2_tiles)


# --------------------------------------------------------------------------
# Full forward (glue in plain JAX, hot paths in Pallas)
# --------------------------------------------------------------------------
def mini_transformer_forward(params, x, prev_node_output=None, src_mask=None,
                             is_final_node=False, *, num_heads):
    # TODO(synk): src_mask (additive attention mask) and the 3-D
    # "pre-embedded x" input path are not implemented; module is exercised
    # with 2-D token ids and src_mask=None.
    assert src_mask is None and x.ndim == 2
    tokens = jnp.clip(x.astype(jnp.int32), 0, VOCAB - 1)
    emb = params['embedding'][tokens]                     # embedding gather (glue)
    pos = params['pos_encoder'][:tokens.shape[1]][None, :, :]
    src = emb + pos
    num_layers = params['enc']['wqkv'].shape[0]

    if prev_node_output is None:
        out = encoder_forward(src, params['enc'], num_layers, num_heads)
        attn_w = None
    else:
        out, attn_w = encoder_cross_forward(src, prev_node_output,
                                            params['enc'], params['cross'],
                                            num_layers, num_heads)
    if is_final_node:
        # bf16 logits (documented precision trade; f32 MXU accumulation).
        out = fc_out(out, params['fc_w'], params['fc_b2'], VOCAB)
    return out, attn_w


# --------------------------------------------------------------------------
# Pure-JAX reference (same math, no Pallas, exact reciprocal) for correctness
# --------------------------------------------------------------------------
def reference_forward(params, x, prev_node_output=None, is_final_node=False, *,
                      num_heads):
    tokens = jnp.clip(x.astype(jnp.int32), 0, VOCAB - 1)
    emb = params['embedding'][tokens]
    pos = params['pos_encoder'][:tokens.shape[1]][None, :, :]
    out = emb + pos
    num_layers = params['enc']['wqkv'].shape[0]
    out = _encoder_stack(out, params['enc'], num_layers, num_heads, approx=False)
    attn_w = None
    if prev_node_output is not None:
        c = params['cross']
        co, attn_w = _mha(out, prev_node_output, c['wqkv'], c['bqkv'],
                          c['wo'], c['bo'], num_heads,
                          need_weights=True, approx=False)
        out = co + prev_node_output
    if is_final_node:
        b_, s_, e = out.shape
        w = jnp.transpose(params['fc_w'], (1, 0, 2)).reshape(e, -1)     # bf16
        b2 = jnp.transpose(params['fc_b2'], (1, 0, 2)).reshape(1, -1)   # f32, 2x
        xb = out.reshape(b_ * s_, e).astype(jnp.bfloat16)
        logits = (jnp.dot(xb, w, preferred_element_type=jnp.float32) + b2)
        out = logits[:, :VOCAB].reshape(b_, s_, VOCAB)
    return out, attn_w


# --------------------------------------------------------------------------
# Deterministic synthetic parameters (encoder layers stacked on a leading axis)
# --------------------------------------------------------------------------
def init_params(key, embed_size, num_heads, num_layers, hidden_size,
                vocab=VOCAB, max_seq=MAX_SEQ):
    def dense(k, shape, scale=0.02):
        return scale * jax.random.normal(k, shape, jnp.float32)

    e, hf = embed_size, hidden_size
    n_tiles = pl.cdiv(vocab, FC_TILE)            # 2 tiles of 15360 lanes
    vpad = n_tiles * FC_TILE
    keys = iter(jax.random.split(key, 8 * num_layers + 16))

    def stacked(shape):
        return jnp.stack([dense(next(keys), shape) for _ in range(num_layers)])

    enc = {
        'wqkv': stacked((e, 3 * e)), 'bqkv': stacked((1, 3 * e)),   # fused QKV
        'wo': stacked((e, e)), 'bo': stacked((1, e)),
        'ln1_g': jnp.ones((num_layers, 1, e), jnp.float32),
        'ln1_b': jnp.zeros((num_layers, 1, e), jnp.float32),
        'w1': stacked((e, hf)), 'b1': stacked((1, hf)),
        'w2': stacked((hf, e)), 'b2': stacked((1, e)),
        'ln2_g': jnp.ones((num_layers, 1, e), jnp.float32),
        'ln2_b': jnp.zeros((num_layers, 1, e), jnp.float32),
    }
    cross = {
        'wqkv': dense(next(keys), (e, 3 * e)),
        'bqkv': dense(next(keys), (1, 3 * e)),
        'wo': dense(next(keys), (e, e)), 'bo': dense(next(keys), (1, e)),
    }

    # fc_out: bf16 weight pre-tiled (n_tiles, e, FC_TILE) -> contiguous per-tile
    # DMA; bias pre-doubled (PyTorch forward adds fc_out.bias twice) and
    # pre-tiled (n_tiles, 1, FC_TILE) f32.  Pad columns are zero.
    fc_w = jnp.zeros((e, vpad), jnp.float32).at[:, :vocab].set(
        dense(next(keys), (e, vocab)))
    fc_b = jnp.zeros((1, vpad), jnp.float32).at[:, :vocab].set(
        dense(next(keys), (1, vocab)))
    fc_w_tiles = jnp.transpose(fc_w.reshape(e, n_tiles, FC_TILE),
                               (1, 0, 2)).astype(jnp.bfloat16)
    fc_b2_tiles = jnp.transpose((2.0 * fc_b).reshape(1, n_tiles, FC_TILE),
                                (1, 0, 2))

    return {
        'embedding': dense(next(keys), (vocab, e)),
        'pos_encoder': dense(next(keys), (max_seq, e)),
        'enc': enc, 'cross': cross,
        'fc_w': fc_w_tiles, 'fc_b2': fc_b2_tiles,
    }


if __name__ == "__main__":
    embed_size, num_heads, num_layers, hidden_size = 32, 4, 2, 64
    batch, seq = 2, 8

    root = jax.random.PRNGKey(0)
    kp, kx, kprev = jax.random.split(root, 3)
    params = init_params(kp, embed_size, num_heads, num_layers, hidden_size)
    x = jax.random.randint(kx, (batch, seq), 0, VOCAB, dtype=jnp.int32)
    prev = 0.02 * jax.random.normal(kprev, (batch, seq, embed_size), jnp.float32)

    # --- cross-node + final projection path -------------------------------
    fwd_final = jax.jit(functools.partial(mini_transformer_forward,
                                          is_final_node=True,
                                          num_heads=num_heads))
    out, attn_w = fwd_final(params, x, prev)
    out, attn_w = jax.block_until_ready((out, attn_w))
    assert out.shape == (batch, seq, VOCAB) and out.dtype == jnp.bfloat16
    assert attn_w.shape == (batch, seq, seq)

    ref_out, ref_w = reference_forward(params, x, prev_node_output=prev,
                                       is_final_node=True, num_heads=num_heads)
    np.testing.assert_allclose(np.asarray(out.astype(jnp.float32)),
                               np.asarray(ref_out), atol=3e-2, rtol=3e-2)
    np.testing.assert_allclose(np.asarray(attn_w), np.asarray(ref_w),
                               atol=3e-2, rtol=3e-2)

    # --- encoder-only path (no prev node, not final) -----------------------
    fwd_enc = jax.jit(functools.partial(mini_transformer_forward,
                                        num_heads=num_heads))
    enc_out, enc_w = fwd_enc(params, x)
    enc_out = jax.block_until_ready(enc_out)
    assert enc_w is None and enc_out.shape == (batch, seq, embed_size)
    ref_enc, _ = reference_forward(params, x, num_heads=num_heads)
    np.testing.assert_allclose(np.asarray(enc_out), np.asarray(ref_enc),
                               atol=3e-2, rtol=3e-2)

    print("KERNEL_OK")
</pallas_src>

<mosaic_0001>
module attributes {stable_mosaic.version = 11 : i64} {
  func.func @_fc_out_kernel(%arg0: i32, %arg1: memref<2x8x32xf32, #tpu.memory_space<vmem>>, %arg2: memref<1x32x15360xbf16, #tpu.memory_space<vmem>>, %arg3: memref<1x1x15360xf32, #tpu.memory_space<vmem>>, %arg4: memref<2x8x15360xbf16, #tpu.memory_space<vmem>>) attributes {dimension_semantics = [#tpu.dimension_semantics<parallel>], iteration_bounds = array<i64: 2>, scalar_prefetch = 0 : i64, scratch_operands = 0 : i64, tpu.core_type = #tpu.core_type<tc>, window_params = [{pipeline_mode = #tpu.pipeline_mode<synchronous>, transform_indices = @transform_0, window_bounds = array<i64: 2, 8, 32>}, {transform_indices = @transform_1, window_bounds = array<i64: 1, 32, 15360>}, {transform_indices = @transform_2, window_bounds = array<i64: 1, 1, 15360>}, {transform_indices = @transform_3, window_bounds = array<i64: 2, 8, 15360>}]} {
    %c0 = arith.constant 0 : index
    %c0_0 = arith.constant 0 : index
    %c0_1 = arith.constant 0 : index
    %0 = vector.load %arg1[%c0, %c0_0, %c0_1] : memref<2x8x32xf32, #tpu.memory_space<vmem>>, vector<2x8x32xf32>
    %1 = vector.shape_cast %0 : vector<2x8x32xf32> to vector<16x32xf32>
    %2 = arith.truncf %1 : vector<16x32xf32> to vector<16x32xbf16>
    %c0_2 = arith.constant 0 : index
    %c0_3 = arith.constant 0 : index
    %c0_4 = arith.constant 0 : index
    %3 = vector.load %arg2[%c0_2, %c0_3, %c0_4] : memref<1x32x15360xbf16, #tpu.memory_space<vmem>>, vector<1x32x15360xbf16>
    %4 = vector.shape_cast %3 : vector<1x32x15360xbf16> to vector<32x15360xbf16>
    %cst = arith.constant dense<0.000000e+00> : vector<16x15360xf32>
    %5 = tpu.matmul %2, %4, %cst {dimension_numbers = #tpu.dot_dimension_numbers<[1], [0], [0], [1], [0, 0, 1, 1], [], []>} : vector<16x32xbf16>, vector<32x15360xbf16>, vector<16x15360xf32> -> vector<16x15360xf32>
    %c0_5 = arith.constant 0 : index
    %c0_6 = arith.constant 0 : index
    %c0_7 = arith.constant 0 : index
    %6 = vector.load %arg3[%c0_5, %c0_6, %c0_7] : memref<1x1x15360xf32, #tpu.memory_space<vmem>>, vector<1x1x15360xf32>
    %7 = vector.shape_cast %6 : vector<1x1x15360xf32> to vector<1x15360xf32>
    %8 = vector.extract_strided_slice %5 {offsets = [0, 0], sizes = [8, 15360], strides = [1, 1]} : vector<16x15360xf32> to vector<8x15360xf32>
    %9 = vector.broadcast %7 : vector<1x15360xf32> to vector<8x15360xf32>
    %10 = arith.addf %8, %9 : vector<8x15360xf32>
    %11 = arith.truncf %10 : vector<8x15360xf32> to vector<8x15360xbf16>
    %c0_8 = arith.constant 0 : index
    %c0_9 = arith.constant 0 : index
    %c0_10 = arith.constant 0 : index
    %12 = vector.load %arg4[%c0_8, %c0_9, %c0_10] : memref<2x8x15360xbf16, #tpu.memory_space<vmem>>, vector<1x8x15360xbf16>
    %13 = vector.shape_cast %12 : vector<1x8x15360xbf16> to vector<8x15360xbf16>
    %14 = vector.shape_cast %11 : vector<8x15360xbf16> to vector<1x8x15360xbf16>
    tpu.vector_store %arg4[%c0_8, %c0_9, %c0_10], %14 {strides = array<i32>} : memref<2x8x15360xbf16, #tpu.memory_space<vmem>>, vector<1x8x15360xbf16>,
    %15 = vector.extract_strided_slice %5 {offsets = [8, 0], sizes = [8, 15360], strides = [1, 1]} : vector<16x15360xf32> to vector<8x15360xf32>
    %16 = vector.broadcast %7 : vector<1x15360xf32> to vector<8x15360xf32>
    %17 = arith.addf %15, %16 : vector<8x15360xf32>
    %18 = arith.truncf %17 : vector<8x15360xf32> to vector<8x15360xbf16>
    %c1 = arith.constant 1 : index
    %c0_11 = arith.constant 0 : index
    %c0_12 = arith.constant 0 : index
    %19 = vector.load %arg4[%c1, %c0_11, %c0_12] : memref<2x8x15360xbf16, #tpu.memory_space<vmem>>, vector<1x8x15360xbf16>
    %20 = vector.shape_cast %19 : vector<1x8x15360xbf16> to vector<8x15360xbf16>
    %21 = vector.shape_cast %18 : vector<8x15360xbf16> to vector<1x8x15360xbf16>
    tpu.vector_store %arg4[%c1, %c0_11, %c0_12], %21 {strides = array<i32>} : memref<2x8x15360xbf16, #tpu.memory_space<vmem>>, vector<1x8x15360xbf16>,
    return
  }
  func.func @transform_0(%arg0: i32) -> (i32, i32, i32) {
    %c0_i32 = arith.constant 0 : i32
    %c0_i32_0 = arith.constant 0 : i32
    %c0_i32_1 = arith.constant 0 : i32
    %c0_i32_2 = arith.constant 0 : i32
    return %c0_i32, %c0_i32_0, %c0_i32_1 : i32, i32, i32
  }
  func.func @transform_1(%arg0: i32) -> (i32, i32, i32) {
    %c0_i32 = arith.constant 0 : i32
    %c0_i32_0 = arith.constant 0 : i32
    %c0_i32_1 = arith.constant 0 : i32
    return %arg0, %c0_i32, %c0_i32_0 : i32, i32, i32
  }
  func.func @transform_2(%arg0: i32) -> (i32, i32, i32) {
    %c0_i32 = arith.constant 0 : i32
    %c0_i32_0 = arith.constant 0 : i32
    %c0_i32_1 = arith.constant 0 : i32
    return %arg0, %c0_i32, %c0_i32_0 : i32, i32, i32
  }
  func.func @transform_3(%arg0: i32) -> (i32, i32, i32) {
    %c0_i32 = arith.constant 0 : i32
    %c0_i32_0 = arith.constant 0 : i32
    %c0_i32_1 = arith.constant 0 : i32
    return %c0_i32, %c0_i32_0, %arg0 : i32, i32, i32
  }
}

module attributes {stable_mosaic.version = 11 : i64} {
  func.func @_encoder_cross_kernel(%arg0: memref<2x8x32xf32, #tpu.memory_space<vmem>>, %arg1: memref<2x8x32xf32, #tpu.memory_space<vmem>>, %arg2: memref<2x32x96xf32, #tpu.memory_space<vmem>>, %arg3: memref<2x1x96xf32, #tpu.memory_space<vmem>>, %arg4: memref<2x32x32xf32, #tpu.memory_space<vmem>>, %arg5: memref<2x1x32xf32, #tpu.memory_space<vmem>>, %arg6: memref<2x1x32xf32, #tpu.memory_space<vmem>>, %arg7: memref<2x1x32xf32, #tpu.memory_space<vmem>>, %arg8: memref<2x32x64xf32, #tpu.memory_space<vmem>>, %arg9: memref<2x1x64xf32, #tpu.memory_space<vmem>>, %arg10: memref<2x64x32xf32, #tpu.memory_space<vmem>>, %arg11: memref<2x1x32xf32, #tpu.memory_space<vmem>>, %arg12: memref<2x1x32xf32, #tpu.memory_space<vmem>>, %arg13: memref<2x1x32xf32, #tpu.memory_space<vmem>>, %arg14: memref<32x96xf32, #tpu.memory_space<vmem>>, %arg15: memref<1x96xf32, #tpu.memory_space<vmem>>, %arg16: memref<32x32xf32, #tpu.memory_space<vmem>>, %arg17: memref<1x32xf32, #tpu.memory_space<vmem>>, %arg18: memref<2x8x32xf32, #tpu.memory_space<vmem>>, %arg19: memref<2x8x8xf32, #tpu.memory_space<vmem>>) attributes {dimension_semantics = [], scalar_prefetch = 0 : i64, scratch_operands = 0 : i64, tpu.core_type = #tpu.core_type<tc>} {
    %c0 = arith.constant 0 : index
    %c0_0 = arith.constant 0 : index
    %0 = vector.load %arg14[%c0, %c0_0] : memref<32x96xf32, #tpu.memory_space<vmem>>, vector<32x96xf32>
    %c0_1 = arith.constant 0 : index
    %c0_2 = arith.constant 0 : index
    %1 = vector.load %arg15[%c0_1, %c0_2] : memref<1x96xf32, #tpu.memory_space<vmem>>, vector<1x96xf32>
    %c0_3 = arith.constant 0 : index
    %c0_4 = arith.constant 0 : index
    %2 = vector.load %arg16[%c0_3, %c0_4] : memref<32x32xf32, #tpu.memory_space<vmem>>, vector<32x32xf32>
    %c0_5 = arith.constant 0 : index
    %c0_6 = arith.constant 0 : index
    %3 = vector.load %arg17[%c0_5, %c0_6] : memref<1x32xf32, #tpu.memory_space<vmem>>, vector<1x32xf32>
    %c0_7 = arith.constant 0 : index
    %c0_8 = arith.constant 0 : index
    %c0_9 = arith.constant 0 : index
    %4 = vector.load %arg0[%c0_7, %c0_8, %c0_9] : memref<2x8x32xf32, #tpu.memory_space<vmem>>, vector<2x8x32xf32>
    %c0_10 = arith.constant 0 : index
    %c0_11 = arith.constant 0 : index
    %c0_12 = arith.constant 0 : index
    %5 = vector.load %arg2[%c0_10, %c0_11, %c0_12] : memref<2x32x96xf32, #tpu.memory_space<vmem>>, vector<1x32x96xf32>
    %6 = vector.shape_cast %5 : vector<1x32x96xf32> to vector<32x96xf32>
    %c0_13 = arith.constant 0 : index
    %c0_14 = arith.constant 0 : index
    %c0_15 = arith.constant 0 : index
    %7 = vector.load %arg3[%c0_13, %c0_14, %c0_15] : memref<2x1x96xf32, #tpu.memory_space<vmem>>, vector<1x1x96xf32>
    %8 = vector.shape_cast %7 : vector<1x1x96xf32> to vector<1x96xf32>
    %c0_16 = arith.constant 0 : index
    %c0_17 = arith.constant 0 : index
    %c0_18 = arith.constant 0 : index
    %9 = vector.load %arg4[%c0_16, %c0_17, %c0_18] : memref<2x32x32xf32, #tpu.memory_space<vmem>>, vector<1x32x32xf32>
    %10 = vector.shape_cast %9 : vector<1x32x32xf32> to vector<32x32xf32>
    %c0_19 = arith.constant 0 : index
    %c0_20 = arith.constant 0 : index
    %c0_21 = arith.constant 0 : index
    %11 = vector.load %arg5[%c0_19, %c0_20, %c0_21] : memref<2x1x32xf32, #tpu.memory_space<vmem>>, vector<1x1x32xf32>
    %12 = vector.shape_cast %11 : vector<1x1x32xf32> to vector<1x32xf32>
    %13 = vector.shape_cast %4 : vector<2x8x32xf32> to vector<16x32xf32>
    %cst = arith.constant dense<0.000000e+00> : vector<16x96xf32>
    %14 = tpu.matmul %13, %6, %cst {dimension_numbers = #tpu.dot_dimension_numbers<[1], [0], [0], [1], [0, 0, 1, 1], [], []>} : vector<16x32xf32>, vector<32x96xf32>, vector<16x96xf32> -> vector<16x96xf32>
    %15 = vector.broadcast %8 : vector<1x96xf32> to vector<16x96xf32>
    %16 = arith.addf %14, %15 : vector<16x96xf32>
    %17 = vector.extract_strided_slice %16 {offsets = [0, 0], sizes = [16, 32], strides = [1, 1]} : vector<16x96xf32> to vector<16x32xf32>
    %18 = vector.shape_cast %17 : vector<16x32xf32> to vector<2x8x32xf32>
    %19 = vector.extract_strided_slice %16 {offsets = [0, 32], sizes = [16, 32], strides = [1, 1]} : vector<16x96xf32> to vector<16x32xf32>
    %20 = vector.shape_cast %19 : vector<16x32xf32> to vector<2x8x32xf32>
    %21 = vector.extract_strided_slice %16 {offsets = [0, 64], sizes = [16, 32], strides = [1, 1]} : vector<16x96xf32> to vector<16x32xf32>
    %22 = vector.shape_cast %21 : vector<16x32xf32> to vector<2x8x32xf32>
    %cst_22 = arith.constant 0.000000e+00 : f32
    %23 = vector.broadcast %cst_22 : f32 to vector<16x32xf32>
    %24 = vector.extract_strided_slice %18 {offsets = [0, 0, 0], sizes = [2, 8, 8], strides = [1, 1, 1]} : vector<2x8x32xf32> to vector<2x8x8xf32>
    %25 = vector.extract_strided_slice %20 {offsets = [0, 0, 0], sizes = [2, 8, 8], strides = [1, 1, 1]} : vector<2x8x32xf32> to vector<2x8x8xf32>
    "tpu.trace_start"() <{level = 10 : i32, message = "bqd,bkd->bqk"}> : () -> ()
    %cst_23 = arith.constant dense<0.000000e+00> : vector<2x8x8xf32>
    %26 = tpu.matmul %24, %25, %cst_23 {dimension_numbers = #tpu.dot_dimension_numbers<[2], [2], [1], [1], [0, 0, 0, 1, 1, 1], [0], [0]>} : vector<2x8x8xf32>, vector<2x8x8xf32>, vector<2x8x8xf32> -> vector<2x8x8xf32>
    "tpu.trace_stop"() : () -> ()
    %cst_24 = arith.constant 0.353553385 : f32
    %27 = vector.broadcast %cst_24 : f32 to vector<2x8x8xf32>
    %28 = arith.mulf %26, %27 : vector<2x8x8xf32>
    %cst_25 = arith.constant dense<0xFF800000> : vector<2x8xf32>
    %29 = vector.multi_reduction <maximumf>, %28, %cst_25 [2] : vector<2x8x8xf32> to vector<2x8xf32>
    %30 = vector.shape_cast %29 : vector<2x8xf32> to vector<2x8x1xf32>
    %31 = vector.broadcast %30 : vector<2x8x1xf32> to vector<2x8x8xf32>
    %32 = arith.subf %28, %31 : vector<2x8x8xf32>
    %33 = math.exp %32 : vector<2x8x8xf32>
    %cst_26 = arith.constant dense<0.000000e+00> : vector<2x8xf32>
    %34 = vector.multi_reduction <add>, %33, %cst_26 [2] : vector<2x8x8xf32> to vector<2x8xf32>
    %35 = vector.shape_cast %34 : vector<2x8xf32> to vector<2x8x1xf32>
    %36 = tpu.reciprocal %35 {approx = true} : vector<2x8x1xf32> -> vector<2x8x1xf32>
    %37 = vector.broadcast %36 : vector<2x8x1xf32> to vector<2x8x8xf32>
    %38 = arith.mulf %33, %37 : vector<2x8x8xf32>
    %39 = vector.extract_strided_slice %22 {offsets = [0, 0, 0], sizes = [2, 8, 8], strides = [1, 1, 1]} : vector<2x8x32xf32> to vector<2x8x8xf32>
    "tpu.trace_start"() <{level = 10 : i32, message = "bqk,bkd->bqd"}> : () -> ()
    %cst_27 = arith.constant dense<0.000000e+00> : vector<2x8x8xf32>
    %40 = tpu.matmul %38, %39, %cst_27 {dimension_numbers = #tpu.dot_dimension_numbers<[2], [1], [1], [2], [0, 0, 0, 1, 1, 2], [0], [0]>} : vector<2x8x8xf32>, vector<2x8x8xf32>, vector<2x8x8xf32> -> vector<2x8x8xf32>
    "tpu.trace_stop"() : () -> ()
    %41 = vector.shape_cast %40 : vector<2x8x8xf32> to vector<16x8xf32>
    %42 = vector.extract_strided_slice %10 {offsets = [0, 0], sizes = [8, 32], strides = [1, 1]} : vector<32x32xf32> to vector<8x32xf32>
    %cst_28 = arith.constant dense<0.000000e+00> : vector<16x32xf32>
    %43 = tpu.matmul %41, %42, %cst_28 {dimension_numbers = #tpu.dot_dimension_numbers<[1], [0], [0], [1], [0, 0, 1, 1], [], []>} : vector<16x8xf32>, vector<8x32xf32>, vector<16x32xf32> -> vector<16x32xf32>
    %44 = arith.addf %23, %43 : vector<16x32xf32>
    %45 = vector.extract_strided_slice %18 {offsets = [0, 0, 8], sizes = [2, 8, 8], strides = [1, 1, 1]} : vector<2x8x32xf32> to vector<2x8x8xf32>
    %46 = vector.extract_strided_slice %20 {offsets = [0, 0, 8], sizes = [2, 8, 8], strides = [1, 1, 1]} : vector<2x8x32xf32> to vector<2x8x8xf32>
    "tpu.trace_start"() <{level = 10 : i32, message = "bqd,bkd->bqk"}> : () -> ()
    %cst_29 = arith.constant dense<0.000000e+00> : vector<2x8x8xf32>
    %47 = tpu.matmul %45, %46, %cst_29 {dimension_numbers = #tpu.dot_dimension_numbers<[2], [2], [1], [1], [0, 0, 0, 1, 1, 1], [0], [0]>} : vector<2x8x8xf32>, vector<2x8x8xf32>, vector<2x8x8xf32> -> vector<2x8x8xf32>
    "tpu.trace_stop"() : () -> ()
    %cst_30 = arith.constant 0.353553385 : f32
    %48 = vector.broadcast %cst_30 : f32 to vector<2x8x8xf32>
    %49 = arith.mulf %47, %48 : vector<2x8x8xf32>
    %cst_31 = arith.constant dense<0xFF800000> : vector<2x8xf32>
    %50 = vector.multi_reduction <maximumf>, %49, %cst_31 [2] : vector<2x8x8xf32> to vector<2x8xf32>
    %51 = vector.shape_cast %50 : vector<2x8xf32> to vector<2x8x1xf32>
    %52 = vector.broadcast %51 : vector<2x8x1xf32> to vector<2x8x8xf32>
    %53 = arith.subf %49, %52 : vector<2x8x8xf32>
    %54 = math.exp %53 : vector<2x8x8xf32>
    %cst_32 = arith.constant dense<0.000000e+00> : vector<2x8xf32>
    %55 = vector.multi_reduction <add>, %54, %cst_32 [2] : vector<2x8x8xf32> to vector<2x8xf32>
    %56 = vector.shape_cast %55 : vector<2x8xf32> to vector<2x8x1xf32>
    %57 = tpu.reciprocal %56 {approx = true} : vector<2x8x1xf32> -> vector<2x8x1xf32>
    %58 = vector.broadcast %57 : vector<2x8x1xf32> to vector<2x8x8xf32>
    %59 = arith.mulf %54, %58 : vector<2x8x8xf32>
    %60 = vector.extract_strided_slice %22 {offsets = [0, 0, 8], sizes = [2, 8, 8], strides = [1, 1, 1]} : vector<2x8x32xf32> to vector<2x8x8xf32>
    "tpu.trace_start"() <{level = 10 : i32, message = "bqk,bkd->bqd"}> : () -> ()
    %cst_33 = arith.constant dense<0.000000e+00> : vector<2x8x8xf32>
    %61 = tpu.matmul %59, %60, %cst_33 {dimension_numbers = #tpu.dot_dimension_numbers<[2], [1], [1], [2], [0, 0, 0, 1, 1, 2], [0], [0]>} : vector<2x8x8xf32>, vector<2x8x8xf32>, vector<2x8x8xf32> -> vector<2x8x8xf32>
    "tpu.trace_stop"() : () -> ()
    %62 = vector.shape_cast %61 : vector<2x8x8xf32> to vector<16x8xf32>
    %63 = vector.extract_strided_slice %10 {offsets = [8, 0], sizes = [8, 32], strides = [1, 1]} : vector<32x32xf32> to vector<8x32xf32>
    %cst_34 = arith.constant dense<0.000000e+00> : vector<16x32xf32>
    %64 = tpu.matmul %62, %63, %cst_34 {dimension_numbers = #tpu.dot_dimension_numbers<[1], [0], [0], [1], [0, 0, 1, 1], [], []>} : vector<16x8xf32>, vector<8x32xf32>, vector<16x32xf32> -> vector<16x32xf32>
    %65 = arith.addf %44, %64 : vector<16x32xf32>
    %66 = vector.extract_strided_slice %18 {offsets = [0, 0, 16], sizes = [2, 8, 8], strides = [1, 1, 1]} : vector<2x8x32xf32> to vector<2x8x8xf32>
    %67 = vector.extract_strided_slice %20 {offsets = [0, 0, 16], sizes = [2, 8, 8], strides = [1, 1, 1]} : vector<2x8x32xf32> to vector<2x8x8xf32>
    "tpu.trace_start"() <{level = 10 : i32, message = "bqd,bkd->bqk"}> : () -> ()
    %cst_35 = arith.constant dense<0.000000e+00> : vector<2x8x8xf32>
    %68 = tpu.matmul %66, %67, %cst_35 {dimension_numbers = #tpu.dot_dimension_numbers<[2], [2], [1], [1], [0, 0, 0, 1, 1, 1], [0], [0]>} : vector<2x8x8xf32>, vector<2x8x8xf32>, vector<2x8x8xf32> -> vector<2x8x8xf32>
    "tpu.trace_stop"() : () -> ()
    %cst_36 = arith.constant 0.353553385 : f32
    %69 = vector.broadcast %cst_36 : f32 to vector<2x8x8xf32>
    %70 = arith.mulf %68, %69 : vector<2x8x8xf32>
    %cst_37 = arith.constant dense<0xFF800000> : vector<2x8xf32>
    %71 = vector.multi_reduction <maximumf>, %70, %cst_37 [2] : vector<2x8x8xf32> to vector<2x8xf32>
    %72 = vector.shape_cast %71 : vector<2x8xf32> to vector<2x8x1xf32>
    %73 = vector.broadcast %72 : vector<2x8x1xf32> to vector<2x8x8xf32>
    %74 = arith.subf %70, %73 : vector<2x8x8xf32>
    %75 = math.exp %74 : vector<2x8x8xf32>
    %cst_38 = arith.constant dense<0.000000e+00> : vector<2x8xf32>
    %76 = vector.multi_reduction <add>, %75, %cst_38 [2] : vector<2x8x8xf32> to vector<2x8xf32>
    %77 = vector.shape_cast %76 : vector<2x8xf32> to vector<2x8x1xf32>
    %78 = tpu.reciprocal %77 {approx = true} : vector<2x8x1xf32> -> vector<2x8x1xf32>
    %79 = vector.broadcast %78 : vector<2x8x1xf32> to vector<2x8x8xf32>
    %80 = arith.mulf %75, %79 : vector<2x8x8xf32>
    %81 = vector.extract_strided_slice %22 {offsets = [0, 0, 16], sizes = [2, 8, 8], strides = [1, 1, 1]} : vector<2x8x32xf32> to vector<2x8x8xf32>
    "tpu.trace_start"() <{level = 10 : i32, message = "bqk,bkd->bqd"}> : () -> ()
    %cst_39 = arith.constant dense<0.000000e+00> : vector<2x8x8xf32>
    %82 = tpu.matmul %80, %81, %cst_39 {dimension_numbers = #tpu.dot_dimension_numbers<[2], [1], [1], [2], [0, 0, 0, 1, 1, 2], [0], [0]>} : vector<2x8x8xf32>, vector<2x8x8xf32>, vector<2x8x8xf32> -> vector<2x8x8xf32>
    "tpu.trace_stop"() : () -> ()
    %83 = vector.shape_cast %82 : vector<2x8x8xf32> to vector<16x8xf32>
    %84 = vector.extract_strided_slice %10 {offsets = [16, 0], sizes = [8, 32], strides = [1, 1]} : vector<32x32xf32> to vector<8x32xf32>
    %cst_40 = arith.constant dense<0.000000e+00> : vector<16x32xf32>
    %85 = tpu.matmul %83, %84, %cst_40 {dimension_numbers = #tpu.dot_dimension_numbers<[1], [0], [0], [1], [0, 0, 1, 1], [], []>} : vector<16x8xf32>, vector<8x32xf32>, vector<16x32xf32> -> vector<16x32xf32>
    %86 = arith.addf %65, %85 : vector<16x32xf32>
    %87 = vector.extract_strided_slice %18 {offsets = [0, 0, 24], sizes = [2, 8, 8], strides = [1, 1, 1]} : vector<2x8x32xf32> to vector<2x8x8xf32>
    %88 = vector.extract_strided_slice %20 {offsets = [0, 0, 24], sizes = [2, 8, 8], strides = [1, 1, 1]} : vector<2x8x32xf32> to vector<2x8x8xf32>
    "tpu.trace_start"() <{level = 10 : i32, message = "bqd,bkd->bqk"}> : () -> ()
    %cst_41 = arith.constant dense<0.000000e+00> : vector<2x8x8xf32>
    %89 = tpu.matmul %87, %88, %cst_41 {dimension_numbers = #tpu.dot_dimension_numbers<[2], [2], [1], [1], [0, 0, 0, 1, 1, 1], [0], [0]>} : vector<2x8x8xf32>, vector<2x8x8xf32>, vector<2x8x8xf32> -> vector<2x8x8xf32>
    "tpu.trace_stop"() : () -> ()
    %cst_42 = arith.constant 0.353553385 : f32
    %90 = vector.broadcast %cst_42 : f32 to vector<2x8x8xf32>
    %91 = arith.mulf %89, %90 : vector<2x8x8xf32>
    %cst_43 = arith.constant dense<0xFF800000> : vector<2x8xf32>
    %92 = vector.multi_reduction <maximumf>, %91, %cst_43 [2] : vector<2x8x8xf32> to vector<2x8xf32>
    %93 = vector.shape_cast %92 : vector<2x8xf32> to vector<2x8x1xf32>
    %94 = vector.broadcast %93 : vector<2x8x1xf32> to vector<2x8x8xf32>
    %95 = arith.subf %91, %94 : vector<2x8x8xf32>
    %96 = math.exp %95 : vector<2x8x8xf32>
    %cst_44 = arith.constant dense<0.000000e+00> : vector<2x8xf32>
    %97 = vector.multi_reduction <add>, %96, %cst_44 [2] : vector<2x8x8xf32> to vector<2x8xf32>
    %98 = vector.shape_cast %97 : vector<2x8xf32> to vector<2x8x1xf32>
    %99 = tpu.reciprocal %98 {approx = true} : vector<2x8x1xf32> -> vector<2x8x1xf32>
    %100 = vector.broadcast %99 : vector<2x8x1xf32> to vector<2x8x8xf32>
    %101 = arith.mulf %96, %100 : vector<2x8x8xf32>
    %102 = vector.extract_strided_slice %22 {offsets = [0, 0, 24], sizes = [2, 8, 8], strides = [1, 1, 1]} : vector<2x8x32xf32> to vector<2x8x8xf32>
    "tpu.trace_start"() <{level = 10 : i32, message = "bqk,bkd->bqd"}> : () -> ()
    %cst_45 = arith.constant dense<0.000000e+00> : vector<2x8x8xf32>
    %103 = tpu.matmul %101, %102, %cst_45 {dimension_numbers = #tpu.dot_dimension_numbers<[2], [1], [1], [2], [0, 0, 0, 1, 1, 2], [0], [0]>} : vector<2x8x8xf32>, vector<2x8x8xf32>, vector<2x8x8xf32> -> vector<2x8x8xf32>
    "tpu.trace_stop"() : () -> ()
    %104 = vector.shape_cast %103 : vector<2x8x8xf32> to vector<16x8xf32>
    %105 = vector.extract_strided_slice %10 {offsets = [24, 0], sizes = [8, 32], strides = [1, 1]} : vector<32x32xf32> to vector<8x32xf32>
    %cst_46 = arith.constant dense<0.000000e+00> : vector<16x32xf32>
    %106 = tpu.matmul %104, %105, %cst_46 {dimension_numbers = #tpu.dot_dimension_numbers<[1], [0], [0], [1], [0, 0, 1, 1], [], []>} : vector<16x8xf32>, vector<8x32xf32>, vector<16x32xf32> -> vector<16x32xf32>
    %107 = arith.addf %86, %106 : vector<16x32xf32>
    %108 = vector.shape_cast %107 : vector<16x32xf32> to vector<2x8x32xf32>
    %109 = vector.shape_cast %12 : vector<1x32xf32> to vector<1x1x32xf32>
    %110 = vector.broadcast %109 : vector<1x1x32xf32> to vector<2x8x32xf32>
    %111 = arith.addf %108, %110 : vector<2x8x32xf32>
    %112 = arith.addf %4, %111 : vector<2x8x32xf32>
    %c0_47 = arith.constant 0 : index
    %c0_48 = arith.constant 0 : index
    %c0_49 = arith.constant 0 : index
    %113 = vector.load %arg6[%c0_47, %c0_48, %c0_49] : memref<2x1x32xf32, #tpu.memory_space<vmem>>, vector<1x1x32xf32>
    %114 = vector.shape_cast %113 : vector<1x1x32xf32> to vector<1x32xf32>
    %c0_50 = arith.constant 0 : index
    %c0_51 = arith.constant 0 : index
    %c0_52 = arith.constant 0 : index
    %115 = vector.load %arg7[%c0_50, %c0_51, %c0_52] : memref<2x1x32xf32, #tpu.memory_space<vmem>>, vector<1x1x32xf32>
    %116 = vector.shape_cast %115 : vector<1x1x32xf32> to vector<1x32xf32>
    %cst_53 = arith.constant dense<0.000000e+00> : vector<2x8xf32>
    %117 = vector.multi_reduction <add>, %112, %cst_53 [2] : vector<2x8x32xf32> to vector<2x8xf32>
    %118 = vector.shape_cast %117 : vector<2x8xf32> to vector<2x8x1xf32>
    %cst_54 = arith.constant 3.200000e+01 : f32
    %119 = vector.broadcast %cst_54 : f32 to vector<2x8x1xf32>
    %120 = arith.divf %118, %119 : vector<2x8x1xf32>
    %121 = vector.broadcast %120 : vector<2x8x1xf32> to vector<2x8x32xf32>
    %122 = arith.subf %112, %121 : vector<2x8x32xf32>
    %123 = arith.mulf %122, %122 : vector<2x8x32xf32>
    %cst_55 = arith.constant dense<0.000000e+00> : vector<2x8xf32>
    %124 = vector.multi_reduction <add>, %123, %cst_55 [2] : vector<2x8x32xf32> to vector<2x8xf32>
    %125 = vector.shape_cast %124 : vector<2x8xf32> to vector<2x8x1xf32>
    %cst_56 = arith.constant 3.200000e+01 : f32
    %126 = vector.broadcast %cst_56 : f32 to vector<2x8x1xf32>
    %127 = arith.divf %125, %126 : vector<2x8x1xf32>
    %128 = vector.broadcast %120 : vector<2x8x1xf32> to vector<2x8x32xf32>
    %129 = arith.subf %112, %128 : vector<2x8x32xf32>
    %cst_57 = arith.constant 9.99999974E-6 : f32
    %130 = vector.broadcast %cst_57 : f32 to vector<2x8x1xf32>
    %131 = arith.addf %127, %130 : vector<2x8x1xf32>
    %132 = math.rsqrt %131 : vector<2x8x1xf32>
    %133 = vector.broadcast %132 : vector<2x8x1xf32> to vector<2x8x32xf32>
    %134 = arith.mulf %129, %133 : vector<2x8x32xf32>
    %135 = vector.shape_cast %114 : vector<1x32xf32> to vector<1x1x32xf32>
    %136 = vector.broadcast %135 : vector<1x1x32xf32> to vector<2x8x32xf32>
    %137 = arith.mulf %134, %136 : vector<2x8x32xf32>
    %138 = vector.shape_cast %116 : vector<1x32xf32> to vector<1x1x32xf32>
    %139 = vector.broadcast %138 : vector<1x1x32xf32> to vector<2x8x32xf32>
    %140 = arith.addf %137, %139 : vector<2x8x32xf32>
    %141 = vector.shape_cast %140 : vector<2x8x32xf32> to vector<16x32xf32>
    %c0_58 = arith.constant 0 : index
    %c0_59 = arith.constant 0 : index
    %c0_60 = arith.constant 0 : index
    %142 = vector.load %arg8[%c0_58, %c0_59, %c0_60] : memref<2x32x64xf32, #tpu.memory_space<vmem>>, vector<1x32x64xf32>
    %143 = vector.shape_cast %142 : vector<1x32x64xf32> to vector<32x64xf32>
    %cst_61 = arith.constant dense<0.000000e+00> : vector<16x64xf32>
    %144 = tpu.matmul %141, %143, %cst_61 {dimension_numbers = #tpu.dot_dimension_numbers<[1], [0], [0], [1], [0, 0, 1, 1], [], []>} : vector<16x32xf32>, vector<32x64xf32>, vector<16x64xf32> -> vector<16x64xf32>
    %c0_62 = arith.constant 0 : index
    %c0_63 = arith.constant 0 : index
    %c0_64 = arith.constant 0 : index
    %145 = vector.load %arg9[%c0_62, %c0_63, %c0_64] : memref<2x1x64xf32, #tpu.memory_space<vmem>>, vector<1x1x64xf32>
    %146 = vector.shape_cast %145 : vector<1x1x64xf32> to vector<1x64xf32>
    %147 = vector.broadcast %146 : vector<1x64xf32> to vector<16x64xf32>
    %148 = arith.addf %144, %147 : vector<16x64xf32>
    %cst_65 = arith.constant 0.000000e+00 : f32
    %149 = vector.broadcast %cst_65 : f32 to vector<16x64xf32>
    %150 = arith.maximumf %148, %149 : vector<16x64xf32>
    %c0_66 = arith.constant 0 : index
    %c0_67 = arith.constant 0 : index
    %c0_68 = arith.constant 0 : index
    %151 = vector.load %arg10[%c0_66, %c0_67, %c0_68] : memref<2x64x32xf32, #tpu.memory_space<vmem>>, vector<1x64x32xf32>
    %152 = vector.shape_cast %151 : vector<1x64x32xf32> to vector<64x32xf32>
    %cst_69 = arith.constant dense<0.000000e+00> : vector<16x32xf32>
    %153 = tpu.matmul %150, %152, %cst_69 {dimension_numbers = #tpu.dot_dimension_numbers<[1], [0], [0], [1], [0, 0, 1, 1], [], []>} : vector<16x64xf32>, vector<64x32xf32>, vector<16x32xf32> -> vector<16x32xf32>
    %c0_70 = arith.constant 0 : index
    %c0_71 = arith.constant 0 : index
    %c0_72 = arith.constant 0 : index
    %154 = vector.load %arg11[%c0_70, %c0_71, %c0_72] : memref<2x1x32xf32, #tpu.memory_space<vmem>>, vector<1x1x32xf32>
    %155 = vector.shape_cast %154 : vector<1x1x32xf32> to vector<1x32xf32>
    %156 = vector.broadcast %155 : vector<1x32xf32> to vector<16x32xf32>
    %157 = arith.addf %153, %156 : vector<16x32xf32>
    %158 = vector.shape_cast %157 : vector<16x32xf32> to vector<2x8x32xf32>
    %159 = arith.addf %140, %158 : vector<2x8x32xf32>
    %c0_73 = arith.constant 0 : index
    %c0_74 = arith.constant 0 : index
    %c0_75 = arith.constant 0 : index
    %160 = vector.load %arg12[%c0_73, %c0_74, %c0_75] : memref<2x1x32xf32, #tpu.memory_space<vmem>>, vector<1x1x32xf32>
    %161 = vector.shape_cast %160 : vector<1x1x32xf32> to vector<1x32xf32>
    %c0_76 = arith.constant 0 : index
    %c0_77 = arith.constant 0 : index
    %c0_78 = arith.constant 0 : index
    %162 = vector.load %arg13[%c0_76, %c0_77, %c0_78] : memref<2x1x32xf32, #tpu.memory_space<vmem>>, vector<1x1x32xf32>
    %163 = vector.shape_cast %162 : vector<1x1x32xf32> to vector<1x32xf32>
    %cst_79 = arith.constant dense<0.000000e+00> : vector<2x8xf32>
    %164 = vector.multi_reduction <add>, %159, %cst_79 [2] : vector<2x8x32xf32> to vector<2x8xf32>
    %165 = vector.shape_cast %164 : vector<2x8xf32> to vector<2x8x1xf32>
    %cst_80 = arith.constant 3.200000e+01 : f32
    %166 = vector.broadcast %cst_80 : f32 to vector<2x8x1xf32>
    %167 = arith.divf %165, %166 : vector<2x8x1xf32>
    %168 = vector.broadcast %167 : vector<2x8x1xf32> to vector<2x8x32xf32>
    %169 = arith.subf %159, %168 : vector<2x8x32xf32>
    %170 = arith.mulf %169, %169 : vector<2x8x32xf32>
    %cst_81 = arith.constant dense<0.000000e+00> : vector<2x8xf32>
    %171 = vector.multi_reduction <add>, %170, %cst_81 [2] : vector<2x8x32xf32> to vector<2x8xf32>
    %172 = vector.shape_cast %171 : vector<2x8xf32> to vector<2x8x1xf32>
    %cst_82 = arith.constant 3.200000e+01 : f32
    %173 = vector.broadcast %cst_82 : f32 to vector<2x8x1xf32>
    %174 = arith.divf %172, %173 : vector<2x8x1xf32>
    %175 = vector.broadcast %167 : vector<2x8x1xf32> to vector<2x8x32xf32>
    %176 = arith.subf %159, %175 : vector<2x8x32xf32>
    %cst_83 = arith.constant 9.99999974E-6 : f32
    %177 = vector.broadcast %cst_83 : f32 to vector<2x8x1xf32>
    %178 = arith.addf %174, %177 : vector<2x8x1xf32>
    %179 = math.rsqrt %178 : vector<2x8x1xf32>
    %180 = vector.broadcast %179 : vector<2x8x1xf32> to vector<2x8x32xf32>
    %181 = arith.mulf %176, %180 : vector<2x8x32xf32>
    %182 = vector.shape_cast %161 : vector<1x32xf32> to vector<1x1x32xf32>
    %183 = vector.broadcast %182 : vector<1x1x32xf32> to vector<2x8x32xf32>
    %184 = arith.mulf %181, %183 : vector<2x8x32xf32>
    %185 = vector.shape_cast %163 : vector<1x32xf32> to vector<1x1x32xf32>
    %186 = vector.broadcast %185 : vector<1x1x32xf32> to vector<2x8x32xf32>
    %187 = arith.addf %184, %186 : vector<2x8x32xf32>
    %c1 = arith.constant 1 : index
    %c0_84 = arith.constant 0 : index
    %c0_85 = arith.constant 0 : index
    %188 = vector.load %arg2[%c1, %c0_84, %c0_85] : memref<2x32x96xf32, #tpu.memory_space<vmem>>, vector<1x32x96xf32>
    %189 = vector.shape_cast %188 : vector<1x32x96xf32> to vector<32x96xf32>
    %c1_86 = arith.constant 1 : index
    %c0_87 = arith.constant 0 : index
    %c0_88 = arith.constant 0 : index
    %190 = vector.load %arg3[%c1_86, %c0_87, %c0_88] : memref<2x1x96xf32, #tpu.memory_space<vmem>>, vector<1x1x96xf32>
    %191 = vector.shape_cast %190 : vector<1x1x96xf32> to vector<1x96xf32>
    %c1_89 = arith.constant 1 : index
    %c0_90 = arith.constant 0 : index
    %c0_91 = arith.constant 0 : index
    %192 = vector.load %arg4[%c1_89, %c0_90, %c0_91] : memref<2x32x32xf32, #tpu.memory_space<vmem>>, vector<1x32x32xf32>
    %193 = vector.shape_cast %192 : vector<1x32x32xf32> to vector<32x32xf32>
    %c1_92 = arith.constant 1 : index
    %c0_93 = arith.constant 0 : index
    %c0_94 = arith.constant 0 : index
    %194 = vector.load %arg5[%c1_92, %c0_93, %c0_94] : memref<2x1x32xf32, #tpu.memory_space<vmem>>, vector<1x1x32xf32>
    %195 = vector.shape_cast %194 : vector<1x1x32xf32> to vector<1x32xf32>
    %196 = vector.shape_cast %187 : vector<2x8x32xf32> to vector<16x32xf32>
    %cst_95 = arith.constant dense<0.000000e+00> : vector<16x96xf32>
    %197 = tpu.matmul %196, %189, %cst_95 {dimension_numbers = #tpu.dot_dimension_numbers<[1], [0], [0], [1], [0, 0, 1, 1], [], []>} : vector<16x32xf32>, vector<32x96xf32>, vector<16x96xf32> -> vector<16x96xf32>
    %198 = vector.broadcast %191 : vector<1x96xf32> to vector<16x96xf32>
    %199 = arith.addf %197, %198 : vector<16x96xf32>
    %200 = vector.extract_strided_slice %199 {offsets = [0, 0], sizes = [16, 32], strides = [1, 1]} : vector<16x96xf32> to vector<16x32xf32>
    %201 = vector.shape_cast %200 : vector<16x32xf32> to vector<2x8x32xf32>
    %202 = vector.extract_strided_slice %199 {offsets = [0, 32], sizes = [16, 32], strides = [1, 1]} : vector<16x96xf32> to vector<16x32xf32>
    %203 = vector.shape_cast %202 : vector<16x32xf32> to vector<2x8x32xf32>
    %204 = vector.extract_strided_slice %199 {offsets = [0, 64], sizes = [16, 32], strides = [1, 1]} : vector<16x96xf32> to vector<16x32xf32>
    %205 = vector.shape_cast %204 : vector<16x32xf32> to vector<2x8x32xf32>
    %cst_96 = arith.constant 0.000000e+00 : f32
    %206 = vector.broadcast %cst_96 : f32 to vector<16x32xf32>
    %207 = vector.extract_strided_slice %201 {offsets = [0, 0, 0], sizes = [2, 8, 8], strides = [1, 1, 1]} : vector<2x8x32xf32> to vector<2x8x8xf32>
    %208 = vector.extract_strided_slice %203 {offsets = [0, 0, 0], sizes = [2, 8, 8], strides = [1, 1, 1]} : vector<2x8x32xf32> to vector<2x8x8xf32>
    "tpu.trace_start"() <{level = 10 : i32, message = "bqd,bkd->bqk"}> : () -> ()
    %cst_97 = arith.constant dense<0.000000e+00> : vector<2x8x8xf32>
    %209 = tpu.matmul %207, %208, %cst_97 {dimension_numbers = #tpu.dot_dimension_numbers<[2], [2], [1], [1], [0, 0, 0, 1, 1, 1], [0], [0]>} : vector<2x8x8xf32>, vector<2x8x8xf32>, vector<2x8x8xf32> -> vector<2x8x8xf32>
    "tpu.trace_stop"() : () -> ()
    %cst_98 = arith.constant 0.353553385 : f32
    %210 = vector.broadcast %cst_98 : f32 to vector<2x8x8xf32>
    %211 = arith.mulf %209, %210 : vector<2x8x8xf32>
    %cst_99 = arith.constant dense<0xFF800000> : vector<2x8xf32>
    %212 = vector.multi_reduction <maximumf>, %211, %cst_99 [2] : vector<2x8x8xf32> to vector<2x8xf32>
    %213 = vector.shape_cast %212 : vector<2x8xf32> to vector<2x8x1xf32>
    %214 = vector.broadcast %213 : vector<2x8x1xf32> to vector<2x8x8xf32>
    %215 = arith.subf %211, %214 : vector<2x8x8xf32>
    %216 = math.exp %215 : vector<2x8x8xf32>
    %cst_100 = arith.constant dense<0.000000e+00> : vector<2x8xf32>
    %217 = vector.multi_reduction <add>, %216, %cst_100 [2] : vector<2x8x8xf32> to vector<2x8xf32>
    %218 = vector.shape_cast %217 : vector<2x8xf32> to vector<2x8x1xf32>
    %219 = tpu.reciprocal %218 {approx = true} : vector<2x8x1xf32> -> vector<2x8x1xf32>
    %220 = vector.broadcast %219 : vector<2x8x1xf32> to vector<2x8x8xf32>
    %221 = arith.mulf %216, %220 : vector<2x8x8xf32>
    %222 = vector.extract_strided_slice %205 {offsets = [0, 0, 0], sizes = [2, 8, 8], strides = [1, 1, 1]} : vector<2x8x32xf32> to vector<2x8x8xf32>
    "tpu.trace_start"() <{level = 10 : i32, message = "bqk,bkd->bqd"}> : () -> ()
    %cst_101 = arith.constant dense<0.000000e+00> : vector<2x8x8xf32>
    %223 = tpu.matmul %221, %222, %cst_101 {dimension_numbers = #tpu.dot_dimension_numbers<[2], [1], [1], [2], [0, 0, 0, 1, 1, 2], [0], [0]>} : vector<2x8x8xf32>, vector<2x8x8xf32>, vector<2x8x8xf32> -> vector<2x8x8xf32>
    "tpu.trace_stop"() : () -> ()
    %224 = vector.shape_cast %223 : vector<2x8x8xf32> to vector<16x8xf32>
    %225 = vector.extract_strided_slice %193 {offsets = [0, 0], sizes = [8, 32], strides = [1, 1]} : vector<32x32xf32> to vector<8x32xf32>
    %cst_102 = arith.constant dense<0.000000e+00> : vector<16x32xf32>
    %226 = tpu.matmul %224, %225, %cst_102 {dimension_numbers = #tpu.dot_dimension_numbers<[1], [0], [0], [1], [0, 0, 1, 1], [], []>} : vector<16x8xf32>, vector<8x32xf32>, vector<16x32xf32> -> vector<16x32xf32>
    %227 = arith.addf %206, %226 : vector<16x32xf32>
    %228 = vector.extract_strided_slice %201 {offsets = [0, 0, 8], sizes = [2, 8, 8], strides = [1, 1, 1]} : vector<2x8x32xf32> to vector<2x8x8xf32>
    %229 = vector.extract_strided_slice %203 {offsets = [0, 0, 8], sizes = [2, 8, 8], strides = [1, 1, 1]} : vector<2x8x32xf32> to vector<2x8x8xf32>
    "tpu.trace_start"() <{level = 10 : i32, message = "bqd,bkd->bqk"}> : () -> ()
    %cst_103 = arith.constant dense<0.000000e+00> : vector<2x8x8xf32>
    %230 = tpu.matmul %228, %229, %cst_103 {dimension_numbers = #tpu.dot_dimension_numbers<[2], [2], [1], [1], [0, 0, 0, 1, 1, 1], [0], [0]>} : vector<2x8x8xf32>, vector<2x8x8xf32>, vector<2x8x8xf32> -> vector<2x8x8xf32>
    "tpu.trace_stop"() : () -> ()
    %cst_104 = arith.constant 0.353553385 : f32
    %231 = vector.broadcast %cst_104 : f32 to vector<2x8x8xf32>
    %232 = arith.mulf %230, %231 : vector<2x8x8xf32>
    %cst_105 = arith.constant dense<0xFF800000> : vector<2x8xf32>
    %233 = vector.multi_reduction <maximumf>, %232, %cst_105 [2] : vector<2x8x8xf32> to vector<2x8xf32>
    %234 = vector.shape_cast %233 : vector<2x8xf32> to vector<2x8x1xf32>
    %235 = vector.broadcast %234 : vector<2x8x1xf32> to vector<2x8x8xf32>
    %236 = arith.subf %232, %235 : vector<2x8x8xf32>
    %237 = math.exp %236 : vector<2x8x8xf32>
    %cst_106 = arith.constant dense<0.000000e+00> : vector<2x8xf32>
    %238 = vector.multi_reduction <add>, %237, %cst_106 [2] : vector<2x8x8xf32> to vector<2x8xf32>
    %239 = vector.shape_cast %238 : vector<2x8xf32> to vector<2x8x1xf32>
    %240 = tpu.reciprocal %239 {approx = true} : vector<2x8x1xf32> -> vector<2x8x1xf32>
    %241 = vector.broadcast %240 : vector<2x8x1xf32> to vector<2x8x8xf32>
    %242 = arith.mulf %237, %241 : vector<2x8x8xf32>
    %243 = vector.extract_strided_slice %205 {offsets = [0, 0, 8], sizes = [2, 8, 8], strides = [1, 1, 1]} : vector<2x8x32xf32> to vector<2x8x8xf32>
    "tpu.trace_start"() <{level = 10 : i32, message = "bqk,bkd->bqd"}> : () -> ()
    %cst_107 = arith.constant dense<0.000000e+00> : vector<2x8x8xf32>
    %244 = tpu.matmul %242, %243, %cst_107 {dimension_numbers = #tpu.dot_dimension_numbers<[2], [1], [1], [2], [0, 0, 0, 1, 1, 2], [0], [0]>} : vector<2x8x8xf32>, vector<2x8x8xf32>, vector<2x8x8xf32> -> vector<2x8x8xf32>
    "tpu.trace_stop"() : () -> ()
    %245 = vector.shape_cast %244 : vector<2x8x8xf32> to vector<16x8xf32>
    %246 = vector.extract_strided_slice %193 {offsets = [8, 0], sizes = [8, 32], strides = [1, 1]} : vector<32x32xf32> to vector<8x32xf32>
    %cst_108 = arith.constant dense<0.000000e+00> : vector<16x32xf32>
    %247 = tpu.matmul %245, %246, %cst_108 {dimension_numbers = #tpu.dot_dimension_numbers<[1], [0], [0], [1], [0, 0, 1, 1], [], []>} : vector<16x8xf32>, vector<8x32xf32>, vector<16x32xf32> -> vector<16x32xf32>
    %248 = arith.addf %227, %247 : vector<16x32xf32>
    %249 = vector.extract_strided_slice %201 {offsets = [0, 0, 16], sizes = [2, 8, 8], strides = [1, 1, 1]} : vector<2x8x32xf32> to vector<2x8x8xf32>
    %250 = vector.extract_strided_slice %203 {offsets = [0, 0, 16], sizes = [2, 8, 8], strides = [1, 1, 1]} : vector<2x8x32xf32> to vector<2x8x8xf32>
    "tpu.trace_start"() <{level = 10 : i32, message = "bqd,bkd->bqk"}> : () -> ()
    %cst_109 = arith.constant dense<0.000000e+00> : vector<2x8x8xf32>
    %251 = tpu.matmul %249, %250, %cst_109 {dimension_numbers = #tpu.dot_dimension_numbers<[2], [2], [1], [1], [0, 0, 0, 1, 1, 1], [0], [0]>} : vector<2x8x8xf32>, vector<2x8x8xf32>, vector<2x8x8xf32> -> vector<2x8x8xf32>
    "tpu.trace_stop"() : () -> ()
    %cst_110 = arith.constant 0.353553385 : f32
    %252 = vector.broadcast %cst_110 : f32 to vector<2x8x8xf32>
    %253 = arith.mulf %251, %252 : vector<2x8x8xf32>
    %cst_111 = arith.constant dense<0xFF800000> : vector<2x8xf32>
    %254 = vector.multi_reduction <maximumf>, %253, %cst_111 [2] : vector<2x8x8xf32> to vector<2x8xf32>
    %255 = vector.shape_cast %254 : vector<2x8xf32> to vector<2x8x1xf32>
    %256 = vector.broadcast %255 : vector<2x8x1xf32> to vector<2x8x8xf32>
    %257 = arith.subf %253, %256 : vector<2x8x8xf32>
    %258 = math.exp %257 : vector<2x8x8xf32>
    %cst_112 = arith.constant dense<0.000000e+00> : vector<2x8xf32>
    %259 = vector.multi_reduction <add>, %258, %cst_112 [2] : vector<2x8x8xf32> to vector<2x8xf32>
    %260 = vector.shape_cast %259 : vector<2x8xf32> to vector<2x8x1xf32>
    %261 = tpu.reciprocal %260 {approx = true} : vector<2x8x1xf32> -> vector<2x8x1xf32>
    %262 = vector.broadcast %261 : vector<2x8x1xf32> to vector<2x8x8xf32>
    %263 = arith.mulf %258, %262 : vector<2x8x8xf32>
    %264 = vector.extract_strided_slice %205 {offsets = [0, 0, 16], sizes = [2, 8, 8], strides = [1, 1, 1]} : vector<2x8x32xf32> to vector<2x8x8xf32>
    "tpu.trace_start"() <{level = 10 : i32, message = "bqk,bkd->bqd"}> : () -> ()
    %cst_113 = arith.constant dense<0.000000e+00> : vector<2x8x8xf32>
    %265 = tpu.matmul %263, %264, %cst_113 {dimension_numbers = #tpu.dot_dimension_numbers<[2], [1], [1], [2], [0, 0, 0, 1, 1, 2], [0], [0]>} : vector<2x8x8xf32>, vector<2x8x8xf32>, vector<2x8x8xf32> -> vector<2x8x8xf32>
    "tpu.trace_stop"() : () -> ()
    %266 = vector.shape_cast %265 : vector<2x8x8xf32> to vector<16x8xf32>
    %267 = vector.extract_strided_slice %193 {offsets = [16, 0], sizes = [8, 32], strides = [1, 1]} : vector<32x32xf32> to vector<8x32xf32>
    %cst_114 = arith.constant dense<0.000000e+00> : vector<16x32xf32>
    %268 = tpu.matmul %266, %267, %cst_114 {dimension_numbers = #tpu.dot_dimension_numbers<[1], [0], [0], [1], [0, 0, 1, 1], [], []>} : vector<16x8xf32>, vector<8x32xf32>, vector<16x32xf32> -> vector<16x32xf32>
    %269 = arith.addf %248, %268 : vector<16x32xf32>
    %270 = vector.extract_strided_slice %201 {offsets = [0, 0, 24], sizes = [2, 8, 8], strides = [1, 1, 1]} : vector<2x8x32xf32> to vector<2x8x8xf32>
    %271 = vector.extract_strided_slice %203 {offsets = [0, 0, 24], sizes = [2, 8, 8], strides = [1, 1, 1]} : vector<2x8x32xf32> to vector<2x8x8xf32>
    "tpu.trace_start"() <{level = 10 : i32, message = "bqd,bkd->bqk"}> : () -> ()
    %cst_115 = arith.constant dense<0.000000e+00> : vector<2x8x8xf32>
    %272 = tpu.matmul %270, %271, %cst_115 {dimension_numbers = #tpu.dot_dimension_numbers<[2], [2], [1], [1], [0, 0, 0, 1, 1, 1], [0], [0]>} : vector<2x8x8xf32>, vector<2x8x8xf32>, vector<2x8x8xf32> -> vector<2x8x8xf32>
    "tpu.trace_stop"() : () -> ()
    %cst_116 = arith.constant 0.353553385 : f32
    %273 = vector.broadcast %cst_116 : f32 to vector<2x8x8xf32>
    %274 = arith.mulf %272, %273 : vector<2x8x8xf32>
    %cst_117 = arith.constant dense<0xFF800000> : vector<2x8xf32>
    %275 = vector.multi_reduction <maximumf>, %274, %cst_117 [2] : vector<2x8x8xf32> to vector<2x8xf32>
    %276 = vector.shape_cast %275 : vector<2x8xf32> to vector<2x8x1xf32>
    %277 = vector.broadcast %276 : vector<2x8x1xf32> to vector<2x8x8xf32>
    %278 = arith.subf %274, %277 : vector<2x8x8xf32>
    %279 = math.exp %278 : vector<2x8x8xf32>
    %cst_118 = arith.constant dense<0.000000e+00> : vector<2x8xf32>
    %280 = vector.multi_reduction <add>, %279, %cst_118 [2] : vector<2x8x8xf32> to vector<2x8xf32>
    %281 = vector.shape_cast %280 : vector<2x8xf32> to vector<2x8x1xf32>
    %282 = tpu.reciprocal %281 {approx = true} : vector<2x8x1xf32> -> vector<2x8x1xf32>
    %283 = vector.broadcast %282 : vector<2x8x1xf32> to vector<2x8x8xf32>
    %284 = arith.mulf %279, %283 : vector<2x8x8xf32>
    %285 = vector.extract_strided_slice %205 {offsets = [0, 0, 24], sizes = [2, 8, 8], strides = [1, 1, 1]} : vector<2x8x32xf32> to vector<2x8x8xf32>
    "tpu.trace_start"() <{level = 10 : i32, message = "bqk,bkd->bqd"}> : () -> ()
    %cst_119 = arith.constant dense<0.000000e+00> : vector<2x8x8xf32>
    %286 = tpu.matmul %284, %285, %cst_119 {dimension_numbers = #tpu.dot_dimension_numbers<[2], [1], [1], [2], [0, 0, 0, 1, 1, 2], [0], [0]>} : vector<2x8x8xf32>, vector<2x8x8xf32>, vector<2x8x8xf32> -> vector<2x8x8xf32>
    "tpu.trace_stop"() : () -> ()
    %287 = vector.shape_cast %286 : vector<2x8x8xf32> to vector<16x8xf32>
    %288 = vector.extract_strided_slice %193 {offsets = [24, 0], sizes = [8, 32], strides = [1, 1]} : vector<32x32xf32> to vector<8x32xf32>
    %cst_120 = arith.constant dense<0.000000e+00> : vector<16x32xf32>
    %289 = tpu.matmul %287, %288, %cst_120 {dimension_numbers = #tpu.dot_dimension_numbers<[1], [0], [0], [1], [0, 0, 1, 1], [], []>} : vector<16x8xf32>, vector<8x32xf32>, vector<16x32xf32> -> vector<16x32xf32>
    %290 = arith.addf %269, %289 : vector<16x32xf32>
    %291 = vector.shape_cast %290 : vector<16x32xf32> to vector<2x8x32xf32>
    %292 = vector.shape_cast %195 : vector<1x32xf32> to vector<1x1x32xf32>
    %293 = vector.broadcast %292 : vector<1x1x32xf32> to vector<2x8x32xf32>
    %294 = arith.addf %291, %293 : vector<2x8x32xf32>
    %295 = arith.addf %187, %294 : vector<2x8x32xf32>
    %c1_121 = arith.constant 1 : index
    %c0_122 = arith.constant 0 : index
    %c0_123 = arith.constant 0 : index
    %296 = vector.load %arg6[%c1_121, %c0_122, %c0_123] : memref<2x1x32xf32, #tpu.memory_space<vmem>>, vector<1x1x32xf32>
    %297 = vector.shape_cast %296 : vector<1x1x32xf32> to vector<1x32xf32>
    %c1_124 = arith.constant 1 : index
    %c0_125 = arith.constant 0 : index
    %c0_126 = arith.constant 0 : index
    %298 = vector.load %arg7[%c1_124, %c0_125, %c0_126] : memref<2x1x32xf32, #tpu.memory_space<vmem>>, vector<1x1x32xf32>
    %299 = vector.shape_cast %298 : vector<1x1x32xf32> to vector<1x32xf32>
    %cst_127 = arith.constant dense<0.000000e+00> : vector<2x8xf32>
    %300 = vector.multi_reduction <add>, %295, %cst_127 [2] : vector<2x8x32xf32> to vector<2x8xf32>
    %301 = vector.shape_cast %300 : vector<2x8xf32> to vector<2x8x1xf32>
    %cst_128 = arith.constant 3.200000e+01 : f32
    %302 = vector.broadcast %cst_128 : f32 to vector<2x8x1xf32>
    %303 = arith.divf %301, %302 : vector<2x8x1xf32>
    %304 = vector.broadcast %303 : vector<2x8x1xf32> to vector<2x8x32xf32>
    %305 = arith.subf %295, %304 : vector<2x8x32xf32>
    %306 = arith.mulf %305, %305 : vector<2x8x32xf32>
    %cst_129 = arith.constant dense<0.000000e+00> : vector<2x8xf32>
    %307 = vector.multi_reduction <add>, %306, %cst_129 [2] : vector<2x8x32xf32> to vector<2x8xf32>
    %308 = vector.shape_cast %307 : vector<2x8xf32> to vector<2x8x1xf32>
    %cst_130 = arith.constant 3.200000e+01 : f32
    %309 = vector.broadcast %cst_130 : f32 to vector<2x8x1xf32>
    %310 = arith.divf %308, %309 : vector<2x8x1xf32>
    %311 = vector.broadcast %303 : vector<2x8x1xf32> to vector<2x8x32xf32>
    %312 = arith.subf %295, %311 : vector<2x8x32xf32>
    %cst_131 = arith.constant 9.99999974E-6 : f32
    %313 = vector.broadcast %cst_131 : f32 to vector<2x8x1xf32>
    %314 = arith.addf %310, %313 : vector<2x8x1xf32>
    %315 = math.rsqrt %314 : vector<2x8x1xf32>
    %316 = vector.broadcast %315 : vector<2x8x1xf32> to vector<2x8x32xf32>
    %317 = arith.mulf %312, %316 : vector<2x8x32xf32>
    %318 = vector.shape_cast %297 : vector<1x32xf32> to vector<1x1x32xf32>
    %319 = vector.broadcast %318 : vector<1x1x32xf32> to vector<2x8x32xf32>
    %320 = arith.mulf %317, %319 : vector<2x8x32xf32>
    %321 = vector.shape_cast %299 : vector<1x32xf32> to vector<1x1x32xf32>
    %322 = vector.broadcast %321 : vector<1x1x32xf32> to vector<2x8x32xf32>
    %323 = arith.addf %320, %322 : vector<2x8x32xf32>
    %324 = vector.shape_cast %323 : vector<2x8x32xf32> to vector<16x32xf32>
    %c1_132 = arith.constant 1 : index
    %c0_133 = arith.constant 0 : index
    %c0_134 = arith.constant 0 : index
    %325 = vector.load %arg8[%c1_132, %c0_133, %c0_134] : memref<2x32x64xf32, #tpu.memory_space<vmem>>, vector<1x32x64xf32>
    %326 = vector.shape_cast %325 : vector<1x32x64xf32> to vector<32x64xf32>
    %cst_135 = arith.constant dense<0.000000e+00> : vector<16x64xf32>
    %327 = tpu.matmul %324, %326, %cst_135 {dimension_numbers = #tpu.dot_dimension_numbers<[1], [0], [0], [1], [0, 0, 1, 1], [], []>} : vector<16x32xf32>, vector<32x64xf32>, vector<16x64xf32> -> vector<16x64xf32>
    %c1_136 = arith.constant 1 : index
    %c0_137 = arith.constant 0 : index
    %c0_138 = arith.constant 0 : index
    %328 = vector.load %arg9[%c1_136, %c0_137, %c0_138] : memref<2x1x64xf32, #tpu.memory_space<vmem>>, vector<1x1x64xf32>
    %329 = vector.shape_cast %328 : vector<1x1x64xf32> to vector<1x64xf32>
    %330 = vector.broadcast %329 : vector<1x64xf32> to vector<16x64xf32>
    %331 = arith.addf %327, %330 : vector<16x64xf32>
    %cst_139 = arith.constant 0.000000e+00 : f32
    %332 = vector.broadcast %cst_139 : f32 to vector<16x64xf32>
    %333 = arith.maximumf %331, %332 : vector<16x64xf32>
    %c1_140 = arith.constant 1 : index
    %c0_141 = arith.constant 0 : index
    %c0_142 = arith.constant 0 : index
    %334 = vector.load %arg10[%c1_140, %c0_141, %c0_142] : memref<2x64x32xf32, #tpu.memory_space<vmem>>, vector<1x64x32xf32>
    %335 = vector.shape_cast %334 : vector<1x64x32xf32> to vector<64x32xf32>
    %cst_143 = arith.constant dense<0.000000e+00> : vector<16x32xf32>
    %336 = tpu.matmul %333, %335, %cst_143 {dimension_numbers = #tpu.dot_dimension_numbers<[1], [0], [0], [1], [0, 0, 1, 1], [], []>} : vector<16x64xf32>, vector<64x32xf32>, vector<16x32xf32> -> vector<16x32xf32>
    %c1_144 = arith.constant 1 : index
    %c0_145 = arith.constant 0 : index
    %c0_146 = arith.constant 0 : index
    %337 = vector.load %arg11[%c1_144, %c0_145, %c0_146] : memref<2x1x32xf32, #tpu.memory_space<vmem>>, vector<1x1x32xf32>
    %338 = vector.shape_cast %337 : vector<1x1x32xf32> to vector<1x32xf32>
    %339 = vector.broadcast %338 : vector<1x32xf32> to vector<16x32xf32>
    %340 = arith.addf %336, %339 : vector<16x32xf32>
    %341 = vector.shape_cast %340 : vector<16x32xf32> to vector<2x8x32xf32>
    %342 = arith.addf %323, %341 : vector<2x8x32xf32>
    %c1_147 = arith.constant 1 : index
    %c0_148 = arith.constant 0 : index
    %c0_149 = arith.constant 0 : index
    %343 = vector.load %arg12[%c1_147, %c0_148, %c0_149] : memref<2x1x32xf32, #tpu.memory_space<vmem>>, vector<1x1x32xf32>
    %344 = vector.shape_cast %343 : vector<1x1x32xf32> to vector<1x32xf32>
    %c1_150 = arith.constant 1 : index
    %c0_151 = arith.constant 0 : index
    %c0_152 = arith.constant 0 : index
    %345 = vector.load %arg13[%c1_150, %c0_151, %c0_152] : memref<2x1x32xf32, #tpu.memory_space<vmem>>, vector<1x1x32xf32>
    %346 = vector.shape_cast %345 : vector<1x1x32xf32> to vector<1x32xf32>
    %cst_153 = arith.constant dense<0.000000e+00> : vector<2x8xf32>
    %347 = vector.multi_reduction <add>, %342, %cst_153 [2] : vector<2x8x32xf32> to vector<2x8xf32>
    %348 = vector.shape_cast %347 : vector<2x8xf32> to vector<2x8x1xf32>
    %cst_154 = arith.constant 3.200000e+01 : f32
    %349 = vector.broadcast %cst_154 : f32 to vector<2x8x1xf32>
    %350 = arith.divf %348, %349 : vector<2x8x1xf32>
    %351 = vector.broadcast %350 : vector<2x8x1xf32> to vector<2x8x32xf32>
    %352 = arith.subf %342, %351 : vector<2x8x32xf32>
    %353 = arith.mulf %352, %352 : vector<2x8x32xf32>
    %cst_155 = arith.constant dense<0.000000e+00> : vector<2x8xf32>
    %354 = vector.multi_reduction <add>, %353, %cst_155 [2] : vector<2x8x32xf32> to vector<2x8xf32>
    %355 = vector.shape_cast %354 : vector<2x8xf32> to vector<2x8x1xf32>
    %cst_156 = arith.constant 3.200000e+01 : f32
    %356 = vector.broadcast %cst_156 : f32 to vector<2x8x1xf32>
    %357 = arith.divf %355, %356 : vector<2x8x1xf32>
    %358 = vector.broadcast %350 : vector<2x8x1xf32> to vector<2x8x32xf32>
    %359 = arith.subf %342, %358 : vector<2x8x32xf32>
    %cst_157 = arith.constant 9.99999974E-6 : f32
    %360 = vector.broadcast %cst_157 : f32 to vector<2x8x1xf32>
    %361 = arith.addf %357, %360 : vector<2x8x1xf32>
    %362 = math.rsqrt %361 : vector<2x8x1xf32>
    %363 = vector.broadcast %362 : vector<2x8x1xf32> to vector<2x8x32xf32>
    %364 = arith.mulf %359, %363 : vector<2x8x32xf32>
    %365 = vector.shape_cast %344 : vector<1x32xf32> to vector<1x1x32xf32>
    %366 = vector.broadcast %365 : vector<1x1x32xf32> to vector<2x8x32xf32>
    %367 = arith.mulf %364, %366 : vector<2x8x32xf32>
    %368 = vector.shape_cast %346 : vector<1x32xf32> to vector<1x1x32xf32>
    %369 = vector.broadcast %368 : vector<1x1x32xf32> to vector<2x8x32xf32>
    %370 = arith.addf %367, %369 : vector<2x8x32xf32>
    %c0_158 = arith.constant 0 : index
    %c0_159 = arith.constant 0 : index
    %c0_160 = arith.constant 0 : index
    %371 = vector.load %arg1[%c0_158, %c0_159, %c0_160] : memref<2x8x32xf32, #tpu.memory_space<vmem>>, vector<2x8x32xf32>
    %372 = vector.shape_cast %370 : vector<2x8x32xf32> to vector<16x32xf32>
    %373 = vector.shape_cast %371 : vector<2x8x32xf32> to vector<16x32xf32>
    %374 = vector.extract_strided_slice %0 {offsets = [0, 0], sizes = [32, 32], strides = [1, 1]} : vector<32x96xf32> to vector<32x32xf32>
    %cst_161 = arith.constant dense<0.000000e+00> : vector<16x32xf32>
    %375 = tpu.matmul %372, %374, %cst_161 {dimension_numbers = #tpu.dot_dimension_numbers<[1], [0], [0], [1], [0, 0, 1, 1], [], []>} : vector<16x32xf32>, vector<32x32xf32>, vector<16x32xf32> -> vector<16x32xf32>
    %376 = vector.extract_strided_slice %1 {offsets = [0, 0], sizes = [1, 32], strides = [1, 1]} : vector<1x96xf32> to vector<1x32xf32>
    %377 = vector.broadcast %376 : vector<1x32xf32> to vector<16x32xf32>
    %378 = arith.addf %375, %377 : vector<16x32xf32>
    %379 = vector.shape_cast %378 : vector<16x32xf32> to vector<2x8x32xf32>
    %380 = vector.extract_strided_slice %0 {offsets = [0, 32], sizes = [32, 64], strides = [1, 1]} : vector<32x96xf32> to vector<32x64xf32>
    %cst_162 = arith.constant dense<0.000000e+00> : vector<16x64xf32>
    %381 = tpu.matmul %373, %380, %cst_162 {dimension_numbers = #tpu.dot_dimension_numbers<[1], [0], [0], [1], [0, 0, 1, 1], [], []>} : vector<16x32xf32>, vector<32x64xf32>, vector<16x64xf32> -> vector<16x64xf32>
    %382 = vector.extract_strided_slice %1 {offsets = [0, 32], sizes = [1, 64], strides = [1, 1]} : vector<1x96xf32> to vector<1x64xf32>
    %383 = vector.broadcast %382 : vector<1x64xf32> to vector<16x64xf32>
    %384 = arith.addf %381, %383 : vector<16x64xf32>
    %385 = vector.extract_strided_slice %384 {offsets = [0, 0], sizes = [16, 32], strides = [1, 1]} : vector<16x64xf32> to vector<16x32xf32>
    %386 = vector.shape_cast %385 : vector<16x32xf32> to vector<2x8x32xf32>
    %387 = vector.extract_strided_slice %384 {offsets = [0, 32], sizes = [16, 32], strides = [1, 1]} : vector<16x64xf32> to vector<16x32xf32>
    %388 = vector.shape_cast %387 : vector<16x32xf32> to vector<2x8x32xf32>
    %cst_163 = arith.constant 0.000000e+00 : f32
    %389 = vector.broadcast %cst_163 : f32 to vector<16x32xf32>
    %cst_164 = arith.constant 0.000000e+00 : f32
    %390 = vector.broadcast %cst_164 : f32 to vector<2x8x8xf32>
    %391 = vector.extract_strided_slice %379 {offsets = [0, 0, 0], sizes = [2, 8, 8], strides = [1, 1, 1]} : vector<2x8x32xf32> to vector<2x8x8xf32>
    %392 = vector.extract_strided_slice %386 {offsets = [0, 0, 0], sizes = [2, 8, 8], strides = [1, 1, 1]} : vector<2x8x32xf32> to vector<2x8x8xf32>
    "tpu.trace_start"() <{level = 10 : i32, message = "bqd,bkd->bqk"}> : () -> ()
    %cst_165 = arith.constant dense<0.000000e+00> : vector<2x8x8xf32>
    %393 = tpu.matmul %391, %392, %cst_165 {dimension_numbers = #tpu.dot_dimension_numbers<[2], [2], [1], [1], [0, 0, 0, 1, 1, 1], [0], [0]>} : vector<2x8x8xf32>, vector<2x8x8xf32>, vector<2x8x8xf32> -> vector<2x8x8xf32>
    "tpu.trace_stop"() : () -> ()
    %cst_166 = arith.constant 0.353553385 : f32
    %394 = vector.broadcast %cst_166 : f32 to vector<2x8x8xf32>
    %395 = arith.mulf %393, %394 : vector<2x8x8xf32>
    %cst_167 = arith.constant dense<0xFF800000> : vector<2x8xf32>
    %396 = vector.multi_reduction <maximumf>, %395, %cst_167 [2] : vector<2x8x8xf32> to vector<2x8xf32>
    %397 = vector.shape_cast %396 : vector<2x8xf32> to vector<2x8x1xf32>
    %398 = vector.broadcast %397 : vector<2x8x1xf32> to vector<2x8x8xf32>
    %399 = arith.subf %395, %398 : vector<2x8x8xf32>
    %400 = math.exp %399 : vector<2x8x8xf32>
    %cst_168 = arith.constant dense<0.000000e+00> : vector<2x8xf32>
    %401 = vector.multi_reduction <add>, %400, %cst_168 [2] : vector<2x8x8xf32> to vector<2x8xf32>
    %402 = vector.shape_cast %401 : vector<2x8xf32> to vector<2x8x1xf32>
    %403 = tpu.reciprocal %402 {approx = true} : vector<2x8x1xf32> -> vector<2x8x1xf32>
    %404 = vector.broadcast %403 : vector<2x8x1xf32> to vector<2x8x8xf32>
    %405 = arith.mulf %400, %404 : vector<2x8x8xf32>
    %406 = vector.extract_strided_slice %388 {offsets = [0, 0, 0], sizes = [2, 8, 8], strides = [1, 1, 1]} : vector<2x8x32xf32> to vector<2x8x8xf32>
    "tpu.trace_start"() <{level = 10 : i32, message = "bqk,bkd->bqd"}> : () -> ()
    %cst_169 = arith.constant dense<0.000000e+00> : vector<2x8x8xf32>
    %407 = tpu.matmul %405, %406, %cst_169 {dimension_numbers = #tpu.dot_dimension_numbers<[2], [1], [1], [2], [0, 0, 0, 1, 1, 2], [0], [0]>} : vector<2x8x8xf32>, vector<2x8x8xf32>, vector<2x8x8xf32> -> vector<2x8x8xf32>
    "tpu.trace_stop"() : () -> ()
    %408 = vector.shape_cast %407 : vector<2x8x8xf32> to vector<16x8xf32>
    %409 = vector.extract_strided_slice %2 {offsets = [0, 0], sizes = [8, 32], strides = [1, 1]} : vector<32x32xf32> to vector<8x32xf32>
    %cst_170 = arith.constant dense<0.000000e+00> : vector<16x32xf32>
    %410 = tpu.matmul %408, %409, %cst_170 {dimension_numbers = #tpu.dot_dimension_numbers<[1], [0], [0], [1], [0, 0, 1, 1], [], []>} : vector<16x8xf32>, vector<8x32xf32>, vector<16x32xf32> -> vector<16x32xf32>
    %411 = arith.addf %389, %410 : vector<16x32xf32>
    %412 = arith.addf %390, %405 : vector<2x8x8xf32>
    %413 = vector.extract_strided_slice %379 {offsets = [0, 0, 8], sizes = [2, 8, 8], strides = [1, 1, 1]} : vector<2x8x32xf32> to vector<2x8x8xf32>
    %414 = vector.extract_strided_slice %386 {offsets = [0, 0, 8], sizes = [2, 8, 8], strides = [1, 1, 1]} : vector<2x8x32xf32> to vector<2x8x8xf32>
    "tpu.trace_start"() <{level = 10 : i32, message = "bqd,bkd->bqk"}> : () -> ()
    %cst_171 = arith.constant dense<0.000000e+00> : vector<2x8x8xf32>
    %415 = tpu.matmul %413, %414, %cst_171 {dimension_numbers = #tpu.dot_dimension_numbers<[2], [2], [1], [1], [0, 0, 0, 1, 1, 1], [0], [0]>} : vector<2x8x8xf32>, vector<2x8x8xf32>, vector<2x8x8xf32> -> vector<2x8x8xf32>
    "tpu.trace_stop"() : () -> ()
    %cst_172 = arith.constant 0.353553385 : f32
    %416 = vector.broadcast %cst_172 : f32 to vector<2x8x8xf32>
    %417 = arith.mulf %415, %416 : vector<2x8x8xf32>
    %cst_173 = arith.constant dense<0xFF800000> : vector<2x8xf32>
    %418 = vector.multi_reduction <maximumf>, %417, %cst_173 [2] : vector<2x8x8xf32> to vector<2x8xf32>
    %419 = vector.shape_cast %418 : vector<2x8xf32> to vector<2x8x1xf32>
    %420 = vector.broadcast %419 : vector<2x8x1xf32> to vector<2x8x8xf32>
    %421 = arith.subf %417, %420 : vector<2x8x8xf32>
    %422 = math.exp %421 : vector<2x8x8xf32>
    %cst_174 = arith.constant dense<0.000000e+00> : vector<2x8xf32>
    %423 = vector.multi_reduction <add>, %422, %cst_174 [2] : vector<2x8x8xf32> to vector<2x8xf32>
    %424 = vector.shape_cast %423 : vector<2x8xf32> to vector<2x8x1xf32>
    %425 = tpu.reciprocal %424 {approx = true} : vector<2x8x1xf32> -> vector<2x8x1xf32>
    %426 = vector.broadcast %425 : vector<2x8x1xf32> to vector<2x8x8xf32>
    %427 = arith.mulf %422, %426 : vector<2x8x8xf32>
    %428 = vector.extract_strided_slice %388 {offsets = [0, 0, 8], sizes = [2, 8, 8], strides = [1, 1, 1]} : vector<2x8x32xf32> to vector<2x8x8xf32>
    "tpu.trace_start"() <{level = 10 : i32, message = "bqk,bkd->bqd"}> : () -> ()
    %cst_175 = arith.constant dense<0.000000e+00> : vector<2x8x8xf32>
    %429 = tpu.matmul %427, %428, %cst_175 {dimension_numbers = #tpu.dot_dimension_numbers<[2], [1], [1], [2], [0, 0, 0, 1, 1, 2], [0], [0]>} : vector<2x8x8xf32>, vector<2x8x8xf32>, vector<2x8x8xf32> -> vector<2x8x8xf32>
    "tpu.trace_stop"() : () -> ()
    %430 = vector.shape_cast %429 : vector<2x8x8xf32> to vector<16x8xf32>
    %431 = vector.extract_strided_slice %2 {offsets = [8, 0], sizes = [8, 32], strides = [1, 1]} : vector<32x32xf32> to vector<8x32xf32>
    %cst_176 = arith.constant dense<0.000000e+00> : vector<16x32xf32>
    %432 = tpu.matmul %430, %431, %cst_176 {dimension_numbers = #tpu.dot_dimension_numbers<[1], [0], [0], [1], [0, 0, 1, 1], [], []>} : vector<16x8xf32>, vector<8x32xf32>, vector<16x32xf32> -> vector<16x32xf32>
    %433 = arith.addf %411, %432 : vector<16x32xf32>
    %434 = arith.addf %412, %427 : vector<2x8x8xf32>
    %435 = vector.extract_strided_slice %379 {offsets = [0, 0, 16], sizes = [2, 8, 8], strides = [1, 1, 1]} : vector<2x8x32xf32> to vector<2x8x8xf32>
    %436 = vector.extract_strided_slice %386 {offsets = [0, 0, 16], sizes = [2, 8, 8], strides = [1, 1, 1]} : vector<2x8x32xf32> to vector<2x8x8xf32>
    "tpu.trace_start"() <{level = 10 : i32, message = "bqd,bkd->bqk"}> : () -> ()
    %cst_177 = arith.constant dense<0.000000e+00> : vector<2x8x8xf32>
    %437 = tpu.matmul %435, %436, %cst_177 {dimension_numbers = #tpu.dot_dimension_numbers<[2], [2], [1], [1], [0, 0, 0, 1, 1, 1], [0], [0]>} : vector<2x8x8xf32>, vector<2x8x8xf32>, vector<2x8x8xf32> -> vector<2x8x8xf32>
    "tpu.trace_stop"() : () -> ()
    %cst_178 = arith.constant 0.353553385 : f32
    %438 = vector.broadcast %cst_178 : f32 to vector<2x8x8xf32>
    %439 = arith.mulf %437, %438 : vector<2x8x8xf32>
    %cst_179 = arith.constant dense<0xFF800000> : vector<2x8xf32>
    %440 = vector.multi_reduction <maximumf>, %439, %cst_179 [2] : vector<2x8x8xf32> to vector<2x8xf32>
    %441 = vector.shape_cast %440 : vector<2x8xf32> to vector<2x8x1xf32>
    %442 = vector.broadcast %441 : vector<2x8x1xf32> to vector<2x8x8xf32>
    %443 = arith.subf %439, %442 : vector<2x8x8xf32>
    %444 = math.exp %443 : vector<2x8x8xf32>
    %cst_180 = arith.constant dense<0.000000e+00> : vector<2x8xf32>
    %445 = vector.multi_reduction <add>, %444, %cst_180 [2] : vector<2x8x8xf32> to vector<2x8xf32>
    %446 = vector.shape_cast %445 : vector<2x8xf32> to vector<2x8x1xf32>
    %447 = tpu.reciprocal %446 {approx = true} : vector<2x8x1xf32> -> vector<2x8x1xf32>
    %448 = vector.broadcast %447 : vector<2x8x1xf32> to vector<2x8x8xf32>
    %449 = arith.mulf %444, %448 : vector<2x8x8xf32>
    %450 = vector.extract_strided_slice %388 {offsets = [0, 0, 16], sizes = [2, 8, 8], strides = [1, 1, 1]} : vector<2x8x32xf32> to vector<2x8x8xf32>
    "tpu.trace_start"() <{level = 10 : i32, message = "bqk,bkd->bqd"}> : () -> ()
    %cst_181 = arith.constant dense<0.000000e+00> : vector<2x8x8xf32>
    %451 = tpu.matmul %449, %450, %cst_181 {dimension_numbers = #tpu.dot_dimension_numbers<[2], [1], [1], [2], [0, 0, 0, 1, 1, 2], [0], [0]>} : vector<2x8x8xf32>, vector<2x8x8xf32>, vector<2x8x8xf32> -> vector<2x8x8xf32>
    "tpu.trace_stop"() : () -> ()
    %452 = vector.shape_cast %451 : vector<2x8x8xf32> to vector<16x8xf32>
    %453 = vector.extract_strided_slice %2 {offsets = [16, 0], sizes = [8, 32], strides = [1, 1]} : vector<32x32xf32> to vector<8x32xf32>
    %cst_182 = arith.constant dense<0.000000e+00> : vector<16x32xf32>
    %454 = tpu.matmul %452, %453, %cst_182 {dimension_numbers = #tpu.dot_dimension_numbers<[1], [0], [0], [1], [0, 0, 1, 1], [], []>} : vector<16x8xf32>, vector<8x32xf32>, vector<16x32xf32> -> vector<16x32xf32>
    %455 = arith.addf %433, %454 : vector<16x32xf32>
    %456 = arith.addf %434, %449 : vector<2x8x8xf32>
    %457 = vector.extract_strided_slice %379 {offsets = [0, 0, 24], sizes = [2, 8, 8], strides = [1, 1, 1]} : vector<2x8x32xf32> to vector<2x8x8xf32>
    %458 = vector.extract_strided_slice %386 {offsets = [0, 0, 24], sizes = [2, 8, 8], strides = [1, 1, 1]} : vector<2x8x32xf32> to vector<2x8x8xf32>
    "tpu.trace_start"() <{level = 10 : i32, message = "bqd,bkd->bqk"}> : () -> ()
    %cst_183 = arith.constant dense<0.000000e+00> : vector<2x8x8xf32>
    %459 = tpu.matmul %457, %458, %cst_183 {dimension_numbers = #tpu.dot_dimension_numbers<[2], [2], [1], [1], [0, 0, 0, 1, 1, 1], [0], [0]>} : vector<2x8x8xf32>, vector<2x8x8xf32>, vector<2x8x8xf32> -> vector<2x8x8xf32>
    "tpu.trace_stop"() : () -> ()
    %cst_184 = arith.constant 0.353553385 : f32
    %460 = vector.broadcast %cst_184 : f32 to vector<2x8x8xf32>
    %461 = arith.mulf %459, %460 : vector<2x8x8xf32>
    %cst_185 = arith.constant dense<0xFF800000> : vector<2x8xf32>
    %462 = vector.multi_reduction <maximumf>, %461, %cst_185 [2] : vector<2x8x8xf32> to vector<2x8xf32>
    %463 = vector.shape_cast %462 : vector<2x8xf32> to vector<2x8x1xf32>
    %464 = vector.broadcast %463 : vector<2x8x1xf32> to vector<2x8x8xf32>
    %465 = arith.subf %461, %464 : vector<2x8x8xf32>
    %466 = math.exp %465 : vector<2x8x8xf32>
    %cst_186 = arith.constant dense<0.000000e+00> : vector<2x8xf32>
    %467 = vector.multi_reduction <add>, %466, %cst_186 [2] : vector<2x8x8xf32> to vector<2x8xf32>
    %468 = vector.shape_cast %467 : vector<2x8xf32> to vector<2x8x1xf32>
    %469 = tpu.reciprocal %468 {approx = true} : vector<2x8x1xf32> -> vector<2x8x1xf32>
    %470 = vector.broadcast %469 : vector<2x8x1xf32> to vector<2x8x8xf32>
    %471 = arith.mulf %466, %470 : vector<2x8x8xf32>
    %472 = vector.extract_strided_slice %388 {offsets = [0, 0, 24], sizes = [2, 8, 8], strides = [1, 1, 1]} : vector<2x8x32xf32> to vector<2x8x8xf32>
    "tpu.trace_start"() <{level = 10 : i32, message = "bqk,bkd->bqd"}> : () -> ()
    %cst_187 = arith.constant dense<0.000000e+00> : vector<2x8x8xf32>
    %473 = tpu.matmul %471, %472, %cst_187 {dimension_numbers = #tpu.dot_dimension_numbers<[2], [1], [1], [2], [0, 0, 0, 1, 1, 2], [0], [0]>} : vector<2x8x8xf32>, vector<2x8x8xf32>, vector<2x8x8xf32> -> vector<2x8x8xf32>
    "tpu.trace_stop"() : () -> ()
    %474 = vector.shape_cast %473 : vector<2x8x8xf32> to vector<16x8xf32>
    %475 = vector.extract_strided_slice %2 {offsets = [24, 0], sizes = [8, 32], strides = [1, 1]} : vector<32x32xf32> to vector<8x32xf32>
    %cst_188 = arith.constant dense<0.000000e+00> : vector<16x32xf32>
    %476 = tpu.matmul %474, %475, %cst_188 {dimension_numbers = #tpu.dot_dimension_numbers<[1], [0], [0], [1], [0, 0, 1, 1], [], []>} : vector<16x8xf32>, vector<8x32xf32>, vector<16x32xf32> -> vector<16x32xf32>
    %477 = arith.addf %455, %476 : vector<16x32xf32>
    %478 = arith.addf %456, %471 : vector<2x8x8xf32>
    %479 = vector.shape_cast %477 : vector<16x32xf32> to vector<2x8x32xf32>
    %480 = vector.shape_cast %3 : vector<1x32xf32> to vector<1x1x32xf32>
    %481 = vector.broadcast %480 : vector<1x1x32xf32> to vector<2x8x32xf32>
    %482 = arith.addf %479, %481 : vector<2x8x32xf32>
    %cst_189 = arith.constant 2.500000e-01 : f32
    %483 = vector.broadcast %cst_189 : f32 to vector<2x8x8xf32>
    %484 = arith.mulf %478, %483 : vector<2x8x8xf32>
    %485 = arith.addf %482, %371 : vector<2x8x32xf32>
    %c0_190 = arith.constant 0 : index
    %c0_191 = arith.constant 0 : index
    %c0_192 = arith.constant 0 : index
    %486 = vector.load %arg18[%c0_190, %c0_191, %c0_192] : memref<2x8x32xf32, #tpu.memory_space<vmem>>, vector<2x8x32xf32>
    tpu.vector_store %arg18[%c0_190, %c0_191, %c0_192], %485 {strides = array<i32>} : memref<2x8x32xf32, #tpu.memory_space<vmem>>, vector<2x8x32xf32>,
    %c0_193 = arith.constant 0 : index
    %c0_194 = arith.constant 0 : index
    %c0_195 = arith.constant 0 : index
    %487 = vector.load %arg19[%c0_193, %c0_194, %c0_195] : memref<2x8x8xf32, #tpu.memory_space<vmem>>, vector<2x8x8xf32>
    tpu.vector_store %arg19[%c0_193, %c0_194, %c0_195], %484 {strides = array<i32>} : memref<2x8x8xf32, #tpu.memory_space<vmem>>, vector<2x8x8xf32>,
    return
  }
}

</mosaic_0001>

<bundles_post_ra>
// kernel: mini_transformer_forward.2
= control target key start
LH: loop header
LB: loop body
LE: loop exit
PB: predicated region body
PF: predicated region fallthrough
CT: control target
= control target key end

     0   :  { %s7947_s0 = inlined_call_operand.vmem [shape: f32[2,8,32], index: 0, kind: input, shape index: {}]   ;;  %s7948_s1 = inlined_call_operand.vmem [shape: f32[2,8,32], index: 1, kind: input, shape index: {}]   ;;  %s7949_s2 = inlined_call_operand.vmem [shape: f32[2,32,96], index: 2, kind: input, shape index: {}]   ;;  %s7950_s3 = inlined_call_operand.vmem [shape: f32[2,1,96], index: 3, kind: input, shape index: {}]   ;;  %s7951_s4 = inlined_call_operand.vmem [shape: f32[2,32,32], index: 4, kind: input, shape index: {}]   ;;  %s7952_s5 = inlined_call_operand.vmem [shape: f32[2,1,32], index: 5, kind: input, shape index: {}]   ;;  %s7953_s6 = inlined_call_operand.vmem [shape: f32[2,1,32], index: 6, kind: input, shape index: {}]   ;;  %s7954_s7 = inlined_call_operand.vmem [shape: f32[2,1,32], index: 7, kind: input, shape index: {}]   ;;  %s7955_s8 = inlined_call_operand.vmem [shape: f32[2,32,64], index: 8, kind: input, shape index: {}]   ;;  %s7956_s9 = inlined_call_operand.vmem [shape: f32[2,1,64], index: 9, kind: input, shape index: {}]   ;;  %s7957_s10 = inlined_call_operand.vmem [shape: f32[2,64,32], index: 10, kind: input, shape index: {}]   ;;  %s7958_s11 = inlined_call_operand.vmem [shape: f32[2,1,32], index: 11, kind: input, shape index: {}]   ;;  %s7959_s12 = inlined_call_operand.vmem [shape: f32[2,1,32], index: 12, kind: input, shape index: {}]   ;;  %s7960_s13 = inlined_call_operand.vmem [shape: f32[2,1,32], index: 13, kind: input, shape index: {}]   ;;  %s7961_s14 = inlined_call_operand.vmem [shape: f32[32,96], index: 14, kind: input, shape index: {}]   ;;  %s7962_s15 = inlined_call_operand.vmem [shape: f32[1,96], index: 15, kind: input, shape index: {}]   ;;  %s7963_s16 = inlined_call_operand.vmem [shape: f32[32,32], index: 16, kind: input, shape index: {}]   ;;  %s7964_s17 = inlined_call_operand.vmem [shape: f32[1,32], index: 17, kind: input, shape index: {}]   ;;  %s7965_s18 = inlined_call_operand.vmem [shape: f32[2,8,32], index: 18, kind: output, shape index: {0}]   ;;  %s7966_s19 = inlined_call_operand.hbm [shape: f32[2,8,8], index: 19, kind: output, shape index: {1}]  }
   0x1   :  { %7987 = sst [smem:[#allocation5_spill]] %s7947_s0 }
   0x2   :  { %7988 = sst [smem:[#allocation6_spill]] %s7948_s1 }
   0x3   :  { %7989 = sst [smem:[#allocation7_spill]] %s7949_s2 }
   0x4   :  { %7990 = sst [smem:[#allocation8_spill]] %s7950_s3 }
   0x5   :  { %s7991_s20 = sld [smem:[#allocation7_spill]]  ;;  %vm90_vm0 = vcmask 261120   ;;  %s7992_s26 = sld [smem:[#allocation5_spill]] }
   0xb   :  { %v74_v0 = vld [vmem:[%s7991_s20] sm:$0xff]  ;;  %v75_v1 = vld [vmem:[%s7991_s20 + $0x8] sm:$0xff]  ;;  %v76_v2 = vld [vmem:[%s7991_s20 + $0x10] sm:$0xff] }
   0xc   :  { %v6807_v3 = vpack.c.bf16 %v75_v1, %v74_v0  ;;  %v77_v4 = vld [vmem:[%s7991_s20 + $0x18] sm:$0xff]  ;;  %v7198_v5 = vld [vmem:[%s7992_s26] sm:$0xff] }
   0xd   :  { %v6811_v6 = vpack.c.bf16 %v77_v4, %v76_v2  ;;  %6411 = vmatprep.mubr.msk.f32.mxu0 %vm90_vm0, %v7198_v5 }
   0xe   :  { %25 = vsyncpa [#allocation3], 0  ;;  %6808 = vmatprep.subr.bf16.mxu0 %v6807_v3  ;;  %v7205_v7 = vld [vmem:[%s7992_s26 + $0x8] sm:$0xff]  ;;  %v7067_v8 = vmov 0.0   ;;  %vm7068_vm1 = vmmov 0   ;;  %s7993_s30 = sld [smem:[#allocation8_spill]] }
   0xf   :  { %6810 = vmatpush3.bf16.msra.mxu0 %v6807_v3  ;;  %6414 = vmatprep.subr.mxu1 %v7067_v8  ;;  %s7069_s21 = smov 96   ;;  %vm175_vm2 = vcmask 64512   ;;  %s7070_s1 = smov 64   ;;  %vm1991_vm3 = vcmask 523264  }
  0x10   :  { %6812 = vmatprep.subr.bf16.mxu0 %v6811_v6  ;;  %6416 = vmatprep.mubr.msk.f32.mxu1 %vm7068_vm1, %v7067_v8  ;;  %s7985_s22 = smov 88   ;;  %s7072_s2 = smov 120  }
  0x11   :  { %s7981_s23 = smov 56   ;;  %s7979_s24 = smov 112  }
  0x12   :  { %s7983_s25 = smov 80   ;;  %s7977_s3 = smov 48  }
  0x13   :  { %6814 = vmatpush3.bf16.msra.mxu0 %v6811_v6  ;;  %s7971_s26 = smov 72   ;;  %s7975_s27 = smov 104  }
  0x14   :  { %6434 = vmatprep.subr.mxu0 %v7067_v8  ;;  %v6057_v9 = vld [vmem:[%s7993_s30] ss:$0 sm:$0xff]  ;;  %s7973_s29 = smov 40   ;;  %s8000_s0 = smov 104  }
  0x16   :  { %6412 = vmatmul.mubr.msk.f32.vlgmr.msra.gmra.mrb[0].mxu0 %vm90_vm0, %v7205_v7 }
  0x17   :  { %6436 = vmatprep.mubr.msk.f32.mxu0 %vm7068_vm1, %v7067_v8 }
  0xe9   :  { %v6413_v10 = vpop.f32.mrb[0].mxu0 }
  0xea   :  { %v163_v11 = vpop.f32.mrb[1].mxu0  ;;  %v7222_v13 = vadd.f32 %v6413_v10, %v6057_v9 }
  0xeb   :  { %v7218_v12 = vadd.f32 %v6057_v9, %v163_v11 }
  0xed   :  { %173 = vrot.lane.b32.xlu0 %v7218_v12, %s7069_s21 }
  0xf1   :  { %251 = vrot.lane.b32.xlu0 %v7222_v13, %s7069_s21 }
 0x15f   :  { %v174_v14 = vpop.permute.xlu0 %173 }
 0x160   :  { %6415 = vmatpush3.xpose.msk.msra.mxu1 %vm175_vm2, %v174_v14 }
 0x161   :  { %6419 = vmatprep.subr.mxu1 %v7067_v8 }
 0x163   :  { %6417 = vmatmul.mubr.msk.f32.vlgmr.msra.gmra.mrb[0].mxu1 %vm175_vm2, %v7218_v12  ;;  %v252_v15 = vpop.permute.xlu0 %251 }
 0x164   :  { %6420 = vmatpush3.xpose.msk.msra.mxu1 %vm175_vm2, %v252_v15  ;;  %6421 = vmatprep.mubr.msk.f32.mxu1 %vm7068_vm1, %v7067_v8 }
 0x165   :  { %6424 = vmatprep.subr.mxu1 %v7067_v8 }
 0x167   :  { %6422 = vmatmul.mubr.msk.f32.vlgmr.msra.gmra.mrb[2].mxu1 %vm175_vm2, %v7222_v13 }
 0x168   :  { %6426 = vmatprep.mubr.msk.f32.mxu1 %vm7068_vm1, %v7067_v8 }
 0x236   :  { %v246_v16 = vpop.f32.mrb[0].mxu1 }
 0x237   :  { %v327_v17 = vmul.f32 0.35355338, %v246_v16  ;;  %v6418_v18 = vpop.f32.mrb[1].mxu1 }
 0x239   :  { %v329_v19 = vsel %vm175_vm2, %v327_v17, -inf }
 0x23a   :  { %330 = vmax.xlane.f32.xlu1 %v329_v19  ;;  %v323_v20 = vpop.f32.mrb[2].mxu1 }
 0x23b   :  { %v328_v21 = vmul.f32 0.35355338, %v323_v20  ;;  %v6423_v22 = vpop.f32.mrb[3].mxu1 }
 0x23c   :  { %v80_v22 = vld [vmem:[%s7951_s4 + $0x8] sm:$0xff] }
 0x23d   :  { %v332_v23 = vsel %vm175_vm2, %v328_v21, -inf }
 0x23e   :  { %333 = vmax.xlane.f32.xlu1 %v332_v23  ;;  %v79_v23 = vld [vmem:[%s7951_s4] sm:$0xff] }
 0x24f   :  { %351 = vrot.lane.b32.xlu1 %v7218_v12, %s7070_s1 }
 0x253   :  { %427 = vrot.lane.b32.xlu1 %v7222_v13, %s7070_s1 }
 0x257   :  { %583 = vrot.lane.b32.xlu1 %v7222_v13, %s7985_s22 }
 0x2c7   :  { %v331_v24 = vpop.xlane.xlu1 %330 }
 0x2c8   :  { %v335_v25 = vsub.f32 %v327_v17, %v331_v24 }
 0x2ca   :  { %v337_v26 = vmul.f32 1.442695, %v335_v25 }
 0x2cb   :  { %v334_v27 = vpop.xlane.xlu1 %333 }
 0x2cc   :  { %6931 = vpow2.f32 %v337_v26  ;;  %v336_v28 = vsub.f32 %v328_v21, %v334_v27 }
 0x2ce   :  { %v339_v29 = vmul.f32 1.442695, %v336_v28 }
 0x2cf   :  { %v352_v30 = vpop.permute.xlu1 %351 }
 0x2d0   :  { %6933 = vpow2.f32 %v339_v29  ;;  %6425 = vmatpush3.msra.mxu1 %v352_v30 }
 0x2d1   :  { %6429 = vmatprep.subr.mxu1 %v7067_v8 }
 0x2d3   :  { %v428_v35 = vpop.permute.xlu1 %427 }
 0x2d6   :  { %v6932_v31 = vpop.eup %6931 }
 0x2d7   :  { %v341_v32 = vsel %vm175_vm2, %v6932_v31, 0.0  ;;  %v584_v36 = vpop.permute.xlu1 %583 }
 0x2d8   :  { %342 = vadd.xlane.f32.xlu0 %v341_v32 }
 0x2da   :  { %v6934_v33 = vpop.eup %6933 }
 0x2db   :  { %v344_v34 = vsel %vm175_vm2, %v6934_v33, 0.0 }
 0x2dc   :  { %345 = vadd.xlane.f32.xlu1 %v344_v34 }
 0x2ed   :  { %581 = vrot.lane.b32.xlu1 %v7222_v13, %s7072_s2 }
 0x2ee   :  { %505 = vrot.lane.b32.xlu0 %v7218_v12, %s7985_s22 }
 0x2f1   :  { %503 = vrot.lane.b32.xlu1 %v7218_v12, %s7072_s2 }
 0x365   :  { %v343_v37 = vpop.xlane.xlu0 %342 }
 0x366   :  { %6935 = vrcp.f32 %v343_v37 }
 0x369   :  { %v346_v38 = vpop.xlane.xlu1 %345  ;;  %v506_v39 = vpop.permute.xlu0 %505 }
 0x36a   :  { %6937 = vrcp.f32 %v346_v38  ;;  %6435 = vmatpush3.xpose.msk.msra.mxu0 %vm175_vm2, %v506_v39 }
 0x36b   :  { %6444 = vmatprep.subr.mxu0 %v7067_v8 }
 0x36d   :  { %v582_v40 = vpop.permute.xlu1 %581 }
 0x370   :  { %v6936_v41 = vpop.eup %6935 }
 0x371   :  { %v504_v42 = vpop.permute.xlu1 %503  ;;  %v349_v43 = vmul.f32 %v6936_v41, %v6932_v31 }
 0x372   :  { %6437 = vmatmul.mubr.msk.f32.vlgmr.msra.gmra.mrb[2].mxu0 %vm175_vm2, %v504_v42 }
 0x373   :  { %6427 = vmatmul.mubr.msk.f32.vlgmr.msra.gmra.mrb[4].mxu1 %vm175_vm2, %v349_v43  ;;  %6446 = vmatprep.mubr.msk.f32.mxu0 %vm7068_vm1, %v7067_v8 }
 0x374   :  { %v6938_v44 = vpop.eup %6937  ;;  %6430 = vmatpush3.msra.mxu1 %v428_v35  ;;  %6431 = vmatprep.mubr.msk.f32.mxu1 %vm7068_vm1, %v7067_v8 }
 0x375   :  { %v350_v45 = vmul.f32 %v6938_v44, %v6934_v33  ;;  %6439 = vmatprep.subr.mxu1 %v7067_v8 }
 0x377   :  { %6432 = vmatmul.mubr.msk.f32.vlgmr.msra.gmra.mrb[6].mxu1 %vm175_vm2, %v350_v45 }
 0x378   :  { %6441 = vmatprep.mubr.msk.f32.mxu1 %vm7068_vm1, %v7067_v8 }
 0x37b   :  { %6440 = vmatpush3.xpose.msk.msra.mxu1 %vm175_vm2, %v584_v36 }
 0x37c   :  { %6449 = vmatprep.subr.mxu1 %v7067_v8 }
 0x37e   :  { %6442 = vmatmul.mubr.msk.f32.vlgmr.msra.gmra.mrb[8].mxu1 %vm175_vm2, %v582_v40 }
 0x37f   :  { %6451 = vmatprep.mubr.msk.f32.mxu1 %vm7068_vm1, %v7067_v8 }
 0x445   :  { %v577_v46 = vpop.f32.mrb[2].mxu0 }
 0x446   :  { %v7272_v47 = vpop.f32.mrb[4].mxu1  ;;  %v6438_v48 = vpop.f32.mrb[3].mxu0  ;;  %v659_v56 = vmul.f32 0.35355338, %v577_v46 }
 0x447   :  { %v6428_v49 = vpop.f32.mrb[5].mxu1  ;;  %v81_v48 = vld [vmem:[%s7951_s4 + $0x10] sm:$0xff] }
 0x448   :  { %v661_v57 = vsel %vm175_vm2, %v659_v56, -inf }
 0x44a   :  { %v7274_v50 = vpop.f32.mrb[6].mxu1 }
 0x44b   :  { %v6433_v51 = vpop.f32.mrb[7].mxu1 }
 0x451   :  { %v655_v52 = vpop.f32.mrb[8].mxu1 }
 0x452   :  { %v660_v53 = vmul.f32 0.35355338, %v655_v52  ;;  %v6443_v54 = vpop.f32.mrb[9].mxu1 }
 0x454   :  { %v664_v55 = vsel %vm175_vm2, %v660_v53, -inf }
 0x455   :  { %665 = vmax.xlane.f32.xlu1 %v664_v55 }
 0x466   :  { %759 = vrot.lane.b32.xlu1 %v7222_v13, %s7981_s23 }
 0x46a   :  { %997 = vrot.lane.b32.xlu1 %v7218_v12, %s7979_s24 }
 0x46e   :  { %1077 = vrot.lane.b32.xlu1 %v7222_v13, %s7983_s25 }
 0x472   :  { %1075 = vrot.lane.b32.xlu1 %v7222_v13, %s7979_s24  ;;  %s7997_s24 = smov 112  }
 0x496   :  { %662 = vmax.xlane.f32.xlu1 %v661_v57 }
 0x4e2   :  { %v666_v58 = vpop.xlane.xlu1 %665 }
 0x4e3   :  { %v668_v59 = vsub.f32 %v660_v53, %v666_v58 }
 0x4e5   :  { %v671_v60 = vmul.f32 1.442695, %v668_v59 }
 0x4e6   :  { %v760_v61 = vpop.permute.xlu1 %759 }
 0x4e7   :  { %6939 = vpow2.f32 %v671_v60  ;;  %6450 = vmatpush3.msra.mxu1 %v760_v61 }
 0x4e8   :  { %6464 = vmatprep.subr.mxu1 %v7067_v8 }
 0x4ea   :  { %v998_v0 = vpop.permute.xlu1 %997 }
 0x4ee   :  { %v1078_v1 = vpop.permute.xlu1 %1077 }
 0x4f1   :  { %v6940_v62 = vpop.eup %6939 }
 0x4f2   :  { %v676_v63 = vsel %vm175_vm2, %v6940_v62, 0.0  ;;  %v1076_v2 = vpop.permute.xlu1 %1075 }
 0x4f3   :  { %677 = vadd.xlane.f32.xlu0 %v676_v63 }
 0x509   :  { %999 = vrot.lane.b32.xlu0 %v7218_v12, %s7983_s25 }
 0x523   :  { %v663_v3 = vpop.xlane.xlu1 %662 }
 0x524   :  { %v667_v4 = vsub.f32 %v659_v56, %v663_v3 }
 0x526   :  { %v669_v6 = vmul.f32 1.442695, %v667_v4 }
 0x528   :  { %6941 = vpow2.f32 %v669_v6 }
 0x532   :  { %v6942_v9 = vpop.eup %6941 }
 0x533   :  { %v673_v10 = vsel %vm175_vm2, %v6942_v9, 0.0 }
 0x534   :  { %674 = vadd.xlane.f32.xlu0 %v673_v10 }
 0x54a   :  { %683 = vrot.lane.b32.xlu0 %v7218_v12, %s7981_s23  ;;  %s7995_s23 = smov 80  }
 0x54e   :  { %1253 = vrot.lane.b32.xlu0 %v7222_v13, %s7977_s3 }
 0x552   :  { %1414 = vrot.lane.b32.xlu0 %v7218_v12, %s7971_s26 }
 0x556   :  { %1492 = vrot.lane.b32.xlu0 %v7222_v13, %s7971_s26 }
 0x55a   :  { %1412 = vrot.lane.b32.xlu0 %v7218_v12, %s7975_s27 }
 0x580   :  { %v678_v11 = vpop.xlane.xlu0 %677 }
 0x581   :  { %6943 = vrcp.f32 %v678_v11 }
 0x584   :  { %v1000_v16 = vpop.permute.xlu0 %999 }
 0x58b   :  { %v6944_v14 = vpop.eup %6943 }
 0x58c   :  { %v682_v15 = vmul.f32 %v6944_v14, %v6940_v62 }
 0x58e   :  { %6452 = vmatmul.mubr.msk.f32.vlgmr.msra.gmra.mrb[10].mxu1 %vm175_vm2, %v682_v15 }
 0x58f   :  { %6465 = vmatpush3.xpose.msk.msra.mxu1 %vm175_vm2, %v1000_v16  ;;  %6466 = vmatprep.mubr.msk.f32.mxu1 %vm7068_vm1, %v7067_v8 }
 0x590   :  { %6469 = vmatprep.subr.mxu1 %v7067_v8 }
 0x592   :  { %6467 = vmatmul.mubr.msk.f32.vlgmr.msra.gmra.mrb[12].mxu1 %vm175_vm2, %v998_v0 }
 0x593   :  { %6470 = vmatpush3.xpose.msk.msra.mxu1 %vm175_vm2, %v1078_v1  ;;  %6471 = vmatprep.mubr.msk.f32.mxu1 %vm7068_vm1, %v7067_v8 }
 0x594   :  { %6479 = vmatprep.subr.mxu1 %v7067_v8 }
 0x596   :  { %6472 = vmatmul.mubr.msk.f32.vlgmr.msra.gmra.mrb[14].mxu1 %vm175_vm2, %v1076_v2 }
 0x597   :  { %6481 = vmatprep.mubr.msk.f32.mxu1 %vm7068_vm1, %v7067_v8 }
 0x5c1   :  { %v675_v17 = vpop.xlane.xlu0 %674 }
 0x5c2   :  { %6945 = vrcp.f32 %v675_v17 }
 0x5c5   :  { %v684_v18 = vpop.permute.xlu0 %683 }
 0x5c6   :  { %6445 = vmatpush3.msra.mxu0 %v684_v18 }
 0x5c7   :  { %6454 = vmatprep.subr.mxu0 %v80_v22 }
 0x5c9   :  { %v1254_v19 = vpop.permute.xlu0 %1253 }
 0x5ca   :  { %6480 = vmatpush3.msra.mxu1 %v1254_v19 }
 0x5cb   :  { %6489 = vmatprep.subr.mxu1 %v7067_v8 }
 0x5cc   :  { %v6946_v20 = vpop.eup %6945 }
 0x5cd   :  { %v681_v21 = vmul.f32 %v6946_v20, %v6942_v9 }
 0x5cf   :  { %6447 = vmatmul.mubr.msk.f32.vlgmr.msra.gmra.mrb[4].mxu0 %vm175_vm2, %v681_v21 }
 0x5d0   :  { %6455 = vmatpush3.msra.mxu0 %v80_v22 }
 0x5d1   :  { %6459 = vmatprep.subr.mxu0 %v79_v23 }
 0x661   :  { %v831_v24 = vpop.f32.mrb[10].mxu1 }
 0x662   :  { %v6453_v25 = vpop.f32.mrb[11].mxu1 }
 0x663   :  { %v82_v25 = vld [vmem:[%s7951_s4 + $0x18] sm:$0xff] }
 0x665   :  { %v1071_v26 = vpop.f32.mrb[12].mxu1 }
 0x666   :  { %v1153_v27 = vmul.f32 0.35355338, %v1071_v26  ;;  %v6468_v28 = vpop.f32.mrb[13].mxu1 }
 0x668   :  { %v1155_v29 = vsel %vm175_vm2, %v1153_v27, -inf }
 0x669   :  { %1156 = vmax.xlane.f32.xlu1 %v1155_v29  ;;  %v1149_v30 = vpop.f32.mrb[14].mxu1 }
 0x66a   :  { %v1154_v31 = vmul.f32 0.35355338, %v1149_v30  ;;  %v6473_v32 = vpop.f32.mrb[15].mxu1 }
 0x66b   :  { %v6092_v32 = vld [vmem:[%s7952_s5] ss:$0 sm:$0xff] }
 0x66c   :  { %v1158_v33 = vsel %vm175_vm2, %v1154_v31, -inf }
 0x66d   :  { %1159 = vmax.xlane.f32.xlu1 %v1158_v33 }
 0x6a2   :  { %v755_v34 = vpop.f32.mrb[4].mxu0 }
 0x6a3   :  { %v6448_v35 = vpop.f32.mrb[5].mxu0  ;;  %6456 = vmatprep.mubr.msk.f32.mxu0 %vm175_vm2, %v755_v34 }
 0x6a4   :  { %6457 = vmatmul.mubr.msk.f32.vlgmr.msra.gmra.mrb[6].mxu0 %vm175_vm2, %v831_v24 }
 0x6a5   :  { %6461 = vmatprep.mubr.msk.f32.mxu0 %vm175_vm2, %v7272_v47  ;;  %6460 = vmatpush3.msra.mxu0 %v79_v23 }
 0x6a6   :  { %6474 = vmatprep.subr.mxu0 %v7067_v8 }
 0x6ac   :  { %6462 = vmatmul.mubr.msk.f32.vlgmr.msra.gmra.mrb[6].mxu0 %vm175_vm2, %v7274_v50  ;;  %v1415_v50 = vpop.permute.xlu0 %1414 }
 0x6ad   :  { %6476 = vmatprep.mubr.msk.f32.mxu0 %vm7068_vm1, %v7067_v8 }
 0x6b0   :  { %v1493_v54 = vpop.permute.xlu0 %1492 }
 0x6b4   :  { %v1413_v56 = vpop.permute.xlu0 %1412 }
 0x6f6   :  { %v1157_v36 = vpop.xlane.xlu1 %1156 }
 0x6f7   :  { %v1161_v37 = vsub.f32 %v1153_v27, %v1157_v36 }
 0x6f9   :  { %v1163_v38 = vmul.f32 1.442695, %v1161_v37 }
 0x6fa   :  { %v1160_v39 = vpop.xlane.xlu1 %1159 }
 0x6fb   :  { %6947 = vpow2.f32 %v1163_v38  ;;  %v1162_v40 = vsub.f32 %v1154_v31, %v1160_v39 }
 0x6fd   :  { %v1165_v41 = vmul.f32 1.442695, %v1162_v40 }
 0x6ff   :  { %6949 = vpow2.f32 %v1165_v41 }
 0x705   :  { %v6948_v42 = vpop.eup %6947 }
 0x706   :  { %v1167_v43 = vsel %vm175_vm2, %v6948_v42, 0.0 }
 0x707   :  { %1168 = vadd.xlane.f32.xlu1 %v1167_v43 }
 0x709   :  { %v6950_v44 = vpop.eup %6949 }
 0x70a   :  { %v1170_v45 = vsel %vm175_vm2, %v6950_v44, 0.0 }
 0x70b   :  { %1171 = vadd.xlane.f32.xlu1 %v1170_v45 }
 0x71c   :  { %1177 = vrot.lane.b32.xlu1 %v7218_v12, %s7977_s3 }
 0x720   :  { %1490 = vrot.lane.b32.xlu1 %v7222_v13, %s7975_s27  ;;  %s7998_s27 = smov 48  }
 0x794   :  { %v1169_v46 = vpop.xlane.xlu1 %1168 }
 0x795   :  { %6951 = vrcp.f32 %v1169_v46 }
 0x798   :  { %v1172_v47 = vpop.xlane.xlu1 %1171 }
 0x799   :  { %6953 = vrcp.f32 %v1172_v47 }
 0x79c   :  { %v1178_v49 = vpop.permute.xlu1 %1177 }
 0x79d   :  { %6475 = vmatpush3.msra.mxu0 %v1178_v49 }
 0x79e   :  { %6484 = vmatprep.subr.mxu0 %v81_v48 }
 0x79f   :  { %v6952_v51 = vpop.eup %6951 }
 0x7a0   :  { %v1175_v52 = vmul.f32 %v6952_v51, %v6948_v42  ;;  %v1491_v61 = vpop.permute.xlu1 %1490 }
 0x7a2   :  { %6477 = vmatmul.mubr.msk.f32.vlgmr.msra.gmra.mrb[8].mxu0 %vm175_vm2, %v1175_v52  ;;  %v1884_v52 = vld [vmem:[%s7955_s8 + $0x10] sm:$0xff] }
 0x7a3   :  { %v6954_v53 = vpop.eup %6953  ;;  %6485 = vmatpush3.msra.mxu0 %v81_v48 }
 0x7a4   :  { %v1176_v55 = vmul.f32 %v6954_v53, %v6950_v44  ;;  %6494 = vmatprep.subr.mxu0 %v7067_v8  ;;  %v1885_v53 = vld [vmem:[%s7955_s8 + $0x18] sm:$0xff] }
 0x7a6   :  { %6482 = vmatmul.mubr.msk.f32.vlgmr.msra.gmra.mrb[16].mxu1 %vm175_vm2, %v1176_v55  ;;  %v1976_v55 = vld [vmem:[%s7957_s10] sm:$0xff] }
 0x7a7   :  { %6490 = vmatpush3.xpose.msk.msra.mxu1 %vm175_vm2, %v1415_v50  ;;  %6491 = vmatprep.mubr.msk.f32.mxu1 %vm7068_vm1, %v7067_v8  ;;  %v1883_v50 = vld [vmem:[%s7955_s8 + $0x8] sm:$0xff] }
 0x7a8   :  { %6499 = vmatprep.subr.mxu1 %v7067_v8 }
 0x7aa   :  { %6492 = vmatmul.mubr.msk.f32.vlgmr.msra.gmra.mrb[18].mxu1 %vm175_vm2, %v1413_v56  ;;  %v1977_v56 = vld [vmem:[%s7957_s10 + $0x8] sm:$0xff] }
 0x7ab   :  { %6501 = vmatprep.mubr.msk.f32.mxu1 %vm7068_vm1, %v7067_v8 }
 0x875   :  { %v1249_v57 = vpop.f32.mrb[8].mxu0 }
 0x876   :  { %v6478_v58 = vpop.f32.mrb[9].mxu0  ;;  %6486 = vmatprep.mubr.msk.f32.mxu0 %vm175_vm2, %v1249_v57  ;;  %v1978_v57 = vld [vmem:[%s7957_s10 + $0x10] sm:$0xff] }
 0x877   :  { %v6823_v58 = vpack.c.bf16 %v1977_v56, %v1976_v55 }
 0x879   :  { %v1325_v59 = vpop.f32.mrb[16].mxu1 }
 0x87a   :  { %v6483_v60 = vpop.f32.mrb[17].mxu1  ;;  %6487 = vmatmul.mubr.msk.f32.vlgmr.msra.gmra.mrb[6].mxu0 %vm175_vm2, %v1325_v59  ;;  %v1979_v59 = vld [vmem:[%s7957_s10 + $0x18] sm:$0xff] }
 0x87b   :  { %6495 = vmatpush3.xpose.msk.msra.mxu0 %vm175_vm2, %v1493_v54  ;;  %6496 = vmatprep.mubr.msk.f32.mxu0 %vm7068_vm1, %v7067_v8  ;;  %v6819_v54 = vpack.c.bf16 %v1885_v53, %v1884_v52  ;;  %v6827_v60 = vpack.c.bf16 %v1979_v59, %v1978_v57  ;;  %v6101_v59 = vld [vmem:[%s7959_s12] ss:$0 sm:$0xff] }
 0x87c   :  { %6504 = vmatprep.subr.mxu0 %v7067_v8 }
 0x87d   :  { %v1486_v62 = vpop.f32.mrb[18].mxu1 }
 0x87e   :  { %v1568_v63 = vmul.f32 0.35355338, %v1486_v62  ;;  %v6493_v0 = vpop.f32.mrb[19].mxu1  ;;  %6497 = vmatmul.mubr.msk.f32.vlgmr.msra.gmra.mrb[10].mxu0 %vm175_vm2, %v1491_v61  ;;  %v1980_v61 = vld [vmem:[%s7957_s10 + $0x20] sm:$0xff]  ;;  %v1981_v62 = vld [vmem:[%s7957_s10 + $0x28] sm:$0xff] }
 0x87f   :  { %6506 = vmatprep.mubr.msk.f32.mxu0 %vm7068_vm1, %v7067_v8 }
 0x880   :  { %v1570_v1 = vsel %vm175_vm2, %v1568_v63, -inf }
 0x881   :  { %1571 = vmax.xlane.f32.xlu0 %v1570_v1 }
 0x90e   :  { %v1572_v2 = vpop.xlane.xlu0 %1571 }
 0x90f   :  { %v1576_v3 = vsub.f32 %v1568_v63, %v1572_v2  ;;  %v6831_v63 = vpack.c.bf16 %v1981_v62, %v1980_v61 }
 0x911   :  { %v1578_v4 = vmul.f32 1.442695, %v1576_v3 }
 0x913   :  { %6955 = vpow2.f32 %v1578_v4 }
 0x91d   :  { %v6956_v6 = vpop.eup %6955 }
 0x91e   :  { %v1582_v9 = vsel %vm175_vm2, %v6956_v6, 0.0 }
 0x91f   :  { %1583 = vadd.xlane.f32.xlu0 %v1582_v9 }
 0x951   :  { %v1564_v10 = vpop.f32.mrb[10].mxu0 }
 0x952   :  { %v1569_v11 = vmul.f32 0.35355338, %v1564_v10  ;;  %v6498_v14 = vpop.f32.mrb[11].mxu0  ;;  %v6093_v10 = vld [vmem:[%s7953_s6] ss:$0 sm:$0xff] }
 0x954   :  { %v1573_v15 = vsel %vm175_vm2, %v1569_v11, -inf }
 0x955   :  { %1574 = vmax.xlane.f32.xlu1 %v1573_v15 }
 0x966   :  { %1592 = vrot.lane.b32.xlu1 %v7218_v12, %s7973_s29 }
 0x9ac   :  { %v1584_v16 = vpop.xlane.xlu0 %1583 }
 0x9ad   :  { %6957 = vrcp.f32 %v1584_v16  ;;  %v6094_v16 = vld [vmem:[%s7954_s7] ss:$0 sm:$0xff] }
 0x9b7   :  { %v6958_v18 = vpop.eup %6957 }
 0x9b8   :  { %v1590_v21 = vmul.f32 %v6958_v18, %v6956_v6 }
 0x9e2   :  { %v1575_v17 = vpop.xlane.xlu1 %1574 }
 0x9e3   :  { %v1577_v19 = vsub.f32 %v1569_v11, %v1575_v17 }
 0x9e5   :  { %v1580_v20 = vmul.f32 1.442695, %v1577_v19 }
 0x9e6   :  { %v1593_v22 = vpop.permute.xlu1 %1592 }
 0x9e7   :  { %6959 = vpow2.f32 %v1580_v20  ;;  %6500 = vmatpush3.msra.mxu1 %v1593_v22  ;;  %v1983_v22 = vld [vmem:[%s7957_s10 + $0x38] sm:$0xff] }
 0x9e8   :  { %6502 = vmatmul.mubr.msk.f32.vlgmr.msra.gmra.mrb[20].mxu1 %vm175_vm2, %v1590_v21  ;;  %v1982_v21 = vld [vmem:[%s7957_s10 + $0x30] sm:$0xff] }
 0x9f1   :  { %v6960_v23 = vpop.eup %6959 }
 0x9f2   :  { %v1585_v24 = vsel %vm175_vm2, %v6960_v23, 0.0 }
 0x9f3   :  { %1586 = vadd.xlane.f32.xlu0 %v1585_v24  ;;  %v6095_v24 = vld [vmem:[%s7956_s9] ss:$0 sm:$0xff] }
 0xa09   :  { %1668 = vrot.lane.b32.xlu0 %v7222_v13, %s7973_s29  ;;  %s7999_s29 = smov 72  }
 0xa80   :  { %v1587_v12 = vpop.xlane.xlu0 %1586 }
 0xa81   :  { %6961 = vrcp.f32 %v1587_v12 }
 0xa84   :  { %v1669_v26 = vpop.permute.xlu0 %1668 }
 0xa85   :  { %6505 = vmatpush3.msra.mxu0 %v1669_v26 }
 0xa86   :  { %6509 = vmatprep.subr.mxu0 %v82_v25 }
 0xa8b   :  { %v6962_v27 = vpop.eup %6961 }
 0xa8c   :  { %v1591_v28 = vmul.f32 %v6962_v27, %v6960_v23  ;;  %v6835_v23 = vpack.c.bf16 %v1983_v22, %v1982_v21 }
 0xa8e   :  { %6507 = vmatmul.mubr.msk.f32.vlgmr.msra.gmra.mrb[12].mxu0 %vm175_vm2, %v1591_v28 }
 0xa8f   :  { %6510 = vmatpush3.msra.mxu0 %v82_v25 }
 0xa90   :  { %6824 = vmatprep.subr.bf16.mxu0 %v6823_v58 }
 0xabb   :  { %v1664_v29 = vpop.f32.mrb[20].mxu1 }
 0xabc   :  { %v6503_v30 = vpop.f32.mrb[21].mxu1  ;;  %6511 = vmatprep.mubr.msk.f32.mxu0 %vm175_vm2, %v1664_v29 }
 0xabd   :  { %v6098_v30 = vld [vmem:[%s7958_s11] ss:$0 sm:$0xff] }
 0xb61   :  { %v1740_v31 = vpop.f32.mrb[12].mxu0 }
 0xb62   :  { %v6508_v13 = vpop.f32.mrb[13].mxu0  ;;  %6512 = vmatmul.mubr.msk.f32.vlgmr.msra.gmra.mrb[6].mxu0 %vm175_vm2, %v1740_v31 }
 0xb63   :  { %6826 = vmatpush3.bf16.msra.mxu0 %v6823_v58 }
 0xb64   :  { %6828 = vmatprep.subr.bf16.mxu0 %v6827_v60 }
 0xb67   :  { %6830 = vmatpush3.bf16.msra.mxu0 %v6827_v60 }
 0xb68   :  { %6832 = vmatprep.subr.bf16.mxu0 %v6831_v63 }
 0xb6b   :  { %6834 = vmatpush3.bf16.msra.mxu0 %v6831_v63  ;;  %v6102_v63 = vld [vmem:[%s7960_s13] ss:$0 sm:$0xff] }
 0xb6c   :  { %6836 = vmatprep.subr.bf16.mxu0 %v6835_v23 }
 0xb6f   :  { %6838 = vmatpush3.bf16.msra.mxu0 %v6835_v23 }
 0xb70   :  { %6565 = vmatprep.subr.mxu0 %v7067_v8 }
 0xc35   :  { %v6513_v33 = vpop.f32.mrb[6].mxu0 }
 0xc36   :  { %v1834_v34 = vadd.f32 %v6513_v33, %v6092_v32  ;;  %v1816_v35 = vpop.f32.mrb[7].mxu0 }
 0xc37   :  { %v1833_v36 = vadd.f32 %v6092_v32, %v1816_v35 }
 0xc38   :  { %v1836_v37 = vadd.f32 %v1834_v34, %v7205_v7 }
 0xc39   :  { %v1835_v38 = vadd.f32 %v1833_v36, %v7198_v5  ;;  %v1882_v5 = vld [vmem:[%s7955_s8] sm:$0xff] }
 0xc3a   :  { %v1842_v39 = vsel %vm90_vm0, %v1836_v37, 0.0  ;;  %v6815_v51 = vpack.c.bf16 %v1883_v50, %v1882_v5  ;;  %v6105_v5 = vld [vmem:[%s7991_s20 + $0x30] sm:$0xff]  ;;  %v6106_v50 = vld [vmem:[%s7991_s20 + $0x38] sm:$0xff] }
 0xc3b   :  { %1843 = vadd.xlane.f32.xlu0 %v1842_v39  ;;  %v1839_v40 = vsel %vm90_vm0, %v1835_v38, 0.0 }
 0xc3c   :  { %1840 = vadd.xlane.f32.xlu1 %v1839_v40  ;;  %6816 = vmatprep.subr.bf16.mxu1 %v6815_v51 }
 0xc3d   :  { %6818 = vmatpush3.bf16.msra.mxu1 %v6815_v51  ;;  %v6843_v51 = vpack.c.bf16 %v6106_v50, %v6105_v5 }
 0xc3e   :  { %6820 = vmatprep.subr.bf16.mxu1 %v6819_v54 }
 0xc41   :  { %6822 = vmatpush3.bf16.msra.mxu1 %v6819_v54 }
 0xcc8   :  { %v1844_v41 = vpop.xlane.xlu0 %1843 }
 0xcc9   :  { %v1847_v42 = vmul.f32 0.03125, %v1844_v41  ;;  %v1841_v43 = vpop.xlane.xlu1 %1840 }
 0xcca   :  { %v1846_v44 = vmul.f32 0.03125, %v1841_v43 }
 0xccb   :  { %v1849_v45 = vsub.f32 %v1836_v37, %v1847_v42 }
 0xccc   :  { %v1848_v46 = vsub.f32 %v1835_v38, %v1846_v44 }
 0xccd   :  { %v1851_v47 = vmul.f32 %v1849_v45, %v1849_v45 }
 0xcce   :  { %v1850_v48 = vmul.f32 %v1848_v46, %v1848_v46 }
 0xccf   :  { %v1855_v49 = vsel %vm90_vm0, %v1851_v47, 0.0 }
 0xcd0   :  { %1856 = vadd.xlane.f32.xlu0 %v1855_v49  ;;  %v1852_v7 = vsel %vm90_vm0, %v1850_v48, 0.0  ;;  %v6103_v48 = vld [vmem:[%s7991_s20 + $0x20] sm:$0xff]  ;;  %v6104_v49 = vld [vmem:[%s7991_s20 + $0x28] sm:$0xff] }
 0xcd1   :  { %1853 = vadd.xlane.f32.xlu1 %v1852_v7  ;;  %v6839_v7 = vpack.c.bf16 %v6104_v49, %v6103_v48 }
 0xcd3   :  { %6840 = vmatprep.subr.bf16.mxu1 %v6839_v7 }
 0xd5d   :  { %v1857_v0 = vpop.xlane.xlu0 %1856 }
 0xd5e   :  { %v1859_v1 = vmul.f32 0.03125, %v1857_v0  ;;  %v1854_v2 = vpop.xlane.xlu1 %1853 }
 0xd5f   :  { %v1858_v3 = vmul.f32 0.03125, %v1854_v2 }
 0xd60   :  { %v1861_v4 = vadd.f32 1e-05, %v1859_v1 }
 0xd61   :  { %v1860_v6 = vadd.f32 1e-05, %v1858_v3 }
 0xd62   :  { %6963 = vrsqrt.f32 %v1861_v4  ;;  %v6113_v4 = vld [vmem:[%s7993_s30 + $0x1] ss:$0 sm:$0xff]  ;;  %s7994_s30 = smov 88  }
 0xd63   :  { %6965 = vrsqrt.f32 %v1860_v6 }
 0xd6c   :  { %v6964_v9 = vpop.eup %6963 }
 0xd6d   :  { %v6966_v11 = vpop.eup %6965  ;;  %v1865_v14 = vmul.f32 %v6964_v9, %v1849_v45 }
 0xd6e   :  { %v1864_v15 = vmul.f32 %v6966_v11, %v1848_v46 }
 0xd6f   :  { %v1873_v17 = vmul.f32 %v6093_v10, %v1865_v14 }
 0xd70   :  { %v1872_v18 = vmul.f32 %v6093_v10, %v1864_v15 }
 0xd71   :  { %v1881_v20 = vadd.f32 %v6094_v16, %v1873_v17 }
 0xd72   :  { %v1880_v19 = vadd.f32 %v6094_v16, %v1872_v18 }
 0xd74   :  { %6522 = vmatprep.mubr.msk.f32.mxu1 %vm90_vm0, %v1880_v19 }
 0xd75   :  { %6523 = vmatmul.mubr.msk.f32.vlgmr.msra.gmra.mrb[22].mxu1 %vm90_vm0, %v1881_v20 }
 0xd76   :  { %6842 = vmatpush3.bf16.msra.mxu1 %v6839_v7 }
 0xd77   :  { %6844 = vmatprep.subr.bf16.mxu1 %v6843_v51 }
 0xd7a   :  { %6846 = vmatpush3.bf16.msra.mxu1 %v6843_v51 }
 0xd7b   :  { %6555 = vmatprep.subr.mxu1 %v7067_v8 }
 0xe48   :  { %v6524_v12 = vpop.f32.mrb[22].mxu1 }
 0xe49   :  { %v1971_v25 = vadd.f32 %v6524_v12, %v6095_v24  ;;  %v1965_v26 = vpop.f32.mrb[23].mxu1 }
 0xe4a   :  { %v1966_v27 = vadd.f32 %v6095_v24, %v1965_v26 }
 0xe4b   :  { %v1975_v29 = vmax.f32 %v1971_v25, 0.0 }
 0xe4c   :  { %v1974_v28 = vmax.f32 %v1966_v27, 0.0 }
 0xe4e   :  { %6541 = vmatprep.mubr.msk.f32.mxu0 %vm1991_vm3, %v1974_v28 }
 0xe4f   :  { %6542 = vmatmul.mubr.msk.f32.vlgmr.msra.gmra.mrb[14].mxu0 %vm1991_vm3, %v1975_v29 }
 0xe50   :  { %6567 = vmatprep.mubr.msk.f32.mxu0 %vm7068_vm1, %v7067_v8 }
 0xf22   :  { %v6543_v31 = vpop.f32.mrb[14].mxu0 }
 0xf23   :  { %v2070_v13 = vadd.f32 %v6543_v31, %v6098_v30  ;;  %v2064_v32 = vpop.f32.mrb[15].mxu0 }
 0xf24   :  { %v2065_v33 = vadd.f32 %v6098_v30, %v2064_v32 }
 0xf25   :  { %v2074_v34 = vadd.f32 %v2070_v13, %v1881_v20 }
 0xf26   :  { %v2073_v35 = vadd.f32 %v2065_v33, %v1880_v19 }
 0xf27   :  { %v2080_v36 = vsel %vm90_vm0, %v2074_v34, 0.0 }
 0xf28   :  { %2081 = vadd.xlane.f32.xlu0 %v2080_v36  ;;  %v2077_v37 = vsel %vm90_vm0, %v2073_v35, 0.0 }
 0xf29   :  { %2078 = vadd.xlane.f32.xlu1 %v2077_v37 }
 0xfb5   :  { %v2082_v38 = vpop.xlane.xlu0 %2081 }
 0xfb6   :  { %v2084_v39 = vmul.f32 0.03125, %v2082_v38  ;;  %v2079_v40 = vpop.xlane.xlu1 %2078 }
 0xfb7   :  { %v2083_v41 = vmul.f32 0.03125, %v2079_v40 }
 0xfb8   :  { %v2086_v42 = vsub.f32 %v2074_v34, %v2084_v39 }
 0xfb9   :  { %v2085_v43 = vsub.f32 %v2073_v35, %v2083_v41 }
 0xfba   :  { %v2088_v44 = vmul.f32 %v2086_v42, %v2086_v42 }
 0xfbb   :  { %v2087_v45 = vmul.f32 %v2085_v43, %v2085_v43 }
 0xfbc   :  { %v2092_v46 = vsel %vm90_vm0, %v2088_v44, 0.0 }
 0xfbd   :  { %2093 = vadd.xlane.f32.xlu0 %v2092_v46  ;;  %v2089_v47 = vsel %vm90_vm0, %v2087_v45, 0.0 }
 0xfbe   :  { %2090 = vadd.xlane.f32.xlu1 %v2089_v47 }
0x104a   :  { %v2094_v52 = vpop.xlane.xlu0 %2093 }
0x104b   :  { %v2096_v53 = vmul.f32 0.03125, %v2094_v52  ;;  %v2091_v54 = vpop.xlane.xlu1 %2090 }
0x104c   :  { %v2095_v55 = vmul.f32 0.03125, %v2091_v54 }
0x104d   :  { %v2098_v56 = vadd.f32 1e-05, %v2096_v53 }
0x104e   :  { %v2097_v57 = vadd.f32 1e-05, %v2095_v55 }
0x104f   :  { %6967 = vrsqrt.f32 %v2098_v56 }
0x1050   :  { %6969 = vrsqrt.f32 %v2097_v57 }
0x1059   :  { %v6968_v58 = vpop.eup %6967 }
0x105a   :  { %v6970_v60 = vpop.eup %6969  ;;  %v2102_v61 = vmul.f32 %v6968_v58, %v2086_v42 }
0x105b   :  { %v2101_v62 = vmul.f32 %v6970_v60, %v2085_v43 }
0x105c   :  { %v2110_v0 = vmul.f32 %v6101_v59, %v2102_v61 }
0x105d   :  { %v2109_v1 = vmul.f32 %v6101_v59, %v2101_v62 }
0x105e   :  { %v7465_v3 = vadd.f32 %v6102_v63, %v2110_v0 }
0x105f   :  { %v7463_v2 = vadd.f32 %v6102_v63, %v2109_v1 }
0x1061   :  { %6552 = vmatprep.mubr.msk.f32.mxu1 %vm90_vm0, %v7463_v2 }
0x1062   :  { %6553 = vmatmul.mubr.msk.f32.vlgmr.msra.gmra.mrb[24].mxu1 %vm90_vm0, %v7465_v3 }
0x1063   :  { %6557 = vmatprep.mubr.msk.f32.mxu1 %vm7068_vm1, %v7067_v8 }
0x1135   :  { %v6554_v6 = vpop.f32.mrb[24].mxu1 }
0x1136   :  { %v7476_v9 = vadd.f32 %v6554_v6, %v6113_v4  ;;  %v2211_v10 = vpop.f32.mrb[25].mxu1 }
0x1137   :  { %v7478_v11 = vadd.f32 %v6113_v4, %v2211_v10 }
0x1138   :  { %2298 = vrot.lane.b32.xlu0 %v7476_v9, %s7069_s21 }
0x1139   :  { %2221 = vrot.lane.b32.xlu1 %v7478_v11, %s7069_s21 }
0x11aa   :  { %v2299_v15 = vpop.permute.xlu0 %2298 }
0x11ab   :  { %v2222_v14 = vpop.permute.xlu1 %2221 }
0x11ac   :  { %6556 = vmatpush3.xpose.msk.msra.mxu1 %vm175_vm2, %v2222_v14 }
0x11ad   :  { %6560 = vmatprep.subr.mxu1 %v7067_v8 }
0x11af   :  { %6558 = vmatmul.mubr.msk.f32.vlgmr.msra.gmra.mrb[26].mxu1 %vm175_vm2, %v7478_v11 }
0x11b0   :  { %6561 = vmatpush3.xpose.msk.msra.mxu1 %vm175_vm2, %v2299_v15  ;;  %6562 = vmatprep.mubr.msk.f32.mxu1 %vm7068_vm1, %v7067_v8 }
0x11b1   :  { %6570 = vmatprep.subr.mxu1 %v7067_v8 }
0x11b3   :  { %6563 = vmatmul.mubr.msk.f32.vlgmr.msra.gmra.mrb[28].mxu1 %vm175_vm2, %v7476_v9 }
0x11b4   :  { %6572 = vmatprep.mubr.msk.f32.mxu1 %vm7068_vm1, %v7067_v8 }
0x1282   :  { %v2293_v16 = vpop.f32.mrb[26].mxu1 }
0x1283   :  { %v6559_v17 = vpop.f32.mrb[27].mxu1  ;;  %v2374_v22 = vmul.f32 0.35355338, %v2293_v16 }
0x1285   :  { %v2376_v23 = vsel %vm175_vm2, %v2374_v22, -inf }
0x1286   :  { %v2370_v18 = vpop.f32.mrb[28].mxu1 }
0x1287   :  { %v2375_v19 = vmul.f32 0.35355338, %v2370_v18  ;;  %v6564_v20 = vpop.f32.mrb[29].mxu1 }
0x1289   :  { %v2379_v21 = vsel %vm175_vm2, %v2375_v19, -inf }
0x128a   :  { %2380 = vmax.xlane.f32.xlu1 %v2379_v21 }
0x129b   :  { %2474 = vrot.lane.b32.xlu1 %v7476_v9, %s7070_s1 }
0x129f   :  { %2628 = vrot.lane.b32.xlu1 %v7476_v9, %s7072_s2 }
0x12c3   :  { %2377 = vmax.xlane.f32.xlu1 %v2376_v23 }
0x12d4   :  { %2552 = vrot.lane.b32.xlu1 %v7478_v11, %s7994_s30 }
0x12d8   :  { %2550 = vrot.lane.b32.xlu1 %v7478_v11, %s7072_s2 }
0x12dc   :  { %3046 = vrot.lane.b32.xlu1 %v7478_v11, %s7995_s23 }
0x1317   :  { %v2381_v24 = vpop.xlane.xlu1 %2380 }
0x1318   :  { %v2383_v12 = vsub.f32 %v2375_v19, %v2381_v24 }
0x131a   :  { %v2386_v25 = vmul.f32 1.442695, %v2383_v12 }
0x131b   :  { %v2475_v26 = vpop.permute.xlu1 %2474 }
0x131c   :  { %6971 = vpow2.f32 %v2386_v25  ;;  %6571 = vmatpush3.msra.mxu1 %v2475_v26 }
0x131d   :  { %6580 = vmatprep.subr.mxu1 %v7067_v8 }
0x131f   :  { %v2629_v29 = vpop.permute.xlu1 %2628 }
0x1326   :  { %v6972_v27 = vpop.eup %6971 }
0x1327   :  { %v2391_v28 = vsel %vm175_vm2, %v6972_v27, 0.0 }
0x1328   :  { %2392 = vadd.xlane.f32.xlu0 %v2391_v28 }
0x133e   :  { %2630 = vrot.lane.b32.xlu0 %v7476_v9, %s7994_s30 }
0x1350   :  { %v2378_v30 = vpop.xlane.xlu1 %2377 }
0x1351   :  { %v2382_v31 = vsub.f32 %v2374_v22, %v2378_v30 }
0x1353   :  { %v2384_v13 = vmul.f32 1.442695, %v2382_v31  ;;  %v6109_v31 = vld [vmem:[%s7951_s4 + $0x28] sm:$0xff] }
0x1354   :  { %v2553_v41 = vpop.permute.xlu1 %2552 }
0x1355   :  { %6973 = vpow2.f32 %v2384_v13  ;;  %v6108_v13 = vld [vmem:[%s7951_s4 + $0x20] sm:$0xff] }
0x1358   :  { %v2551_v43 = vpop.permute.xlu1 %2550 }
0x135c   :  { %v3047_v60 = vpop.permute.xlu1 %3046 }
0x135f   :  { %v6974_v32 = vpop.eup %6973 }
0x1360   :  { %v2388_v33 = vsel %vm175_vm2, %v6974_v32, 0.0 }
0x1361   :  { %2389 = vadd.xlane.f32.xlu0 %v2388_v33 }
0x1377   :  { %2398 = vrot.lane.b32.xlu0 %v7478_v11, %s7070_s1  ;;  %s7996_s1 = smov 56  }
0x13b5   :  { %v2393_v34 = vpop.xlane.xlu0 %2392 }
0x13b6   :  { %6975 = vrcp.f32 %v2393_v34 }
0x13b9   :  { %v2631_v37 = vpop.permute.xlu0 %2630 }
0x13c0   :  { %v6976_v35 = vpop.eup %6975 }
0x13c1   :  { %v2397_v36 = vmul.f32 %v6976_v35, %v6972_v27 }
0x13c3   :  { %6573 = vmatmul.mubr.msk.f32.vlgmr.msra.gmra.mrb[30].mxu1 %vm175_vm2, %v2397_v36 }
0x13c4   :  { %6581 = vmatpush3.xpose.msk.msra.mxu1 %vm175_vm2, %v2631_v37  ;;  %6582 = vmatprep.mubr.msk.f32.mxu1 %vm7068_vm1, %v7067_v8 }
0x13c5   :  { %6590 = vmatprep.subr.mxu1 %v7067_v8 }
0x13c7   :  { %6583 = vmatmul.mubr.msk.f32.vlgmr.msra.gmra.mrb[32].mxu1 %vm175_vm2, %v2629_v29 }
0x13c8   :  { %6592 = vmatprep.mubr.msk.f32.mxu1 %vm7068_vm1, %v7067_v8 }
0x13ee   :  { %v2390_v38 = vpop.xlane.xlu0 %2389 }
0x13ef   :  { %6977 = vrcp.f32 %v2390_v38 }
0x13f2   :  { %v2399_v39 = vpop.permute.xlu0 %2398 }
0x13f3   :  { %6566 = vmatpush3.msra.mxu0 %v2399_v39 }
0x13f4   :  { %6575 = vmatprep.subr.mxu0 %v7067_v8 }
0x13f9   :  { %v6978_v40 = vpop.eup %6977 }
0x13fa   :  { %v2396_v42 = vmul.f32 %v6978_v40, %v6974_v32 }
0x13fc   :  { %6568 = vmatmul.mubr.msk.f32.vlgmr.msra.gmra.mrb[16].mxu0 %vm175_vm2, %v2396_v42 }
0x13fd   :  { %6576 = vmatpush3.xpose.msk.msra.mxu0 %vm175_vm2, %v2553_v41  ;;  %6577 = vmatprep.mubr.msk.f32.mxu0 %vm7068_vm1, %v7067_v8 }
0x13fe   :  { %6585 = vmatprep.subr.mxu0 %v7067_v8 }
0x1400   :  { %6578 = vmatmul.mubr.msk.f32.vlgmr.msra.gmra.mrb[18].mxu0 %vm175_vm2, %v2551_v43 }
0x1401   :  { %6587 = vmatprep.mubr.msk.f32.mxu0 %vm7068_vm1, %v7067_v8 }
0x1496   :  { %v7532_v44 = vpop.f32.mrb[30].mxu1 }
0x1497   :  { %v6574_v45 = vpop.f32.mrb[31].mxu1 }
0x149a   :  { %v2702_v46 = vpop.f32.mrb[32].mxu1 }
0x149b   :  { %v2707_v47 = vmul.f32 0.35355338, %v2702_v46  ;;  %v6584_v48 = vpop.f32.mrb[33].mxu1 }
0x149d   :  { %v2711_v49 = vsel %vm175_vm2, %v2707_v47, -inf }
0x149e   :  { %2712 = vmax.xlane.f32.xlu0 %v2711_v49 }
0x14b4   :  { %2806 = vrot.lane.b32.xlu0 %v7476_v9, %s7996_s1 }
0x14b8   :  { %3044 = vrot.lane.b32.xlu0 %v7478_v11, %s7997_s24 }
0x14bc   :  { %3122 = vrot.lane.b32.xlu0 %v7476_v9, %s7997_s24 }
0x14cf   :  { %v7541_v7 = vpop.f32.mrb[16].mxu0 }
0x14d0   :  { %v6569_v5 = vpop.f32.mrb[17].mxu0 }
0x14d3   :  { %v2624_v50 = vpop.f32.mrb[18].mxu0 }
0x14d4   :  { %v6579_v51 = vpop.f32.mrb[19].mxu0  ;;  %v2706_v58 = vmul.f32 0.35355338, %v2624_v50 }
0x14d6   :  { %v2708_v59 = vsel %vm175_vm2, %v2706_v58, -inf }
0x152b   :  { %v2713_v52 = vpop.xlane.xlu0 %2712 }
0x152c   :  { %v2715_v53 = vsub.f32 %v2707_v47, %v2713_v52  ;;  %v6110_v47 = vld [vmem:[%s7951_s4 + $0x30] sm:$0xff] }
0x152e   :  { %v2718_v54 = vmul.f32 1.442695, %v2715_v53 }
0x152f   :  { %v2807_v55 = vpop.permute.xlu0 %2806 }
0x1530   :  { %6979 = vpow2.f32 %v2718_v54  ;;  %6591 = vmatpush3.msra.mxu1 %v2807_v55 }
0x1531   :  { %6605 = vmatprep.subr.mxu1 %v7067_v8 }
0x1533   :  { %v3045_v0 = vpop.permute.xlu0 %3044 }
0x1537   :  { %v3123_v4 = vpop.permute.xlu0 %3122 }
0x153a   :  { %v6980_v56 = vpop.eup %6979 }
0x153b   :  { %v2723_v57 = vsel %vm175_vm2, %v6980_v56, 0.0 }
0x153c   :  { %2724 = vadd.xlane.f32.xlu1 %v2723_v57 }
0x154d   :  { %3124 = vrot.lane.b32.xlu1 %v7476_v9, %s7995_s23 }
0x1571   :  { %2709 = vmax.xlane.f32.xlu1 %v2708_v59 }
0x15c9   :  { %v2725_v61 = vpop.xlane.xlu1 %2724 }
0x15ca   :  { %6981 = vrcp.f32 %v2725_v61 }
0x15cd   :  { %v3125_v1 = vpop.permute.xlu1 %3124 }
0x15d4   :  { %v6982_v62 = vpop.eup %6981 }
0x15d5   :  { %v2729_v63 = vmul.f32 %v6982_v62, %v6980_v56 }
0x15d7   :  { %6593 = vmatmul.mubr.msk.f32.vlgmr.msra.gmra.mrb[34].mxu1 %vm175_vm2, %v2729_v63 }
0x15d8   :  { %6606 = vmatpush3.xpose.msk.msra.mxu1 %vm175_vm2, %v3047_v60  ;;  %6607 = vmatprep.mubr.msk.f32.mxu1 %vm7068_vm1, %v7067_v8 }
0x15d9   :  { %6610 = vmatprep.subr.mxu1 %v7067_v8 }
0x15db   :  { %6608 = vmatmul.mubr.msk.f32.vlgmr.msra.gmra.mrb[36].mxu1 %vm175_vm2, %v3045_v0 }
0x15dc   :  { %6611 = vmatpush3.xpose.msk.msra.mxu1 %vm175_vm2, %v3125_v1  ;;  %6612 = vmatprep.mubr.msk.f32.mxu1 %vm7068_vm1, %v7067_v8 }
0x15dd   :  { %6620 = vmatprep.subr.mxu1 %v7067_v8 }
0x15df   :  { %6613 = vmatmul.mubr.msk.f32.vlgmr.msra.gmra.mrb[38].mxu1 %vm175_vm2, %v3123_v4 }
0x15e0   :  { %6622 = vmatprep.mubr.msk.f32.mxu1 %vm7068_vm1, %v7067_v8 }
0x15fe   :  { %v2710_v6 = vpop.xlane.xlu1 %2709 }
0x15ff   :  { %v2714_v10 = vsub.f32 %v2706_v58, %v2710_v6 }
0x1601   :  { %v2716_v14 = vmul.f32 1.442695, %v2714_v10 }
0x1603   :  { %6983 = vpow2.f32 %v2716_v14 }
0x160d   :  { %v6984_v15 = vpop.eup %6983 }
0x160e   :  { %v2720_v16 = vsel %vm175_vm2, %v6984_v15, 0.0 }
0x160f   :  { %2721 = vadd.xlane.f32.xlu0 %v2720_v16 }
0x1625   :  { %2730 = vrot.lane.b32.xlu0 %v7478_v11, %s7996_s1  ;;  %s8001_s1 = smov 40  }
0x1629   :  { %3300 = vrot.lane.b32.xlu0 %v7476_v9, %s7998_s27 }
0x162d   :  { %3461 = vrot.lane.b32.xlu0 %v7478_v11, %s7999_s29 }
0x1631   :  { %3539 = vrot.lane.b32.xlu0 %v7476_v9, %s7999_s29 }
0x1635   :  { %3459 = vrot.lane.b32.xlu0 %v7478_v11, %s8000_s0 }
0x169c   :  { %v2722_v17 = vpop.xlane.xlu0 %2721 }
0x169d   :  { %6985 = vrcp.f32 %v2722_v17 }
0x16a0   :  { %v2731_v18 = vpop.permute.xlu0 %2730 }
0x16a1   :  { %6586 = vmatpush3.msra.mxu0 %v2731_v18 }
0x16a2   :  { %6595 = vmatprep.subr.mxu0 %v6109_v31 }
0x16a4   :  { %v3301_v19 = vpop.permute.xlu0 %3300 }
0x16a5   :  { %6621 = vmatpush3.msra.mxu1 %v3301_v19 }
0x16a6   :  { %6630 = vmatprep.subr.mxu1 %v7067_v8 }
0x16a7   :  { %v6986_v20 = vpop.eup %6985 }
0x16a8   :  { %v2728_v21 = vmul.f32 %v6986_v20, %v6984_v15  ;;  %v3462_v49 = vpop.permute.xlu0 %3461 }
0x16aa   :  { %6588 = vmatmul.mubr.msk.f32.vlgmr.msra.gmra.mrb[20].mxu0 %vm175_vm2, %v2728_v21  ;;  %v2878_v22 = vpop.f32.mrb[34].mxu1 }
0x16ab   :  { %v6594_v23 = vpop.f32.mrb[35].mxu1  ;;  %6596 = vmatpush3.msra.mxu0 %v6109_v31  ;;  %v6148_v31 = vld [vmem:[%s7952_s5 + $0x1] ss:$0 sm:$0xff] }
0x16ac   :  { %6600 = vmatprep.subr.mxu0 %v6108_v13  ;;  %v3540_v50 = vpop.permute.xlu0 %3539 }
0x16ae   :  { %v3118_v24 = vpop.f32.mrb[36].mxu1 }
0x16af   :  { %v3200_v12 = vmul.f32 0.35355338, %v3118_v24  ;;  %v6609_v25 = vpop.f32.mrb[37].mxu1 }
0x16b0   :  { %v3460_v52 = vpop.permute.xlu0 %3459 }
0x16b1   :  { %v3202_v26 = vsel %vm175_vm2, %v3200_v12, -inf }
0x16b2   :  { %3203 = vmax.xlane.f32.xlu1 %v3202_v26  ;;  %v3196_v27 = vpop.f32.mrb[38].mxu1 }
0x16b3   :  { %v3201_v28 = vmul.f32 0.35355338, %v3196_v27  ;;  %v6614_v29 = vpop.f32.mrb[39].mxu1 }
0x16b5   :  { %v3205_v30 = vsel %vm175_vm2, %v3201_v28, -inf }
0x16b6   :  { %3206 = vmax.xlane.f32.xlu1 %v3205_v30 }
0x173f   :  { %v3204_v32 = vpop.xlane.xlu1 %3203 }
0x1740   :  { %v3208_v33 = vsub.f32 %v3200_v12, %v3204_v32  ;;  %v6111_v12 = vld [vmem:[%s7951_s4 + $0x38] sm:$0xff] }
0x1742   :  { %v3210_v34 = vmul.f32 1.442695, %v3208_v33 }
0x1743   :  { %v3207_v35 = vpop.xlane.xlu1 %3206 }
0x1744   :  { %6987 = vpow2.f32 %v3210_v34  ;;  %v3209_v36 = vsub.f32 %v3201_v28, %v3207_v35 }
0x1746   :  { %v3212_v37 = vmul.f32 1.442695, %v3209_v36 }
0x1748   :  { %6989 = vpow2.f32 %v3212_v37 }
0x174e   :  { %v6988_v38 = vpop.eup %6987 }
0x174f   :  { %v3214_v39 = vsel %vm175_vm2, %v6988_v38, 0.0 }
0x1750   :  { %3215 = vadd.xlane.f32.xlu1 %v3214_v39 }
0x1752   :  { %v6990_v40 = vpop.eup %6989 }
0x1753   :  { %v3217_v41 = vsel %vm175_vm2, %v6990_v40, 0.0 }
0x1754   :  { %3218 = vadd.xlane.f32.xlu1 %v3217_v41 }
0x1765   :  { %3224 = vrot.lane.b32.xlu1 %v7478_v11, %s7998_s27 }
0x1769   :  { %3537 = vrot.lane.b32.xlu1 %v7476_v9, %s8000_s0 }
0x177d   :  { %v2802_v42 = vpop.f32.mrb[20].mxu0 }
0x177e   :  { %v6589_v43 = vpop.f32.mrb[21].mxu0  ;;  %6597 = vmatprep.mubr.msk.f32.mxu0 %vm175_vm2, %v2802_v42 }
0x177f   :  { %6598 = vmatmul.mubr.msk.f32.vlgmr.msra.gmra.mrb[22].mxu0 %vm175_vm2, %v2878_v22 }
0x1780   :  { %6602 = vmatprep.mubr.msk.f32.mxu0 %vm175_vm2, %v7541_v7  ;;  %6601 = vmatpush3.msra.mxu0 %v6108_v13 }
0x1781   :  { %6615 = vmatprep.subr.mxu0 %v7067_v8 }
0x1787   :  { %6603 = vmatmul.mubr.msk.f32.vlgmr.msra.gmra.mrb[22].mxu0 %vm175_vm2, %v7532_v44 }
0x1788   :  { %6617 = vmatprep.mubr.msk.f32.mxu0 %vm7068_vm1, %v7067_v8 }
0x17dd   :  { %v3216_v45 = vpop.xlane.xlu1 %3215 }
0x17de   :  { %6991 = vrcp.f32 %v3216_v45 }
0x17e1   :  { %v3219_v46 = vpop.xlane.xlu1 %3218 }
0x17e2   :  { %6993 = vrcp.f32 %v3219_v46 }
0x17e5   :  { %v3225_v48 = vpop.permute.xlu1 %3224 }
0x17e6   :  { %6616 = vmatpush3.msra.mxu0 %v3225_v48 }
0x17e7   :  { %6625 = vmatprep.subr.mxu0 %v6110_v47 }
0x17e8   :  { %v6992_v7 = vpop.eup %6991 }
0x17e9   :  { %v3222_v5 = vmul.f32 %v6992_v7, %v6988_v38  ;;  %v3538_v57 = vpop.permute.xlu1 %3537 }
0x17eb   :  { %6618 = vmatmul.mubr.msk.f32.vlgmr.msra.gmra.mrb[24].mxu0 %vm175_vm2, %v3222_v5  ;;  %v6155_v5 = vld [vmem:[%s7955_s8 + $0x30] sm:$0xff] }
0x17ec   :  { %v6994_v44 = vpop.eup %6993  ;;  %6626 = vmatpush3.msra.mxu0 %v6110_v47 }
0x17ed   :  { %v3223_v51 = vmul.f32 %v6994_v44, %v6990_v40  ;;  %6635 = vmatprep.subr.mxu0 %v7067_v8  ;;  %v6156_v44 = vld [vmem:[%s7955_s8 + $0x38] sm:$0xff] }
0x17ef   :  { %6623 = vmatmul.mubr.msk.f32.vlgmr.msra.gmra.mrb[40].mxu1 %vm175_vm2, %v3223_v51  ;;  %v6161_v51 = vld [vmem:[%s7957_s10 + $0x40] sm:$0xff] }
0x17f0   :  { %6631 = vmatpush3.xpose.msk.msra.mxu1 %vm175_vm2, %v3462_v49  ;;  %6632 = vmatprep.mubr.msk.f32.mxu1 %vm7068_vm1, %v7067_v8  ;;  %v6154_v49 = vld [vmem:[%s7955_s8 + $0x28] sm:$0xff] }
0x17f1   :  { %6640 = vmatprep.subr.mxu1 %v7067_v8 }
0x17f3   :  { %6633 = vmatmul.mubr.msk.f32.vlgmr.msra.gmra.mrb[42].mxu1 %vm175_vm2, %v3460_v52  ;;  %v6162_v52 = vld [vmem:[%s7957_s10 + $0x48] sm:$0xff] }
0x17f4   :  { %6642 = vmatprep.mubr.msk.f32.mxu1 %vm7068_vm1, %v7067_v8 }
0x18be   :  { %v3296_v53 = vpop.f32.mrb[24].mxu0 }
0x18bf   :  { %v6619_v54 = vpop.f32.mrb[25].mxu0  ;;  %6627 = vmatprep.mubr.msk.f32.mxu0 %vm175_vm2, %v3296_v53  ;;  %v6163_v53 = vld [vmem:[%s7957_s10 + $0x50] sm:$0xff] }
0x18c0   :  { %v6855_v54 = vpack.c.bf16 %v6162_v52, %v6161_v51 }
0x18c2   :  { %v3372_v55 = vpop.f32.mrb[40].mxu1 }
0x18c3   :  { %v6624_v56 = vpop.f32.mrb[41].mxu1  ;;  %6628 = vmatmul.mubr.msk.f32.vlgmr.msra.gmra.mrb[22].mxu0 %vm175_vm2, %v3372_v55  ;;  %v6164_v55 = vld [vmem:[%s7957_s10 + $0x58] sm:$0xff] }
0x18c4   :  { %6636 = vmatpush3.xpose.msk.msra.mxu0 %vm175_vm2, %v3540_v50  ;;  %6637 = vmatprep.mubr.msk.f32.mxu0 %vm7068_vm1, %v7067_v8  ;;  %v6851_v50 = vpack.c.bf16 %v6156_v44, %v6155_v5  ;;  %v6859_v56 = vpack.c.bf16 %v6164_v55, %v6163_v53 }
0x18c5   :  { %6645 = vmatprep.subr.mxu0 %v7067_v8 }
0x18c6   :  { %v3533_v58 = vpop.f32.mrb[42].mxu1 }
0x18c7   :  { %v3615_v59 = vmul.f32 0.35355338, %v3533_v58  ;;  %v6634_v60 = vpop.f32.mrb[43].mxu1  ;;  %6638 = vmatmul.mubr.msk.f32.vlgmr.msra.gmra.mrb[26].mxu0 %vm175_vm2, %v3538_v57  ;;  %v6165_v57 = vld [vmem:[%s7957_s10 + $0x60] sm:$0xff]  ;;  %v6166_v58 = vld [vmem:[%s7957_s10 + $0x68] sm:$0xff] }
0x18c8   :  { %6647 = vmatprep.mubr.msk.f32.mxu0 %vm7068_vm1, %v7067_v8 }
0x18c9   :  { %v3617_v61 = vsel %vm175_vm2, %v3615_v59, -inf }
0x18ca   :  { %3618 = vmax.xlane.f32.xlu0 %v3617_v61 }
0x1957   :  { %v3619_v62 = vpop.xlane.xlu0 %3618 }
0x1958   :  { %v3623_v63 = vsub.f32 %v3615_v59, %v3619_v62  ;;  %v6863_v59 = vpack.c.bf16 %v6166_v58, %v6165_v57 }
0x195a   :  { %v3625_v0 = vmul.f32 1.442695, %v3623_v63 }
0x195c   :  { %6995 = vpow2.f32 %v3625_v0 }
0x1966   :  { %v6996_v1 = vpop.eup %6995 }
0x1967   :  { %v3629_v4 = vsel %vm175_vm2, %v6996_v1, 0.0 }
0x1968   :  { %3630 = vadd.xlane.f32.xlu0 %v3629_v4 }
0x199a   :  { %v3611_v6 = vpop.f32.mrb[26].mxu0 }
0x199b   :  { %v3616_v10 = vmul.f32 0.35355338, %v3611_v6  ;;  %v6639_v14 = vpop.f32.mrb[27].mxu0  ;;  %v6151_v6 = vld [vmem:[%s7953_s6 + $0x1] ss:$0 sm:$0xff] }
0x199d   :  { %v3620_v15 = vsel %vm175_vm2, %v3616_v10, -inf }
0x199e   :  { %3621 = vmax.xlane.f32.xlu1 %v3620_v15 }
0x19af   :  { %3639 = vrot.lane.b32.xlu1 %v7478_v11, %s8001_s1 }
0x19f5   :  { %v3631_v16 = vpop.xlane.xlu0 %3630 }
0x19f6   :  { %6997 = vrcp.f32 %v3631_v16  ;;  %v6152_v16 = vld [vmem:[%s7954_s7 + $0x1] ss:$0 sm:$0xff] }
0x1a00   :  { %v6998_v18 = vpop.eup %6997 }
0x1a01   :  { %v3637_v21 = vmul.f32 %v6998_v18, %v6996_v1 }
0x1a2b   :  { %v3622_v17 = vpop.xlane.xlu1 %3621 }
0x1a2c   :  { %v3624_v19 = vsub.f32 %v3616_v10, %v3622_v17 }
0x1a2e   :  { %v3627_v20 = vmul.f32 1.442695, %v3624_v19 }
0x1a2f   :  { %v3640_v22 = vpop.permute.xlu1 %3639 }
0x1a30   :  { %6999 = vpow2.f32 %v3627_v20  ;;  %6641 = vmatpush3.msra.mxu1 %v3640_v22  ;;  %v6168_v22 = vld [vmem:[%s7957_s10 + $0x78] sm:$0xff] }
0x1a31   :  { %6643 = vmatmul.mubr.msk.f32.vlgmr.msra.gmra.mrb[44].mxu1 %vm175_vm2, %v3637_v21  ;;  %v6167_v21 = vld [vmem:[%s7957_s10 + $0x70] sm:$0xff]  ;;  %s8002_s10 = sld [smem:[#allocation6_spill]] }
0x1a3a   :  { %v7000_v23 = vpop.eup %6999 }
0x1a3b   :  { %v3632_v24 = vsel %vm175_vm2, %v7000_v23, 0.0 }
0x1a3c   :  { %3633 = vadd.xlane.f32.xlu0 %v3632_v24  ;;  %v6158_v24 = vld [vmem:[%s7956_s9 + $0x1] ss:$0 sm:$0xff] }
0x1a52   :  { %3715 = vrot.lane.b32.xlu0 %v7476_v9, %s8001_s1 }
0x1ac9   :  { %v3634_v11 = vpop.xlane.xlu0 %3633 }
0x1aca   :  { %7001 = vrcp.f32 %v3634_v11 }
0x1acd   :  { %v3716_v25 = vpop.permute.xlu0 %3715 }
0x1ace   :  { %6646 = vmatpush3.msra.mxu0 %v3716_v25 }
0x1acf   :  { %6650 = vmatprep.subr.mxu0 %v6111_v12 }
0x1ad4   :  { %v7002_v26 = vpop.eup %7001 }
0x1ad5   :  { %v3638_v27 = vmul.f32 %v7002_v26, %v7000_v23  ;;  %v6867_v23 = vpack.c.bf16 %v6168_v22, %v6167_v21  ;;  %v7738_v21 = vld [vmem:[%s8002_s10 + $0x8] sm:$0xff] }
0x1ad7   :  { %6648 = vmatmul.mubr.msk.f32.vlgmr.msra.gmra.mrb[28].mxu0 %vm175_vm2, %v3638_v27 }
0x1ad8   :  { %6651 = vmatpush3.msra.mxu0 %v6111_v12 }
0x1ad9   :  { %6856 = vmatprep.subr.bf16.mxu0 %v6855_v54 }
0x1b04   :  { %v3711_v28 = vpop.f32.mrb[44].mxu1 }
0x1b05   :  { %v6644_v29 = vpop.f32.mrb[45].mxu1  ;;  %6652 = vmatprep.mubr.msk.f32.mxu0 %vm175_vm2, %v3711_v28 }
0x1b06   :  { %v6170_v29 = vld [vmem:[%s7958_s11 + $0x1] ss:$0 sm:$0xff] }
0x1baa   :  { %v3787_v30 = vpop.f32.mrb[28].mxu0 }
0x1bab   :  { %v6649_v9 = vpop.f32.mrb[29].mxu0  ;;  %6653 = vmatmul.mubr.msk.f32.vlgmr.msra.gmra.mrb[22].mxu0 %vm175_vm2, %v3787_v30 }
0x1bac   :  { %6858 = vmatpush3.bf16.msra.mxu0 %v6855_v54 }
0x1bad   :  { %6860 = vmatprep.subr.bf16.mxu0 %v6859_v56 }
0x1bb0   :  { %6862 = vmatpush3.bf16.msra.mxu0 %v6859_v56 }
0x1bb1   :  { %6864 = vmatprep.subr.bf16.mxu0 %v6863_v59 }
0x1bb4   :  { %6866 = vmatpush3.bf16.msra.mxu0 %v6863_v59 }
0x1bb5   :  { %6868 = vmatprep.subr.bf16.mxu0 %v6867_v23 }
0x1bb8   :  { %6870 = vmatpush3.bf16.msra.mxu0 %v6867_v23 }
0x1bb9   :  { %6707 = vmatprep.subr.mxu0 %v7067_v8 }
0x1c7e   :  { %v6654_v13 = vpop.f32.mrb[22].mxu0 }
0x1c7f   :  { %v3881_v32 = vadd.f32 %v6654_v13, %v6148_v31  ;;  %v3863_v33 = vpop.f32.mrb[23].mxu0 }
0x1c80   :  { %v3880_v34 = vadd.f32 %v6148_v31, %v3863_v33 }
0x1c81   :  { %v3883_v35 = vadd.f32 %v3881_v32, %v7465_v3 }
0x1c82   :  { %v3882_v36 = vadd.f32 %v3880_v34, %v7463_v2  ;;  %v6153_v2 = vld [vmem:[%s7955_s8 + $0x20] sm:$0xff] }
0x1c83   :  { %v3891_v37 = vsel %vm90_vm0, %v3883_v35, 0.0  ;;  %v6847_v7 = vpack.c.bf16 %v6154_v49, %v6153_v2  ;;  %v64_v2 = vld [vmem:[%s7961_s14 + $0x10] sm:$0xff]  ;;  %v65_v49 = vld [vmem:[%s7961_s14 + $0x18] sm:$0xff] }
0x1c84   :  { %3892 = vadd.xlane.f32.xlu0 %v3891_v37  ;;  %v3888_v38 = vsel %vm90_vm0, %v3882_v36, 0.0  ;;  %v6875_v44 = vpack.c.bf16 %v65_v49, %v64_v2 }
0x1c85   :  { %3889 = vadd.xlane.f32.xlu1 %v3888_v38  ;;  %6848 = vmatprep.subr.bf16.mxu1 %v6847_v7 }
0x1c86   :  { %6850 = vmatpush3.bf16.msra.mxu1 %v6847_v7  ;;  %v6926_v7 = vpack.i.bf16 %v65_v49, %v64_v2 }
0x1c87   :  { %6852 = vmatprep.subr.bf16.mxu1 %v6851_v50 }
0x1c8a   :  { %6854 = vmatpush3.bf16.msra.mxu1 %v6851_v50  ;;  %v6177_v50 = vld [vmem:[%s7962_s15] ss:$0 sm:$0xff] }
0x1d11   :  { %v3893_v39 = vpop.xlane.xlu0 %3892 }
0x1d12   :  { %v3895_v40 = vmul.f32 0.03125, %v3893_v39  ;;  %v3890_v41 = vpop.xlane.xlu1 %3889 }
0x1d13   :  { %v3894_v42 = vmul.f32 0.03125, %v3890_v41 }
0x1d14   :  { %v3897_v43 = vsub.f32 %v3883_v35, %v3895_v40 }
0x1d15   :  { %v3896_v45 = vsub.f32 %v3882_v36, %v3894_v42 }
0x1d16   :  { %v3899_v46 = vmul.f32 %v3897_v43, %v3897_v43 }
0x1d17   :  { %v3898_v47 = vmul.f32 %v3896_v45, %v3896_v45 }
0x1d18   :  { %v3903_v48 = vsel %vm90_vm0, %v3899_v46, 0.0 }
0x1d19   :  { %3904 = vadd.xlane.f32.xlu0 %v3903_v48  ;;  %v3900_v3 = vsel %vm90_vm0, %v3898_v47, 0.0  ;;  %v62_v47 = vld [vmem:[%s7961_s14] sm:$0xff]  ;;  %v63_v48 = vld [vmem:[%s7961_s14 + $0x8] sm:$0xff] }
0x1d1a   :  { %3901 = vadd.xlane.f32.xlu1 %v3900_v3  ;;  %v6921_v3 = vpack.i.bf16 %v63_v48, %v62_v47  ;;  %v6871_v5 = vpack.c.bf16 %v63_v48, %v62_v47 }
0x1d1c   :  { %6872 = vmatprep.subr.bf16.mxu1 %v6871_v5 }
0x1da6   :  { %v3905_v60 = vpop.xlane.xlu0 %3904 }
0x1da7   :  { %v3907_v61 = vmul.f32 0.03125, %v3905_v60  ;;  %v3902_v62 = vpop.xlane.xlu1 %3901 }
0x1da8   :  { %v3906_v63 = vmul.f32 0.03125, %v3902_v62 }
0x1da9   :  { %v3909_v0 = vadd.f32 1e-05, %v3907_v61 }
0x1daa   :  { %v3908_v1 = vadd.f32 1e-05, %v3906_v63  ;;  %v6175_v63 = vld [vmem:[%s7959_s12 + $0x1] ss:$0 sm:$0xff] }
0x1dab   :  { %7003 = vrsqrt.f32 %v3909_v0 }
0x1dac   :  { %7005 = vrsqrt.f32 %v3908_v1 }
0x1db5   :  { %v7004_v4 = vpop.eup %7003 }
0x1db6   :  { %v7006_v10 = vpop.eup %7005  ;;  %v3913_v14 = vmul.f32 %v7004_v4, %v3897_v43 }
0x1db7   :  { %v3912_v15 = vmul.f32 %v7006_v10, %v3896_v45 }
0x1db8   :  { %v3921_v17 = vmul.f32 %v6151_v6, %v3913_v14  ;;  %v6176_v14 = vld [vmem:[%s7960_s13 + $0x1] ss:$0 sm:$0xff] }
0x1db9   :  { %v3920_v18 = vmul.f32 %v6151_v6, %v3912_v15 }
0x1dba   :  { %v3929_v20 = vadd.f32 %v6152_v16, %v3921_v17 }
0x1dbb   :  { %v3928_v19 = vadd.f32 %v6152_v16, %v3920_v18 }
0x1dbd   :  { %6663 = vmatprep.mubr.msk.f32.mxu1 %vm90_vm0, %v3928_v19 }
0x1dbe   :  { %6664 = vmatmul.mubr.msk.f32.vlgmr.msra.gmra.mrb[46].mxu1 %vm90_vm0, %v3929_v20 }
0x1dbf   :  { %6874 = vmatpush3.bf16.msra.mxu1 %v6871_v5 }
0x1dc0   :  { %6876 = vmatprep.subr.bf16.mxu1 %v6875_v44 }
0x1dc3   :  { %6878 = vmatpush3.bf16.msra.mxu1 %v6875_v44 }
0x1e91   :  { %v6665_v11 = vpop.f32.mrb[46].mxu1 }
0x1e92   :  { %v4021_v12 = vadd.f32 %v6665_v11, %v6158_v24  ;;  %v4015_v25 = vpop.f32.mrb[47].mxu1 }
0x1e93   :  { %v4016_v26 = vadd.f32 %v6158_v24, %v4015_v25 }
0x1e94   :  { %v4025_v28 = vmax.f32 %v4021_v12, 0.0 }
0x1e95   :  { %v4024_v27 = vmax.f32 %v4016_v26, 0.0 }
0x1e97   :  { %6682 = vmatprep.mubr.msk.f32.mxu0 %vm1991_vm3, %v4024_v27 }
0x1e98   :  { %6683 = vmatmul.mubr.msk.f32.vlgmr.msra.gmra.mrb[30].mxu0 %vm1991_vm3, %v4025_v28 }
0x1e99   :  { %6709 = vmatprep.mubr.msk.f32.mxu0 %vm7068_vm1, %v7067_v8 }
0x1f6b   :  { %v6684_v30 = vpop.f32.mrb[30].mxu0 }
0x1f6c   :  { %v4121_v9 = vadd.f32 %v6684_v30, %v6170_v29  ;;  %v4115_v31 = vpop.f32.mrb[31].mxu0 }
0x1f6d   :  { %v4116_v13 = vadd.f32 %v6170_v29, %v4115_v31 }
0x1f6e   :  { %v4125_v32 = vadd.f32 %v4121_v9, %v3929_v20  ;;  %v7729_v20 = vld [vmem:[%s8002_s10] sm:$0xff] }
0x1f6f   :  { %v4124_v33 = vadd.f32 %v4116_v13, %v3928_v19 }
0x1f70   :  { %v4133_v34 = vsel %vm90_vm0, %v4125_v32, 0.0 }
0x1f71   :  { %4134 = vadd.xlane.f32.xlu0 %v4133_v34  ;;  %v4130_v35 = vsel %vm90_vm0, %v4124_v33, 0.0 }
0x1f72   :  { %4131 = vadd.xlane.f32.xlu1 %v4130_v35 }
0x1ffe   :  { %v4135_v36 = vpop.xlane.xlu0 %4134 }
0x1fff   :  { %v4137_v37 = vmul.f32 0.03125, %v4135_v36  ;;  %v4132_v38 = vpop.xlane.xlu1 %4131 }
0x2000   :  { %v4136_v39 = vmul.f32 0.03125, %v4132_v38 }
0x2001   :  { %v4139_v40 = vsub.f32 %v4125_v32, %v4137_v37 }
0x2002   :  { %v4138_v41 = vsub.f32 %v4124_v33, %v4136_v39 }
0x2003   :  { %v4141_v42 = vmul.f32 %v4139_v40, %v4139_v40 }
0x2004   :  { %v4140_v43 = vmul.f32 %v4138_v41, %v4138_v41 }
0x2005   :  { %v4145_v45 = vsel %vm90_vm0, %v4141_v42, 0.0 }
0x2006   :  { %4146 = vadd.xlane.f32.xlu0 %v4145_v45  ;;  %v4142_v46 = vsel %vm90_vm0, %v4140_v43, 0.0 }
0x2007   :  { %4143 = vadd.xlane.f32.xlu1 %v4142_v46 }
0x2018   :  { %6922 = vrot.lane.b32.xlu1 %v6921_v3, %s7069_s21 }
0x201c   :  { %6927 = vrot.lane.b32.xlu0 %v6926_v7, %s7069_s21  ;;  %4277 = vrot.lane.b32.xlu1 %v6177_v50, %s7069_s21 }
0x2093   :  { %v4147_v51 = vpop.xlane.xlu0 %4146 }
0x2094   :  { %v4149_v52 = vmul.f32 0.03125, %v4147_v51  ;;  %v4144_v53 = vpop.xlane.xlu1 %4143 }
0x2095   :  { %v4148_v54 = vmul.f32 0.03125, %v4144_v53 }
0x2096   :  { %v4151_v55 = vadd.f32 1e-05, %v4149_v52 }
0x2097   :  { %v4150_v56 = vadd.f32 1e-05, %v4148_v54  ;;  %v6928_v62 = vpop.permute.xlu0 %6927 }
0x2098   :  { %7007 = vrsqrt.f32 %v4151_v55  ;;  %v6923_v57 = vpop.permute.xlu1 %6922  ;;  %v6930_v6 = vunpack.i.h.bf16 %v6928_v62  ;;  %v6929_v10 = vunpack.i.l.bf16 %v6928_v62 }
0x2099   :  { %7009 = vrsqrt.f32 %v4150_v56  ;;  %v6925_v58 = vunpack.i.h.bf16 %v6923_v57  ;;  %v6924_v59 = vunpack.i.l.bf16 %v6923_v57 }
0x209a   :  { %v6883_v18 = vpack.c.bf16 %v6930_v6, %v6929_v10 }
0x209b   :  { %v6879_v60 = vpack.c.bf16 %v6925_v58, %v6924_v59 }
0x209c   :  { %v4278_v24 = vpop.permute.xlu1 %4277 }
0x209d   :  { %6880 = vmatprep.subr.bf16.mxu1 %v6879_v60 }
0x20a2   :  { %v7008_v61 = vpop.eup %7007 }
0x20a3   :  { %v7010_v0 = vpop.eup %7009  ;;  %v4155_v1 = vmul.f32 %v7008_v61, %v4139_v40 }
0x20a4   :  { %v4154_v4 = vmul.f32 %v7010_v0, %v4138_v41 }
0x20a5   :  { %v4163_v15 = vmul.f32 %v6175_v63, %v4155_v1 }
0x20a6   :  { %v4162_v16 = vmul.f32 %v6175_v63, %v4154_v4 }
0x20a7   :  { %v4171_v19 = vadd.f32 %v6176_v14, %v4163_v15 }
0x20a8   :  { %v4170_v17 = vadd.f32 %v6176_v14, %v4162_v16 }
0x20aa   :  { %6693 = vmatprep.mubr.msk.f32.mxu1 %vm90_vm0, %v4170_v17 }
0x20ab   :  { %6694 = vmatmul.mubr.msk.f32.vlgmr.msra.gmra.mrb[48].mxu1 %vm90_vm0, %v4171_v19 }
0x20ac   :  { %6882 = vmatpush3.bf16.msra.mxu1 %v6879_v60  ;;  %6704 = vmatprep.mubr.msk.f32.mxu1 %vm90_vm0, %v7729_v20 }
0x20ad   :  { %6884 = vmatprep.subr.bf16.mxu1 %v6883_v18 }
0x20b0   :  { %6886 = vmatpush3.bf16.msra.mxu1 %v6883_v18 }
0x20b1   :  { %6712 = vmatprep.subr.mxu1 %v7067_v8 }
0x20b3   :  { %6705 = vmatmul.mubr.msk.f32.vlgmr.msra.gmra.mrb[50].mxu1 %vm90_vm0, %v7738_v21 }
0x20b4   :  { %6714 = vmatprep.mubr.msk.f32.mxu1 %vm7068_vm1, %v7067_v8 }
0x217e   :  { %v6695_v22 = vpop.f32.mrb[48].mxu1 }
0x217f   :  { %v4252_v23 = vpop.f32.mrb[49].mxu1  ;;  %v7751_v27 = vadd.f32 %v6695_v22, %v6177_v50 }
0x2180   :  { %v7756_v28 = vadd.f32 %v6177_v50, %v4252_v23 }
0x2186   :  { %v6706_v11 = vpop.f32.mrb[50].mxu1 }
0x2187   :  { %v7745_v12 = vadd.f32 %v6706_v11, %v4278_v24  ;;  %v4352_v25 = vpop.f32.mrb[51].mxu1 }
0x2188   :  { %v7747_v26 = vadd.f32 %v4352_v25, %v4278_v24 }
0x2189   :  { %6713 = vmatpush3.xpose.msk.msra.mxu1 %vm175_vm2, %v7745_v12 }
0x218a   :  { %6708 = vmatpush3.xpose.msk.msra.mxu0 %vm175_vm2, %v7747_v26  ;;  %6722 = vmatprep.subr.mxu1 %v7067_v8 }
0x218b   :  { %6717 = vmatprep.subr.mxu0 %v7067_v8 }
0x218c   :  { %6715 = vmatmul.mubr.msk.f32.vlgmr.msra.gmra.mrb[52].mxu1 %vm175_vm2, %v7751_v27 }
0x218d   :  { %6710 = vmatmul.mubr.msk.f32.vlgmr.msra.gmra.mrb[32].mxu0 %vm175_vm2, %v7756_v28  ;;  %6724 = vmatprep.mubr.msk.f32.mxu1 %vm7068_vm1, %v7067_v8 }
0x218e   :  { %6719 = vmatprep.mubr.msk.f32.mxu0 %vm7068_vm1, %v7067_v8 }
0x225f   :  { %v4509_v29 = vpop.f32.mrb[52].mxu1 }
0x2260   :  { %v4514_v30 = vmul.f32 0.35355338, %v4509_v29  ;;  %v4433_v9 = vpop.f32.mrb[32].mxu0  ;;  %v6716_v31 = vpop.f32.mrb[53].mxu1 }
0x2261   :  { %v6711_v13 = vpop.f32.mrb[33].mxu0  ;;  %v4513_v38 = vmul.f32 0.35355338, %v4433_v9 }
0x2262   :  { %v4518_v32 = vsel %vm175_vm2, %v4514_v30, -inf }
0x2263   :  { %4519 = vmax.xlane.f32.xlu1 %v4518_v32  ;;  %v4515_v39 = vsel %vm175_vm2, %v4513_v38, -inf }
0x2274   :  { %4771 = vrot.lane.b32.xlu1 %v7745_v12, %s7072_s2 }
0x2278   :  { %4769 = vrot.lane.b32.xlu1 %v7751_v27, %s7072_s2 }
0x22f0   :  { %v4520_v33 = vpop.xlane.xlu1 %4519 }
0x22f1   :  { %v4522_v34 = vsub.f32 %v4514_v30, %v4520_v33 }
0x22f3   :  { %v4525_v35 = vmul.f32 1.442695, %v4522_v34 }
0x22f4   :  { %v4772_v43 = vpop.permute.xlu1 %4771 }
0x22f5   :  { %7011 = vpow2.f32 %v4525_v35 }
0x22f8   :  { %v4770_v46 = vpop.permute.xlu1 %4769 }
0x22ff   :  { %v7012_v36 = vpop.eup %7011 }
0x2300   :  { %v4530_v37 = vsel %vm175_vm2, %v7012_v36, 0.0 }
0x2301   :  { %4531 = vadd.xlane.f32.xlu0 %v4530_v37 }
0x2317   :  { %4613 = vrot.lane.b32.xlu0 %v7745_v12, %s7069_s21 }
0x2336   :  { %4516 = vmax.xlane.f32.xlu0 %v4515_v39 }
0x234c   :  { %4537 = vrot.lane.b32.xlu0 %v7747_v26, %s7069_s21 }
0x2350   :  { %4691 = vrot.lane.b32.xlu0 %v7756_v28, %s7072_s2 }
0x238e   :  { %v4532_v40 = vpop.xlane.xlu0 %4531 }
0x238f   :  { %7013 = vrcp.f32 %v4532_v40 }
0x2392   :  { %v4614_v41 = vpop.permute.xlu0 %4613 }
0x2393   :  { %6723 = vmatpush3.msra.mxu1 %v4614_v41 }
0x2394   :  { %6732 = vmatprep.subr.mxu1 %v7067_v8 }
0x2399   :  { %v7014_v42 = vpop.eup %7013 }
0x239a   :  { %v7781_v45 = vmul.f32 %v7014_v42, %v7012_v36 }
0x239c   :  { %6725 = vmatmul.mubr.msk.f32.vlgmr.msra.gmra.mrb[54].mxu1 %vm175_vm2, %v7781_v45 }
0x239d   :  { %6733 = vmatpush3.xpose.msk.msra.mxu1 %vm175_vm2, %v4772_v43  ;;  %6734 = vmatprep.mubr.msk.f32.mxu1 %vm7068_vm1, %v7067_v8  ;;  %v68_v43 = vld [vmem:[%s7963_s16 + $0x8] sm:$0xff] }
0x239e   :  { %6742 = vmatprep.subr.mxu1 %v7067_v8 }
0x23a0   :  { %6735 = vmatmul.mubr.msk.f32.vlgmr.msra.gmra.mrb[56].mxu1 %vm175_vm2, %v4770_v46  ;;  %v67_v46 = vld [vmem:[%s7963_s16] sm:$0xff] }
0x23a1   :  { %6744 = vmatprep.mubr.msk.f32.mxu1 %vm7068_vm1, %v7067_v8 }
0x23c3   :  { %v4517_v47 = vpop.xlane.xlu0 %4516 }
0x23c4   :  { %v4521_v48 = vsub.f32 %v4513_v38, %v4517_v47 }
0x23c6   :  { %v4523_v3 = vmul.f32 1.442695, %v4521_v48 }
0x23c7   :  { %v4538_v2 = vpop.permute.xlu0 %4537 }
0x23c8   :  { %7015 = vpow2.f32 %v4523_v3  ;;  %6718 = vmatpush3.msra.mxu0 %v4538_v2 }
0x23c9   :  { %6727 = vmatprep.subr.mxu0 %v7067_v8 }
0x23cb   :  { %v4692_v54 = vpop.permute.xlu0 %4691 }
0x23d2   :  { %v7016_v49 = vpop.eup %7015 }
0x23d3   :  { %v4527_v7 = vsel %vm175_vm2, %v7016_v49, 0.0 }
0x23d4   :  { %4528 = vadd.xlane.f32.xlu1 %v4527_v7 }
0x23e5   :  { %4693 = vrot.lane.b32.xlu1 %v7747_v26, %s7072_s2 }
0x2461   :  { %v4529_v5 = vpop.xlane.xlu1 %4528 }
0x2462   :  { %7017 = vrcp.f32 %v4529_v5 }
0x2465   :  { %v4694_v51 = vpop.permute.xlu1 %4693 }
0x246c   :  { %v7018_v44 = vpop.eup %7017 }
0x246d   :  { %v7796_v50 = vmul.f32 %v7018_v44, %v7016_v49 }
0x246f   :  { %6720 = vmatmul.mubr.msk.f32.vlgmr.msra.gmra.mrb[34].mxu0 %vm175_vm2, %v7796_v50  ;;  %v7800_v52 = vpop.f32.mrb[54].mxu1 }
0x2470   :  { %6728 = vmatpush3.xpose.msk.msra.mxu0 %vm175_vm2, %v4694_v51  ;;  %v6726_v53 = vpop.f32.mrb[55].mxu1  ;;  %6729 = vmatprep.mubr.msk.f32.mxu0 %vm7068_vm1, %v7067_v8 }
0x2471   :  { %6737 = vmatprep.subr.mxu0 %v7067_v8 }
0x2473   :  { %6730 = vmatmul.mubr.msk.f32.vlgmr.msra.gmra.mrb[36].mxu0 %vm175_vm2, %v4692_v54  ;;  %v4843_v55 = vpop.f32.mrb[56].mxu1 }
0x2474   :  { %v4848_v56 = vmul.f32 0.35355338, %v4843_v55  ;;  %v6736_v57 = vpop.f32.mrb[57].mxu1  ;;  %6739 = vmatprep.mubr.msk.f32.mxu0 %vm7068_vm1, %v7067_v8 }
0x2476   :  { %v4852_v58 = vsel %vm175_vm2, %v4848_v56, -inf }
0x2477   :  { %4853 = vmax.xlane.f32.xlu1 %v4852_v58  ;;  %v69_v58 = vld [vmem:[%s7963_s16 + $0x10] sm:$0xff] }
0x2488   :  { %5189 = vrot.lane.b32.xlu1 %v7747_v26, %s7997_s24 }
0x248c   :  { %5187 = vrot.lane.b32.xlu1 %v7756_v28, %s7997_s24 }
0x2490   :  { %5265 = vrot.lane.b32.xlu1 %v7751_v27, %s7997_s24 }
0x2504   :  { %v4854_v59 = vpop.xlane.xlu1 %4853 }
0x2505   :  { %v4856_v60 = vsub.f32 %v4848_v56, %v4854_v59 }
0x2507   :  { %v4859_v61 = vmul.f32 1.442695, %v4856_v60 }
0x2508   :  { %v5190_v17 = vpop.permute.xlu1 %5189 }
0x2509   :  { %7019 = vpow2.f32 %v4859_v61 }
0x250c   :  { %v5188_v22 = vpop.permute.xlu1 %5187 }
0x2510   :  { %v5266_v24 = vpop.permute.xlu1 %5265 }
0x2513   :  { %v7020_v62 = vpop.eup %7019 }
0x2514   :  { %v4864_v63 = vsel %vm175_vm2, %v7020_v62, 0.0 }
0x2515   :  { %4865 = vadd.xlane.f32.xlu0 %v4864_v63 }
0x252b   :  { %4947 = vrot.lane.b32.xlu0 %v7745_v12, %s7994_s30 }
0x252f   :  { %5267 = vrot.lane.b32.xlu0 %v7745_v12, %s7997_s24 }
0x2542   :  { %v7821_v0 = vpop.f32.mrb[34].mxu0 }
0x2543   :  { %v6721_v1 = vpop.f32.mrb[35].mxu0 }
0x2546   :  { %v4765_v4 = vpop.f32.mrb[36].mxu0 }
0x2547   :  { %v6731_v6 = vpop.f32.mrb[37].mxu0  ;;  %v4847_v10 = vmul.f32 0.35355338, %v4765_v4 }
0x2549   :  { %v4849_v14 = vsel %vm175_vm2, %v4847_v10, -inf }
0x254e   :  { %4850 = vmax.xlane.f32.xlu0 %v4849_v14 }
0x2564   :  { %4871 = vrot.lane.b32.xlu0 %v7747_v26, %s7994_s30 }
0x2568   :  { %5443 = vrot.lane.b32.xlu0 %v7745_v12, %s7995_s23 }
0x256c   :  { %5606 = vrot.lane.b32.xlu0 %v7747_v26, %s8000_s0 }
0x2570   :  { %5684 = vrot.lane.b32.xlu0 %v7745_v12, %s8000_s0 }
0x2574   :  { %5604 = vrot.lane.b32.xlu0 %v7756_v28, %s8000_s0 }
0x2578   :  { %5682 = vrot.lane.b32.xlu0 %v7751_v27, %s8000_s0 }
0x25a2   :  { %v4866_v15 = vpop.xlane.xlu0 %4865 }
0x25a3   :  { %7021 = vrcp.f32 %v4866_v15 }
0x25a6   :  { %v4948_v16 = vpop.permute.xlu0 %4947 }
0x25a7   :  { %6743 = vmatpush3.msra.mxu1 %v4948_v16 }
0x25a8   :  { %6757 = vmatprep.subr.mxu1 %v7067_v8 }
0x25aa   :  { %v5268_v23 = vpop.permute.xlu0 %5267 }
0x25ad   :  { %v7022_v18 = vpop.eup %7021 }
0x25ae   :  { %v7837_v19 = vmul.f32 %v7022_v18, %v7020_v62 }
0x25b0   :  { %6745 = vmatmul.mubr.msk.f32.vlgmr.msra.gmra.mrb[58].mxu1 %vm175_vm2, %v7837_v19  ;;  %v5186_v4 = vadd.f32 %v7837_v19, %v7781_v45 }
0x25b1   :  { %6758 = vmatpush3.xpose.msk.msra.mxu1 %vm175_vm2, %v5190_v17  ;;  %6759 = vmatprep.mubr.msk.f32.mxu1 %vm7068_vm1, %v7067_v8 }
0x25b2   :  { %6762 = vmatprep.subr.mxu1 %v7067_v8 }
0x25b4   :  { %6760 = vmatmul.mubr.msk.f32.vlgmr.msra.gmra.mrb[60].mxu1 %vm175_vm2, %v5188_v22 }
0x25b5   :  { %6763 = vmatpush3.xpose.msk.msra.mxu1 %vm175_vm2, %v5268_v23  ;;  %6764 = vmatprep.mubr.msk.f32.mxu1 %vm7068_vm1, %v7067_v8 }
0x25b6   :  { %6772 = vmatprep.subr.mxu1 %v7067_v8 }
0x25b8   :  { %6765 = vmatmul.mubr.msk.f32.vlgmr.msra.gmra.mrb[62].mxu1 %vm175_vm2, %v5266_v24 }
0x25b9   :  { %6774 = vmatprep.mubr.msk.f32.mxu1 %vm7068_vm1, %v7067_v8 }
0x25db   :  { %v4851_v11 = vpop.xlane.xlu0 %4850 }
0x25dc   :  { %v4855_v25 = vsub.f32 %v4847_v10, %v4851_v11 }
0x25de   :  { %v4857_v27 = vmul.f32 1.442695, %v4855_v25 }
0x25df   :  { %v4872_v28 = vpop.permute.xlu0 %4871 }
0x25e0   :  { %7023 = vpow2.f32 %v4857_v27  ;;  %6738 = vmatpush3.msra.mxu0 %v4872_v28 }
0x25e1   :  { %6747 = vmatprep.subr.mxu0 %v68_v43 }
0x25e3   :  { %v5444_v29 = vpop.permute.xlu0 %5443 }
0x25e4   :  { %6773 = vmatpush3.msra.mxu1 %v5444_v29 }
0x25e5   :  { %6782 = vmatprep.subr.mxu1 %v7067_v8 }
0x25e7   :  { %v5607_v60 = vpop.permute.xlu0 %5606 }
0x25ea   :  { %v7024_v30 = vpop.eup %7023 }
0x25eb   :  { %v4861_v9 = vsel %vm175_vm2, %v7024_v30, 0.0  ;;  %v5685_v1 = vpop.permute.xlu0 %5684 }
0x25ec   :  { %4862 = vadd.xlane.f32.xlu1 %v4861_v9 }
0x2679   :  { %v4863_v31 = vpop.xlane.xlu1 %4862 }
0x267a   :  { %7025 = vrcp.f32 %v4863_v31 }
0x2683   :  { %v5019_v13 = vpop.f32.mrb[58].mxu1 }
0x2684   :  { %v7026_v32 = vpop.eup %7025  ;;  %v6746_v33 = vpop.f32.mrb[59].mxu1 }
0x2685   :  { %v4869_v34 = vmul.f32 %v7026_v32, %v7024_v30 }
0x2687   :  { %6740 = vmatmul.mubr.msk.f32.vlgmr.msra.gmra.mrb[38].mxu0 %vm175_vm2, %v4869_v34  ;;  %v5261_v35 = vpop.f32.mrb[60].mxu1  ;;  %v5185_v62 = vadd.f32 %v4869_v34, %v7796_v50  ;;  %v5605_v50 = vpop.permute.xlu0 %5604 }
0x2688   :  { %v5343_v36 = vmul.f32 0.35355338, %v5261_v35  ;;  %v6761_v37 = vpop.f32.mrb[61].mxu1  ;;  %6748 = vmatpush3.msra.mxu0 %v68_v43 }
0x2689   :  { %6752 = vmatprep.subr.mxu0 %v67_v46 }
0x268a   :  { %v5345_v38 = vsel %vm175_vm2, %v5343_v36, -inf }
0x268b   :  { %v5339_v39 = vpop.f32.mrb[62].mxu1  ;;  %5346 = vmax.xlane.f32.xlu1 %v5345_v38  ;;  %v5683_v17 = vpop.permute.xlu0 %5682 }
0x268c   :  { %v5344_v40 = vmul.f32 0.35355338, %v5339_v39  ;;  %v6766_v41 = vpop.f32.mrb[63].mxu1 }
0x268d   :  { %v70_v41 = vld [vmem:[%s7963_s16 + $0x18] sm:$0xff]  ;;  %s7080_s16 = smov [#allocation2]  }
0x268e   :  { %v5348_v42 = vsel %vm175_vm2, %v5344_v40, -inf }
0x268f   :  { %5349 = vmax.xlane.f32.xlu1 %v5348_v42 }
0x2718   :  { %v5347_v47 = vpop.xlane.xlu1 %5346 }
0x2719   :  { %v5351_v48 = vsub.f32 %v5343_v36, %v5347_v47 }
0x271b   :  { %v5353_v3 = vmul.f32 1.442695, %v5351_v48 }
0x271c   :  { %v5350_v2 = vpop.xlane.xlu1 %5349 }
0x271d   :  { %7027 = vpow2.f32 %v5353_v3  ;;  %v5352_v49 = vsub.f32 %v5344_v40, %v5350_v2 }
0x271f   :  { %v5355_v7 = vmul.f32 1.442695, %v5352_v49 }
0x2721   :  { %7029 = vpow2.f32 %v5355_v7 }
0x2727   :  { %v7028_v5 = vpop.eup %7027 }
0x2728   :  { %v5357_v44 = vsel %vm175_vm2, %v7028_v5, 0.0 }
0x2729   :  { %5358 = vadd.xlane.f32.xlu1 %v5357_v44 }
0x272b   :  { %v7030_v51 = vpop.eup %7029 }
0x272c   :  { %v5360_v53 = vsel %vm175_vm2, %v7030_v51, 0.0 }
0x272d   :  { %5361 = vadd.xlane.f32.xlu1 %v5360_v53 }
0x273e   :  { %5367 = vrot.lane.b32.xlu1 %v7747_v26, %s7995_s23 }
0x275a   :  { %v4943_v54 = vpop.f32.mrb[38].mxu0 }
0x275b   :  { %v6741_v55 = vpop.f32.mrb[39].mxu0  ;;  %6749 = vmatprep.mubr.msk.f32.mxu0 %vm175_vm2, %v4943_v54 }
0x275c   :  { %6750 = vmatmul.mubr.msk.f32.vlgmr.msra.gmra.mrb[40].mxu0 %vm175_vm2, %v5019_v13 }
0x275d   :  { %6754 = vmatprep.mubr.msk.f32.mxu0 %vm175_vm2, %v7821_v0  ;;  %6753 = vmatpush3.msra.mxu0 %v67_v46 }
0x275e   :  { %6767 = vmatprep.subr.mxu0 %v7067_v8 }
0x2764   :  { %6755 = vmatmul.mubr.msk.f32.vlgmr.msra.gmra.mrb[40].mxu0 %vm175_vm2, %v7800_v52 }
0x2765   :  { %6769 = vmatprep.mubr.msk.f32.mxu0 %vm7068_vm1, %v7067_v8 }
0x27b6   :  { %v5359_v56 = vpop.xlane.xlu1 %5358 }
0x27b7   :  { %7031 = vrcp.f32 %v5359_v56 }
0x27ba   :  { %v5362_v57 = vpop.xlane.xlu1 %5361 }
0x27bb   :  { %7033 = vrcp.f32 %v5362_v57 }
0x27be   :  { %v5368_v59 = vpop.permute.xlu1 %5367 }
0x27bf   :  { %6768 = vmatpush3.msra.mxu0 %v5368_v59 }
0x27c0   :  { %6777 = vmatprep.subr.mxu0 %v69_v58 }
0x27c1   :  { %v7032_v61 = vpop.eup %7031 }
0x27c2   :  { %v5365_v63 = vmul.f32 %v7032_v61, %v7028_v5 }
0x27c4   :  { %6770 = vmatmul.mubr.msk.f32.vlgmr.msra.gmra.mrb[42].mxu0 %vm175_vm2, %v5365_v63  ;;  %v5602_v52 = vadd.f32 %v5365_v63, %v5185_v62 }
0x27c5   :  { %v7034_v0 = vpop.eup %7033  ;;  %6778 = vmatpush3.msra.mxu0 %v69_v58 }
0x27c6   :  { %v5366_v6 = vmul.f32 %v7034_v0, %v7030_v51  ;;  %6787 = vmatprep.subr.mxu0 %v7067_v8 }
0x27c8   :  { %6775 = vmatmul.mubr.msk.f32.vlgmr.msra.gmra.mrb[64].mxu1 %vm175_vm2, %v5366_v6  ;;  %v7886_v10 = vadd.f32 %v5366_v6, %v5186_v4 }
0x27c9   :  { %6783 = vmatpush3.xpose.msk.msra.mxu1 %vm175_vm2, %v5607_v60  ;;  %6784 = vmatprep.mubr.msk.f32.mxu1 %vm7068_vm1, %v7067_v8 }
0x27ca   :  { %6792 = vmatprep.subr.mxu1 %v7067_v8 }
0x27cc   :  { %6785 = vmatmul.mubr.msk.f32.vlgmr.msra.gmra.mrb[66].mxu1 %vm175_vm2, %v5605_v50 }
0x27cd   :  { %6794 = vmatprep.mubr.msk.f32.mxu1 %vm7068_vm1, %v7067_v8 }
0x2897   :  { %v5439_v45 = vpop.f32.mrb[42].mxu0 }
0x2898   :  { %v6771_v14 = vpop.f32.mrb[43].mxu0  ;;  %6779 = vmatprep.mubr.msk.f32.mxu0 %vm175_vm2, %v5439_v45 }
0x289b   :  { %v5515_v15 = vpop.f32.mrb[64].mxu1 }
0x289c   :  { %v6776_v16 = vpop.f32.mrb[65].mxu1  ;;  %6780 = vmatmul.mubr.msk.f32.vlgmr.msra.gmra.mrb[40].mxu0 %vm175_vm2, %v5515_v15 }
0x289d   :  { %6788 = vmatpush3.xpose.msk.msra.mxu0 %vm175_vm2, %v5685_v1  ;;  %6789 = vmatprep.mubr.msk.f32.mxu0 %vm7068_vm1, %v7067_v8 }
0x289e   :  { %6797 = vmatprep.subr.mxu0 %v7067_v8 }
0x289f   :  { %v5678_v18 = vpop.f32.mrb[66].mxu1 }
0x28a0   :  { %v5760_v19 = vmul.f32 0.35355338, %v5678_v18  ;;  %v6786_v22 = vpop.f32.mrb[67].mxu1  ;;  %6790 = vmatmul.mubr.msk.f32.vlgmr.msra.gmra.mrb[44].mxu0 %vm175_vm2, %v5683_v17 }
0x28a1   :  { %6799 = vmatprep.mubr.msk.f32.mxu0 %vm7068_vm1, %v7067_v8 }
0x28a2   :  { %v5762_v23 = vsel %vm175_vm2, %v5760_v19, -inf }
0x28a3   :  { %5763 = vmax.xlane.f32.xlu1 %v5762_v23 }
0x2930   :  { %v5764_v24 = vpop.xlane.xlu1 %5763 }
0x2931   :  { %v5768_v11 = vsub.f32 %v5760_v19, %v5764_v24 }
0x2933   :  { %v5770_v25 = vmul.f32 1.442695, %v5768_v11 }
0x2935   :  { %7035 = vpow2.f32 %v5770_v25 }
0x293f   :  { %v7036_v9 = vpop.eup %7035 }
0x2940   :  { %v5774_v31 = vsel %vm175_vm2, %v7036_v9, 0.0 }
0x2973   :  { %v5756_v27 = vpop.f32.mrb[44].mxu0 }
0x2974   :  { %v5761_v28 = vmul.f32 0.35355338, %v5756_v27  ;;  %v6791_v29 = vpop.f32.mrb[45].mxu0 }
0x2976   :  { %v5765_v30 = vsel %vm175_vm2, %v5761_v28, -inf }
0x2977   :  { %5766 = vmax.xlane.f32.xlu0 %v5765_v30 }
0x297b   :  { %5775 = vadd.xlane.f32.xlu0 %v5774_v31 }
0x2991   :  { %5784 = vrot.lane.b32.xlu0 %v7747_v26, %s7999_s29 }
0x2a04   :  { %v5767_v8 = vpop.xlane.xlu0 %5766 }
0x2a05   :  { %v5769_v13 = vsub.f32 %v5761_v28, %v5767_v8 }
0x2a07   :  { %v5772_v32 = vmul.f32 1.442695, %v5769_v13 }
0x2a08   :  { %v5776_v33 = vpop.xlane.xlu0 %5775 }
0x2a09   :  { %7037 = vpow2.f32 %v5772_v32 }
0x2a0a   :  { %7039 = vrcp.f32 %v5776_v33 }
0x2a0c   :  { %v5785_v34 = vpop.permute.xlu0 %5784 }
0x2a0d   :  { %6793 = vmatpush3.msra.mxu1 %v5785_v34 }
0x2a13   :  { %v7038_v35 = vpop.eup %7037 }
0x2a14   :  { %v7040_v36 = vpop.eup %7039  ;;  %v5777_v37 = vsel %vm175_vm2, %v7038_v35, 0.0 }
0x2a15   :  { %v5782_v38 = vmul.f32 %v7040_v36, %v7036_v9  ;;  %5778 = vadd.xlane.f32.xlu1 %v5777_v37 }
0x2a17   :  { %6795 = vmatmul.mubr.msk.f32.vlgmr.msra.gmra.mrb[68].mxu1 %vm175_vm2, %v5782_v38  ;;  %v6019_v39 = vadd.f32 %v5782_v38, %v5602_v52 }
0x2a19   :  { %v6029_v40 = vmul.f32 0.25, %v6019_v39 }
0x2a1b   :  { %6035 = vst.msk [vmem:[#allocation2] sm:$0xff] %vm175_vm2, %v6029_v40 }
0x2a26   :  { %5860 = vrot.lane.b32.xlu1 %v7745_v12, %s7999_s29  ;;  %s6044_s29 = sshll.u32 %s7080_s16, 4  ;;  %s6045_s29 = int_to_ptr.vmem [resolvable:$true] %s6044_s29 }
0x2a27   :  { %s7043_s11 = scalar_lea.vmem %s6045_s29, 256  ;;  %p7048_p1 = scmp.lt.s32.totalorder %s6045_s29, %s6045_s29 }
0x2a28   :  { %p7044_p0 = scmp.ne.s32.totalorder %s6045_s29, %s7043_s11  ;;  %p7049_p2 = scmp.lt.s32.totalorder %s7043_s11, %s7043_s11 }
0x2a2a   :  { %p7050_p3 = por %p7049_p2, %p7048_p1 }
0x2a2c   :  { %p7051_p4 = pnand %p7050_p3, %p7044_p0 }
0x2aa2   :  { %v5779_v26 = vpop.xlane.xlu1 %5778 }
0x2aa3   :  { %7041 = vrcp.f32 %v5779_v26 }
0x2aa6   :  { %v5861_v42 = vpop.permute.xlu1 %5860 }
0x2aa7   :  { %6798 = vmatpush3.msra.mxu0 %v5861_v42 }
0x2aa8   :  { %6802 = vmatprep.subr.mxu0 %v70_v41 }
0x2aad   :  { %v7042_v43 = vpop.eup %7041 }
0x2aae   :  { %v5783_v46 = vmul.f32 %v7042_v43, %v7038_v35 }
0x2ab0   :  { %6800 = vmatmul.mubr.msk.f32.vlgmr.msra.gmra.mrb[46].mxu0 %vm175_vm2, %v5783_v46  ;;  %v6020_v47 = vadd.f32 %v5783_v46, %v7886_v10 }
0x2ab1   :  { %6803 = vmatpush3.msra.mxu0 %v70_v41 }
0x2ab2   :  { %v6030_v48 = vmul.f32 0.25, %v6020_v47 }
0x2ab4   :  { %6036 = vst.msk [vmem:[#allocation2 + $0x8] sm:$0xff] %vm175_vm2, %v6030_v48 }
0x2aea   :  { %v5856_v12 = vpop.f32.mrb[68].mxu1 }
0x2aeb   :  { %v6796_v3 = vpop.f32.mrb[69].mxu1  ;;  %6804 = vmatprep.mubr.msk.f32.mxu0 %vm175_vm2, %v5856_v12 }
0x2b83   :  { %v5932_v2 = vpop.f32.mrb[46].mxu0 }
0x2b84   :  { %v6801_v49 = vpop.f32.mrb[47].mxu0  ;;  %6805 = vmatmul.mubr.msk.f32.vlgmr.msra.gmra.mrb[40].mxu0 %vm175_vm2, %v5932_v2 }
0x2b85   :  { %7054 = shalt.err (!%p7051_p4)
}
0x2b86   :  { %s7055_s20 = scalar_lea.hbm %s7966_s19, 256 }
0x2b87   :  { %p7056_p5 = scmp.ne.s32.totalorder %s7966_s19, %s7055_s20  ;;  %p7059_p6 = scmp.lt.u32.totalorder %s7055_s20, %s7966_s19 }
0x2b89   :  { %p7061_p7 = pnand %p7059_p6, %p7056_p5 }
0x2b8b   :  { %7064 = shalt.err (!%p7061_p7)
}
0x2b8c   :  { %s7081_s3 = smov 128   ;;  %s7082_s14 = smov 8   ;;  %v6214_v7 = vld [vmem:[%s7964_s17] ss:$0 sm:$0xff] }
0x2b8d   :  { %6050 = dma.vmem_to_hbm [thread:$0]  %s6045_s29, 256, %s7966_s19, [#allocation3], %s7081_s3, %s7081_s3, %s7082_s14  }
0x2c57   :  { %v6806_v5 = vpop.f32.mrb[40].mxu0 }
0x2c58   :  { %v6028_v44 = vadd.f32 %v6806_v5, %v6214_v7  ;;  %v6008_v51 = vpop.f32.mrb[41].mxu0 }
0x2c59   :  { %v6027_v53 = vadd.f32 %v6214_v7, %v6008_v51 }
0x2c5a   :  { %v6032_v54 = vadd.f32 %v6028_v44, %v7738_v21 }
0x2c5b   :  { %v6031_v55 = vadd.f32 %v6027_v53, %v7729_v20 }
0x2c5c   :  { %6034 = vst.msk [vmem:[%s7965_s18 + $0x8] sm:$0xff] %vm90_vm0, %v6032_v54 }
0x2c5d   :  { %6033 = vst.msk [vmem:[%s7965_s18] sm:$0xff] %vm90_vm0, %v6031_v55 }
0x2c5e   :  { %7065 = dma.done.wait [#allocation3], 256  }
0x2c5f   :  { %7066 = vsyncadd [#allocation3], 4294967040 }
0x2c60   :  { %6056 = vsyncpa [#allocation3], 1 }

// kernel: mini_transformer_forward.3
= control target key start
LH: loop header
LB: loop body
LE: loop exit
PB: predicated region body
PF: predicated region fallthrough
CT: control target
= control target key end

     0   :  { %8 = vsyncpa [#allocation3], 0  ;;  %s7927_s0 = inlined_call_operand.vmem [shape: f32[2,8,32], index: 0, kind: input, shape index: {}]   ;;  %s7928_s1 = inlined_call_operand.vmem [shape: bf16[2,32,15360], index: 1, kind: input, shape index: {}]   ;;  %s7929_s2 = inlined_call_operand.vmem [shape: f32[2,1,15360], index: 2, kind: input, shape index: {}]   ;;  %s7930_s3 = inlined_call_operand.hbm [shape: bf16[2,8,30000], index: 3, kind: output, shape index: {}]  }
   0x1   :  { %10 = vsyncpa [#allocation3 + $0x1], 0  ;;  %s7013_s12 = smov 0   ;;  %s7015_s13 = smov 0  }
   0x2   :  { %s7017_s14 = smov 0   ;;  %s7019_s15 = smov 0  }
   0x3 LB: > { %s7034_s16 = sadd.s32 4294967295, %s6987_s15   ;;  %s6265_s17 = sadd.s32 4294967294, %s6987_s15   ;;  %s6987_s15 = sphi %s7019_s15, %s7936_s15   ;;  %s6983_s14 = sphi %s7017_s14, %s7935_s14   ;;  %s6979_s13 = sphi %s7015_s13, %s7934_s13   ;;  %s6975_s12 = sphi %s7013_s12, %s7933_s12  }
   0x4   : > { %s7038_s18 = sadd.s32 1, %s6987_s15   ;;  %s96_s19 = sadd.s32 1, %s6983_s14 }
   0x5   : > { %s93_s20 = ssub.s32 %s6987_s15, %s7038_s18  ;;  %p106_p0 = scmp.ne.s32.totalorder %s6983_s14, %s6979_s13 }
   0x6   : > { %p94_p1 = scmp.eq.s32.totalorder %s93_s20, 0  ;;  %p107_p2 = scmp.eq.s32.totalorder %s7034_s16, 1 }
   0x7   : > { %p112_p3 = scmp.ne.s32.totalorder %s6979_s13, %s6975_s12  ;;  %p113_p4 = scmp.eq.s32.totalorder %s6265_s17, 1 }
   0x8   : > { %s7049_s21 = scalar_select %p94_p1, %s6983_s14, %s96_s19  }
   0x9   : > { %p7051_p5 = por %p107_p2, %p106_p0  ;;  %p7055_p6 = por %p113_p4, %p112_p3 }
   0xa   : > { %p6268_p7 = scmp.ge.s32.totalorder %s6987_s15, 1  ;;  %p149_p8 = scmp.lt.s32.totalorder %s6987_s15, 3 }
   0xc   : > { %p150_p9 = pnand %p6268_p7, %p149_p8 }
   0xd   : > { %p177_p10 = scmp.lt.s32.totalorder (!%p150_p9), %s7034_s16, 1  ;;  %v6989_v0 = vmov (!%p150_p9), 0   ;;  %v192_v20 = vld [vmem:[%s7927_s0] sm:$0xff] (!%p150_p9)  ;;  %v193_v21 = vld [vmem:[%s7927_s0 + $0x8] sm:$0xff] (!%p150_p9)  ;;  %vm1635_vm0 = vcmask (!%p150_p9), 261120   ;;  %s174_s10 = sand.u32 (!%p150_p9), 1, %s6979_s13  }
   0xe   : > { %153 = sbr.rel (%p150_p9) target bundleno = 519 (0x207), region = 32  ;;  %1671 = vmatprep.mubr.bf16.mxu0 (!%p150_p9), %v6989_v0  ;;  %1714 = vmatprep.mubr.bf16.mxu1 (!%p150_p9), %v6989_v0  ;;  %v7093_v27 = vpack.c.bf16 (!%p150_p9), %v193_v21, %v192_v20  ;;  %s7860_s19 = scalar_lea.sflag (!%p150_p9), [#allocation3], %s174_s10 }
   0xf   : > { %s7512_s11 = smul.u32 (!%p150_p9), 960, %s174_s10 }
  0x11   : > { %s7570_s17 = scalar_lea.vmem (!%p150_p9), [#allocation2], %s7512_s11 }
  0x15   : > { %s7065_s24 = scalar_select %p177_p10, %s7034_s16, 1 }
  0x16   : > { %s6178_s20 = smul.u32 (%p7051_p5), 120, %s7034_s16 }
  0x17   : > { %s6882_s25 = smul.u32 1920, %s7065_s24 }
  0x18   : > { %s6883_s6 = smul.u32 120, %s7065_s24  ;;  %s6179_s24 = ssub.s32 (%p7051_p5), 235, %s6178_s20 }
  0x19   : > { %s7071_s28 = scalar_lea.vmem %s7928_s1, %s6882_s25  ;;  %p6180_p11 = scmp.lt.s32.totalorder (%p7051_p5), %s6179_s24, 120 }
  0x1a   : > { %v195_v1 = vld [vmem:[%s7071_s28] sm:$0xff]  ;;  %v196_v3 = vld [vmem:[%s7071_s28 + $0x8] sm:$0xff]  ;;  %v197_v14 = vld [vmem:[%s7071_s28 + $0x10] sm:$0xff]  ;;  %s7461_s9 = scalar_lea.vmem %s7929_s2, %s6883_s6 }
  0x1b   : > { %v255_v2 = vld [vmem:[%s7071_s28 + $0x1e0] sm:$0xff]  ;;  %v256_v5 = vld [vmem:[%s7071_s28 + $0x1e8] sm:$0xff]  ;;  %v257_v16 = vld [vmem:[%s7071_s28 + $0x1f0] sm:$0xff] }
  0x1c   : > { %v6271_v4 = vcombine.high %v195_v1, %v255_v2  ;;  %v6270_v6 = vcombine.low %v195_v1, %v255_v2  ;;  %v315_v7 = vld [vmem:[%s7071_s28 + $0x3c0] sm:$0xff]  ;;  %v6273_v9 = vcombine.high %v196_v3, %v256_v5  ;;  %v6272_v10 = vcombine.low %v196_v3, %v256_v5  ;;  %v316_v12 = vld [vmem:[%s7071_s28 + $0x3c8] sm:$0xff]  ;;  %v198_v17 = vld [vmem:[%s7071_s28 + $0x18] sm:$0xff] }
  0x1d   : > { %v375_v8 = vld [vmem:[%s7071_s28 + $0x5a0] sm:$0xff]  ;;  %v376_v13 = vld [vmem:[%s7071_s28 + $0x5a8] sm:$0xff]  ;;  %v258_v18 = vld [vmem:[%s7071_s28 + $0x1f8] sm:$0xff]  ;;  %v6275_v23 = vcombine.high %v197_v14, %v257_v16  ;;  %v6274_v30 = vcombine.low %v197_v14, %v257_v16 }
  0x1e   : > { %v6391_v11 = vcombine.high %v315_v7, %v375_v8  ;;  %1639 = vmatprep.subr.bf16.mxu0 %v6271_v4  ;;  %v6393_v15 = vcombine.high %v316_v12, %v376_v13  ;;  %1682 = vmatprep.subr.bf16.mxu1 %v6273_v9  ;;  %v6390_v19 = vcombine.low %v315_v7, %v375_v8  ;;  %v317_v25 = vld [vmem:[%s7071_s28 + $0x3d0] sm:$0xff]  ;;  %v318_v28 = vld [vmem:[%s7071_s28 + $0x3d8] sm:$0xff]  ;;  %v199_v34 = vld [vmem:[%s7071_s28 + $0x20] sm:$0xff] }
  0x1f   : > { %1640 = vmatpush1.bf16.msra.mxu0 %v6270_v6  ;;  %1683 = vmatpush1.bf16.msra.mxu1 %v6272_v10  ;;  %v6392_v22 = vcombine.low %v316_v12, %v376_v13  ;;  %v6277_v24 = vcombine.high %v198_v17, %v258_v18  ;;  %v377_v26 = vld [vmem:[%s7071_s28 + $0x5b0] sm:$0xff]  ;;  %v378_v29 = vld [vmem:[%s7071_s28 + $0x5b8] sm:$0xff]  ;;  %v6276_v31 = vcombine.low %v198_v17, %v258_v18  ;;  %v259_v35 = vld [vmem:[%s7071_s28 + $0x200] sm:$0xff] }
  0x20   : > { %1641 = vmatprep.subr.bf16.mxu0 %v6391_v11  ;;  %1684 = vmatprep.subr.bf16.mxu1 %v6393_v15  ;;  %v6395_v32 = vcombine.high %v317_v25, %v377_v26  ;;  %v6397_v33 = vcombine.high %v318_v28, %v378_v29  ;;  %v200_v36 = vld [vmem:[%s7071_s28 + $0x28] sm:$0xff]  ;;  %v6394_v38 = vcombine.low %v317_v25, %v377_v26  ;;  %v319_v42 = vld [vmem:[%s7071_s28 + $0x3e0] sm:$0xff]  ;;  %v201_v50 = vld [vmem:[%s7071_s28 + $0x30] sm:$0xff] }
  0x21   : > { %v260_v37 = vld [vmem:[%s7071_s28 + $0x208] sm:$0xff]  ;;  %v6396_v39 = vcombine.low %v318_v28, %v378_v29  ;;  %v6279_v40 = vcombine.high %v199_v34, %v259_v35  ;;  %v379_v43 = vld [vmem:[%s7071_s28 + $0x5c0] sm:$0xff]  ;;  %v6278_v46 = vcombine.low %v199_v34, %v259_v35  ;;  %v261_v51 = vld [vmem:[%s7071_s28 + $0x210] sm:$0xff] }
  0x22   : > { %v6281_v41 = vcombine.high %v200_v36, %v260_v37  ;;  %v320_v44 = vld [vmem:[%s7071_s28 + $0x3e8] sm:$0xff]  ;;  %v6280_v47 = vcombine.low %v200_v36, %v260_v37  ;;  %v6399_v48 = vcombine.high %v319_v42, %v379_v43  ;;  %v202_v52 = vld [vmem:[%s7071_s28 + $0x38] sm:$0xff]  ;;  %v6398_v54 = vcombine.low %v319_v42, %v379_v43  ;;  %v321_v58 = vld [vmem:[%s7071_s28 + $0x3f0] sm:$0xff] }
  0x23   : > { %1642 = vmatpush1.bf16.msra.mxu0 %v6390_v19  ;;  %1685 = vmatpush1.bf16.msra.mxu1 %v6392_v22  ;;  %v380_v45 = vld [vmem:[%s7071_s28 + $0x5c8] sm:$0xff]  ;;  %v262_v53 = vld [vmem:[%s7071_s28 + $0x218] sm:$0xff]  ;;  %v6283_v56 = vcombine.high %v201_v50, %v261_v51  ;;  %v381_v59 = vld [vmem:[%s7071_s28 + $0x5d0] sm:$0xff]  ;;  %v6282_v62 = vcombine.low %v201_v50, %v261_v51 }
  0x24   : > { %1725 = vmatprep.subr.bf16.mxu0 %v6275_v23  ;;  %1768 = vmatprep.subr.bf16.mxu1 %v6277_v24  ;;  %v6401_v49 = vcombine.high %v320_v44, %v380_v45  ;;  %v6400_v55 = vcombine.low %v320_v44, %v380_v45  ;;  %v6285_v57 = vcombine.high %v202_v52, %v262_v53  ;;  %v322_v60 = vld [vmem:[%s7071_s28 + $0x3f8] sm:$0xff]  ;;  %v203_v3 = vld [vmem:[%s7071_s28 + $0x40] sm:$0xff]  ;;  %v204_v5 = vld [vmem:[%s7071_s28 + $0x48] sm:$0xff] }
  0x25   : > { %v382_v61 = vld [vmem:[%s7071_s28 + $0x5d8] sm:$0xff]  ;;  %v6284_v63 = vcombine.low %v202_v52, %v262_v53  ;;  %v6403_v1 = vcombine.high %v321_v58, %v381_v59  ;;  %v263_v4 = vld [vmem:[%s7071_s28 + $0x220] sm:$0xff]  ;;  %v264_v6 = vld [vmem:[%s7071_s28 + $0x228] sm:$0xff]  ;;  %v6402_v7 = vcombine.low %v321_v58, %v381_v59 }
  0x26   : > { %6510 = vmatmul.mubr.msk.bf16.vlgmr.msra.gmra.mrb[0].mxu0 %vm1635_vm0, %v7093_v27  ;;  %6511 = vmatmul.mubr.msk.bf16.vlgmr.msra.gmra.mrb[0].mxu1 %vm1635_vm0, %v7093_v27  ;;  %v6405_v2 = vcombine.high %v322_v60, %v382_v61  ;;  %v6404_v8 = vcombine.low %v322_v60, %v382_v61  ;;  %v6287_v9 = vcombine.high %v203_v3, %v263_v4  ;;  %v323_v11 = vld [vmem:[%s7071_s28 + $0x400] sm:$0xff]  ;;  %v324_v13 = vld [vmem:[%s7071_s28 + $0x408] sm:$0xff]  ;;  %v205_v19 = vld [vmem:[%s7071_s28 + $0x50] sm:$0xff] }
  0x27   : > { %1726 = vmatpush1.bf16.msra.mxu0 %v6274_v30  ;;  %1769 = vmatpush1.bf16.msra.mxu1 %v6276_v31  ;;  %v6289_v10 = vcombine.high %v204_v5, %v264_v6  ;;  %v383_v12 = vld [vmem:[%s7071_s28 + $0x5e0] sm:$0xff]  ;;  %v384_v14 = vld [vmem:[%s7071_s28 + $0x5e8] sm:$0xff]  ;;  %v6286_v15 = vcombine.low %v203_v3, %v263_v4  ;;  %v6288_v16 = vcombine.low %v204_v5, %v264_v6  ;;  %v265_v20 = vld [vmem:[%s7071_s28 + $0x230] sm:$0xff] }
  0x28   : > { %1727 = vmatprep.subr.bf16.mxu0 %v6395_v32  ;;  %1770 = vmatprep.subr.bf16.mxu1 %v6397_v33  ;;  %v6407_v17 = vcombine.high %v323_v11, %v383_v12  ;;  %v6409_v18 = vcombine.high %v324_v13, %v384_v14  ;;  %v206_v21 = vld [vmem:[%s7071_s28 + $0x58] sm:$0xff]  ;;  %v6406_v23 = vcombine.low %v323_v11, %v383_v12  ;;  %v325_v28 = vld [vmem:[%s7071_s28 + $0x410] sm:$0xff]  ;;  %v207_v36 = vld [vmem:[%s7071_s28 + $0x60] sm:$0xff] }
  0x29   : > { %1757 = vmatprep.mubr.bf16.mxu0 %v6989_v0  ;;  %1800 = vmatprep.mubr.bf16.mxu1 %v6989_v0  ;;  %v266_v22 = vld [vmem:[%s7071_s28 + $0x238] sm:$0xff]  ;;  %v6408_v24 = vcombine.low %v324_v13, %v384_v14  ;;  %v6291_v25 = vcombine.high %v205_v19, %v265_v20  ;;  %v385_v29 = vld [vmem:[%s7071_s28 + $0x5f0] sm:$0xff]  ;;  %v6290_v32 = vcombine.low %v205_v19, %v265_v20  ;;  %v267_v37 = vld [vmem:[%s7071_s28 + $0x240] sm:$0xff] }
  0x2a   : > { %v6293_v26 = vcombine.high %v206_v21, %v266_v22  ;;  %v326_v30 = vld [vmem:[%s7071_s28 + $0x418] sm:$0xff]  ;;  %v6292_v33 = vcombine.low %v206_v21, %v266_v22  ;;  %v6411_v34 = vcombine.high %v325_v28, %v385_v29  ;;  %v6295_v42 = vcombine.high %v207_v36, %v267_v37  ;;  %v327_v44 = vld [vmem:[%s7071_s28 + $0x420] sm:$0xff]  ;;  %v209_v52 = vld [vmem:[%s7071_s28 + $0x70] sm:$0xff] }
  0x2b   : > { %1728 = vmatpush1.bf16.msra.mxu0 %v6394_v38  ;;  %1771 = vmatpush1.bf16.msra.mxu1 %v6396_v39  ;;  %v386_v31 = vld [vmem:[%s7071_s28 + $0x5f8] sm:$0xff]  ;;  %v208_v38 = vld [vmem:[%s7071_s28 + $0x68] sm:$0xff]  ;;  %v387_v45 = vld [vmem:[%s7071_s28 + $0x600] sm:$0xff] }
  0x2c   : > { %1811 = vmatprep.subr.bf16.mxu0 %v6279_v40  ;;  %1854 = vmatprep.subr.bf16.mxu1 %v6281_v41  ;;  %v6413_v35 = vcombine.high %v326_v30, %v386_v31  ;;  %v268_v39 = vld [vmem:[%s7071_s28 + $0x248] sm:$0xff]  ;;  %v6410_v40 = vcombine.low %v325_v28, %v385_v29  ;;  %v6412_v41 = vcombine.low %v326_v30, %v386_v31  ;;  %v269_v53 = vld [vmem:[%s7071_s28 + $0x250] sm:$0xff]  ;;  %v211_v5 = vld [vmem:[%s7071_s28 + $0x80] sm:$0xff] }
  0x2d   : > { %v6297_v43 = vcombine.high %v208_v38, %v268_v39  ;;  %v6415_v50 = vcombine.high %v327_v44, %v387_v45  ;;  %v6299_v58 = vcombine.high %v209_v52, %v269_v53  ;;  %v329_v60 = vld [vmem:[%s7071_s28 + $0x430] sm:$0xff]  ;;  %v271_v6 = vld [vmem:[%s7071_s28 + $0x260] sm:$0xff] }
  0x2e   : > { %6512 = vmatmul.mubr.msk.bf16.vlgmr.msra.gmra.mrb[4].mxu0 %vm1635_vm0, %v7093_v27  ;;  %6513 = vmatmul.mubr.msk.bf16.vlgmr.msra.gmra.mrb[4].mxu1 %vm1635_vm0, %v7093_v27  ;;  %v389_v61 = vld [vmem:[%s7071_s28 + $0x610] sm:$0xff]  ;;  %v6303_v11 = vcombine.high %v211_v5, %v271_v6  ;;  %v331_v13 = vld [vmem:[%s7071_s28 + $0x440] sm:$0xff] }
  0x2f   : > { %1812 = vmatpush1.bf16.msra.mxu0 %v6278_v46  ;;  %1855 = vmatpush1.bf16.msra.mxu1 %v6280_v47  ;;  %v328_v46 = vld [vmem:[%s7071_s28 + $0x428] sm:$0xff]  ;;  %v6419_v3 = vcombine.high %v329_v60, %v389_v61  ;;  %v391_v14 = vld [vmem:[%s7071_s28 + $0x620] sm:$0xff]  ;;  %v213_v21 = vld [vmem:[%s7071_s28 + $0x90] sm:$0xff] }
  0x30   : > { %1813 = vmatprep.subr.bf16.mxu0 %v6399_v48  ;;  %1856 = vmatprep.subr.bf16.mxu1 %v6401_v49  ;;  %v388_v47 = vld [vmem:[%s7071_s28 + $0x608] sm:$0xff]  ;;  %v6294_v48 = vcombine.low %v207_v36, %v267_v37  ;;  %v6296_v49 = vcombine.low %v208_v38, %v268_v39  ;;  %v6423_v19 = vcombine.high %v331_v13, %v391_v14  ;;  %v273_v22 = vld [vmem:[%s7071_s28 + $0x270] sm:$0xff]  ;;  %v215_v38 = vld [vmem:[%s7071_s28 + $0xa0] sm:$0xff] }
  0x31   : > { %1843 = vmatprep.mubr.bf16.mxu0 %v6989_v0  ;;  %1886 = vmatprep.mubr.bf16.mxu1 %v6989_v0  ;;  %v6417_v51 = vcombine.high %v328_v46, %v388_v47  ;;  %v6307_v28 = vcombine.high %v213_v21, %v273_v22  ;;  %v333_v30 = vld [vmem:[%s7071_s28 + $0x450] sm:$0xff]  ;;  %v275_v39 = vld [vmem:[%s7071_s28 + $0x280] sm:$0xff] }
  0x32   : > { %v393_v31 = vld [vmem:[%s7071_s28 + $0x630] sm:$0xff] }
  0x33   : > { %1814 = vmatpush1.bf16.msra.mxu0 %v6398_v54  ;;  %1857 = vmatpush1.bf16.msra.mxu1 %v6400_v55  ;;  %v210_v54 = vld [vmem:[%s7071_s28 + $0x78] sm:$0xff]  ;;  %v6427_v36 = vcombine.high %v333_v30, %v393_v31 }
  0x34   : > { %1897 = vmatprep.subr.bf16.mxu0 %v6283_v56  ;;  %1940 = vmatprep.subr.bf16.mxu1 %v6285_v57  ;;  %v270_v55 = vld [vmem:[%s7071_s28 + $0x258] sm:$0xff]  ;;  %v6414_v56 = vcombine.low %v327_v44, %v387_v45  ;;  %v6416_v57 = vcombine.low %v328_v46, %v388_v47  ;;  %v6311_v44 = vcombine.high %v215_v38, %v275_v39  ;;  %v335_v46 = vld [vmem:[%s7071_s28 + $0x460] sm:$0xff] }
  0x35   : > { %v6301_v59 = vcombine.high %v210_v54, %v270_v55  ;;  %v395_v47 = vld [vmem:[%s7071_s28 + $0x640] sm:$0xff] }
  0x36   : > { %6514 = vmatmul.mubr.msk.bf16.vlgmr.msra.gmra.mrb[8].mxu0 %vm1635_vm0, %v7093_v27  ;;  %6515 = vmatmul.mubr.msk.bf16.vlgmr.msra.gmra.mrb[8].mxu1 %vm1635_vm0, %v7093_v27 }
  0x37   : > { %1898 = vmatpush1.bf16.msra.mxu0 %v6282_v62  ;;  %1941 = vmatpush1.bf16.msra.mxu1 %v6284_v63  ;;  %v330_v62 = vld [vmem:[%s7071_s28 + $0x438] sm:$0xff] }
  0x38   : > { %1899 = vmatprep.subr.bf16.mxu0 %v6403_v1  ;;  %1942 = vmatprep.subr.bf16.mxu1 %v6405_v2  ;;  %v390_v63 = vld [vmem:[%s7071_s28 + $0x618] sm:$0xff]  ;;  %v6298_v1 = vcombine.low %v209_v52, %v269_v53  ;;  %v6300_v2 = vcombine.low %v210_v54, %v270_v55  ;;  %v6431_v52 = vcombine.high %v335_v46, %v395_v47  ;;  %v217_v54 = vld [vmem:[%s7071_s28 + $0xb0] sm:$0xff] }
  0x39   : > { %1929 = vmatprep.mubr.bf16.mxu0 %v6989_v0  ;;  %1972 = vmatprep.mubr.bf16.mxu1 %v6989_v0  ;;  %v6421_v4 = vcombine.high %v330_v62, %v390_v63  ;;  %v277_v55 = vld [vmem:[%s7071_s28 + $0x290] sm:$0xff] }
  0x3b   : > { %1900 = vmatpush1.bf16.msra.mxu0 %v6402_v7  ;;  %1943 = vmatpush1.bf16.msra.mxu1 %v6404_v8  ;;  %v212_v7 = vld [vmem:[%s7071_s28 + $0x88] sm:$0xff] }
  0x3c   : > { %1983 = vmatprep.subr.bf16.mxu0 %v6287_v9  ;;  %2026 = vmatprep.subr.bf16.mxu1 %v6289_v10  ;;  %v272_v8 = vld [vmem:[%s7071_s28 + $0x268] sm:$0xff]  ;;  %v6418_v9 = vcombine.low %v329_v60, %v389_v61  ;;  %v6420_v10 = vcombine.low %v330_v62, %v390_v63  ;;  %v6315_v60 = vcombine.high %v217_v54, %v277_v55  ;;  %v337_v62 = vld [vmem:[%s7071_s28 + $0x470] sm:$0xff] }
  0x3d   : > { %v6305_v12 = vcombine.high %v212_v7, %v272_v8  ;;  %v397_v63 = vld [vmem:[%s7071_s28 + $0x650] sm:$0xff] }
  0x3e   : > { %6516 = vmatmul.mubr.msk.bf16.vlgmr.msra.gmra.mrb[12].mxu0 %vm1635_vm0, %v7093_v27  ;;  %6517 = vmatmul.mubr.msk.bf16.vlgmr.msra.gmra.mrb[12].mxu1 %vm1635_vm0, %v7093_v27 }
  0x3f   : > { %1984 = vmatpush1.bf16.msra.mxu0 %v6286_v15  ;;  %2027 = vmatpush1.bf16.msra.mxu1 %v6288_v16  ;;  %v332_v15 = vld [vmem:[%s7071_s28 + $0x448] sm:$0xff] }
  0x40   : > { %1985 = vmatprep.subr.bf16.mxu0 %v6407_v17  ;;  %2028 = vmatprep.subr.bf16.mxu1 %v6409_v18  ;;  %v392_v16 = vld [vmem:[%s7071_s28 + $0x628] sm:$0xff]  ;;  %v6302_v17 = vcombine.low %v211_v5, %v271_v6  ;;  %v6304_v18 = vcombine.low %v212_v7, %v272_v8  ;;  %v6435_v5 = vcombine.high %v337_v62, %v397_v63  ;;  %v219_v7 = vld [vmem:[%s7071_s28 + $0xc0] sm:$0xff] }
  0x41   : > { %2015 = vmatprep.mubr.bf16.mxu0 %v6989_v0  ;;  %2058 = vmatprep.mubr.bf16.mxu1 %v6989_v0  ;;  %v6425_v20 = vcombine.high %v332_v15, %v392_v16  ;;  %v279_v8 = vld [vmem:[%s7071_s28 + $0x2a0] sm:$0xff] }
  0x43   : > { %1986 = vmatpush1.bf16.msra.mxu0 %v6406_v23  ;;  %2029 = vmatpush1.bf16.msra.mxu1 %v6408_v24  ;;  %v214_v23 = vld [vmem:[%s7071_s28 + $0x98] sm:$0xff] }
  0x44   : > { %2069 = vmatprep.subr.bf16.mxu0 %v6291_v25  ;;  %2112 = vmatprep.subr.bf16.mxu1 %v6293_v26  ;;  %v274_v24 = vld [vmem:[%s7071_s28 + $0x278] sm:$0xff]  ;;  %v6422_v25 = vcombine.low %v331_v13, %v391_v14  ;;  %v6424_v26 = vcombine.low %v332_v15, %v392_v16  ;;  %v6319_v13 = vcombine.high %v219_v7, %v279_v8  ;;  %v339_v15 = vld [vmem:[%s7071_s28 + $0x480] sm:$0xff] }
  0x45   : > { %v6309_v29 = vcombine.high %v214_v23, %v274_v24  ;;  %v399_v16 = vld [vmem:[%s7071_s28 + $0x660] sm:$0xff] }
  0x46   : > { %6518 = vmatmul.mubr.msk.bf16.vlgmr.msra.gmra.mrb[16].mxu0 %vm1635_vm0, %v7093_v27  ;;  %6519 = vmatmul.mubr.msk.bf16.vlgmr.msra.gmra.mrb[16].mxu1 %vm1635_vm0, %v7093_v27 }
  0x47   : > { %2070 = vmatpush1.bf16.msra.mxu0 %v6290_v32  ;;  %2113 = vmatpush1.bf16.msra.mxu1 %v6292_v33  ;;  %v334_v32 = vld [vmem:[%s7071_s28 + $0x458] sm:$0xff] }
  0x48   : > { %2071 = vmatprep.subr.bf16.mxu0 %v6411_v34  ;;  %2114 = vmatprep.subr.bf16.mxu1 %v6413_v35  ;;  %v394_v33 = vld [vmem:[%s7071_s28 + $0x638] sm:$0xff]  ;;  %v6306_v34 = vcombine.low %v213_v21, %v273_v22  ;;  %v6308_v35 = vcombine.low %v214_v23, %v274_v24  ;;  %v6439_v21 = vcombine.high %v339_v15, %v399_v16  ;;  %v221_v23 = vld [vmem:[%s7071_s28 + $0xd0] sm:$0xff] }
  0x49   : > { %2101 = vmatprep.mubr.bf16.mxu0 %v6989_v0  ;;  %2144 = vmatprep.mubr.bf16.mxu1 %v6989_v0  ;;  %v6429_v37 = vcombine.high %v334_v32, %v394_v33  ;;  %v281_v24 = vld [vmem:[%s7071_s28 + $0x2b0] sm:$0xff] }
  0x4b   : > { %2072 = vmatpush1.bf16.msra.mxu0 %v6410_v40  ;;  %2115 = vmatpush1.bf16.msra.mxu1 %v6412_v41  ;;  %v216_v40 = vld [vmem:[%s7071_s28 + $0xa8] sm:$0xff] }
  0x4c   : > { %2155 = vmatprep.subr.bf16.mxu0 %v6295_v42  ;;  %2198 = vmatprep.subr.bf16.mxu1 %v6297_v43  ;;  %v276_v41 = vld [vmem:[%s7071_s28 + $0x288] sm:$0xff]  ;;  %v6426_v42 = vcombine.low %v333_v30, %v393_v31  ;;  %v6428_v43 = vcombine.low %v334_v32, %v394_v33  ;;  %v6323_v30 = vcombine.high %v221_v23, %v281_v24  ;;  %v341_v32 = vld [vmem:[%s7071_s28 + $0x490] sm:$0xff] }
  0x4d   : > { %v6313_v45 = vcombine.high %v216_v40, %v276_v41  ;;  %v401_v33 = vld [vmem:[%s7071_s28 + $0x670] sm:$0xff] }
  0x4e   : > { %6520 = vmatmul.mubr.msk.bf16.vlgmr.msra.gmra.mrb[20].mxu0 %vm1635_vm0, %v7093_v27  ;;  %6521 = vmatmul.mubr.msk.bf16.vlgmr.msra.gmra.mrb[20].mxu1 %vm1635_vm0, %v7093_v27 }
  0x4f   : > { %2156 = vmatpush1.bf16.msra.mxu0 %v6294_v48  ;;  %2199 = vmatpush1.bf16.msra.mxu1 %v6296_v49  ;;  %v336_v48 = vld [vmem:[%s7071_s28 + $0x468] sm:$0xff] }
  0x50   : > { %2157 = vmatprep.subr.bf16.mxu0 %v6415_v50  ;;  %2200 = vmatprep.subr.bf16.mxu1 %v6417_v51  ;;  %v396_v49 = vld [vmem:[%s7071_s28 + $0x648] sm:$0xff]  ;;  %v6310_v50 = vcombine.low %v215_v38, %v275_v39  ;;  %v6312_v51 = vcombine.low %v216_v40, %v276_v41  ;;  %v6443_v38 = vcombine.high %v341_v32, %v401_v33  ;;  %v223_v40 = vld [vmem:[%s7071_s28 + $0xe0] sm:$0xff] }
  0x51   : > { %2187 = vmatprep.mubr.bf16.mxu0 %v6989_v0  ;;  %2230 = vmatprep.mubr.bf16.mxu1 %v6989_v0  ;;  %v6433_v53 = vcombine.high %v336_v48, %v396_v49  ;;  %v283_v41 = vld [vmem:[%s7071_s28 + $0x2c0] sm:$0xff] }
  0x53   : > { %2158 = vmatpush1.bf16.msra.mxu0 %v6414_v56  ;;  %2201 = vmatpush1.bf16.msra.mxu1 %v6416_v57  ;;  %v218_v56 = vld [vmem:[%s7071_s28 + $0xb8] sm:$0xff] }
  0x54   : > { %2241 = vmatprep.subr.bf16.mxu0 %v6299_v58  ;;  %2284 = vmatprep.subr.bf16.mxu1 %v6301_v59  ;;  %v278_v57 = vld [vmem:[%s7071_s28 + $0x298] sm:$0xff]  ;;  %v6430_v58 = vcombine.low %v335_v46, %v395_v47  ;;  %v6432_v59 = vcombine.low %v336_v48, %v396_v49  ;;  %v6327_v46 = vcombine.high %v223_v40, %v283_v41  ;;  %v343_v48 = vld [vmem:[%s7071_s28 + $0x4a0] sm:$0xff] }
  0x55   : > { %v6317_v61 = vcombine.high %v218_v56, %v278_v57  ;;  %v403_v49 = vld [vmem:[%s7071_s28 + $0x680] sm:$0xff] }
  0x56   : > { %6522 = vmatmul.mubr.msk.bf16.vlgmr.msra.gmra.mrb[24].mxu0 %vm1635_vm0, %v7093_v27  ;;  %6523 = vmatmul.mubr.msk.bf16.vlgmr.msra.gmra.mrb[24].mxu1 %vm1635_vm0, %v7093_v27 }
  0x57   : > { %2242 = vmatpush1.bf16.msra.mxu0 %v6298_v1  ;;  %2285 = vmatpush1.bf16.msra.mxu1 %v6300_v2  ;;  %v338_v1 = vld [vmem:[%s7071_s28 + $0x478] sm:$0xff] }
  0x58   : > { %2243 = vmatprep.subr.bf16.mxu0 %v6419_v3  ;;  %2286 = vmatprep.subr.bf16.mxu1 %v6421_v4  ;;  %v398_v2 = vld [vmem:[%s7071_s28 + $0x658] sm:$0xff]  ;;  %v6314_v3 = vcombine.low %v217_v54, %v277_v55  ;;  %v6316_v4 = vcombine.low %v218_v56, %v278_v57  ;;  %v6447_v54 = vcombine.high %v343_v48, %v403_v49  ;;  %v225_v56 = vld [vmem:[%s7071_s28 + $0xf0] sm:$0xff] }
  0x59   : > { %2273 = vmatprep.mubr.bf16.mxu0 %v6989_v0  ;;  %2316 = vmatprep.mubr.bf16.mxu1 %v6989_v0  ;;  %v6437_v6 = vcombine.high %v338_v1, %v398_v2  ;;  %v285_v57 = vld [vmem:[%s7071_s28 + $0x2d0] sm:$0xff] }
  0x5b   : > { %2244 = vmatpush1.bf16.msra.mxu0 %v6418_v9  ;;  %2287 = vmatpush1.bf16.msra.mxu1 %v6420_v10  ;;  %v220_v9 = vld [vmem:[%s7071_s28 + $0xc8] sm:$0xff] }
  0x5c   : > { %2327 = vmatprep.subr.bf16.mxu0 %v6303_v11  ;;  %2370 = vmatprep.subr.bf16.mxu1 %v6305_v12  ;;  %v280_v10 = vld [vmem:[%s7071_s28 + $0x2a8] sm:$0xff]  ;;  %v6434_v11 = vcombine.low %v337_v62, %v397_v63  ;;  %v6436_v12 = vcombine.low %v338_v1, %v398_v2  ;;  %v6331_v62 = vcombine.high %v225_v56, %v285_v57  ;;  %v345_v1 = vld [vmem:[%s7071_s28 + $0x4b0] sm:$0xff] }
  0x5d   : > { %v6321_v14 = vcombine.high %v220_v9, %v280_v10  ;;  %v405_v2 = vld [vmem:[%s7071_s28 + $0x690] sm:$0xff] }
  0x5e   : > { %6524 = vmatmul.mubr.msk.bf16.vlgmr.msra.gmra.mrb[28].mxu0 %vm1635_vm0, %v7093_v27  ;;  %6525 = vmatmul.mubr.msk.bf16.vlgmr.msra.gmra.mrb[28].mxu1 %vm1635_vm0, %v7093_v27 }
  0x5f   : > { %2328 = vmatpush1.bf16.msra.mxu0 %v6302_v17  ;;  %2371 = vmatpush1.bf16.msra.mxu1 %v6304_v18  ;;  %v340_v17 = vld [vmem:[%s7071_s28 + $0x488] sm:$0xff] }
  0x60   : > { %2329 = vmatprep.subr.bf16.mxu0 %v6423_v19  ;;  %2372 = vmatprep.subr.bf16.mxu1 %v6425_v20  ;;  %v400_v18 = vld [vmem:[%s7071_s28 + $0x668] sm:$0xff]  ;;  %v6318_v19 = vcombine.low %v219_v7, %v279_v8  ;;  %v6320_v20 = vcombine.low %v220_v9, %v280_v10  ;;  %v6451_v7 = vcombine.high %v345_v1, %v405_v2  ;;  %v227_v9 = vld [vmem:[%s7071_s28 + $0x100] sm:$0xff] }
  0x61   : > { %2359 = vmatprep.mubr.bf16.mxu0 %v6989_v0  ;;  %2402 = vmatprep.mubr.bf16.mxu1 %v6989_v0  ;;  %v6441_v22 = vcombine.high %v340_v17, %v400_v18  ;;  %v287_v10 = vld [vmem:[%s7071_s28 + $0x2e0] sm:$0xff] }
  0x63   : > { %2330 = vmatpush1.bf16.msra.mxu0 %v6422_v25  ;;  %2373 = vmatpush1.bf16.msra.mxu1 %v6424_v26  ;;  %v222_v25 = vld [vmem:[%s7071_s28 + $0xd8] sm:$0xff] }
  0x64   : > { %2413 = vmatprep.subr.bf16.mxu0 %v6307_v28  ;;  %2456 = vmatprep.subr.bf16.mxu1 %v6309_v29  ;;  %v282_v26 = vld [vmem:[%s7071_s28 + $0x2b8] sm:$0xff]  ;;  %v6438_v28 = vcombine.low %v339_v15, %v399_v16  ;;  %v6440_v29 = vcombine.low %v340_v17, %v400_v18  ;;  %v6335_v15 = vcombine.high %v227_v9, %v287_v10  ;;  %v347_v17 = vld [vmem:[%s7071_s28 + $0x4c0] sm:$0xff] }
  0x65   : > { %v6325_v31 = vcombine.high %v222_v25, %v282_v26  ;;  %v407_v18 = vld [vmem:[%s7071_s28 + $0x6a0] sm:$0xff] }
  0x66   : > { %6526 = vmatmul.mubr.msk.bf16.vlgmr.msra.gmra.mrb[32].mxu0 %vm1635_vm0, %v7093_v27  ;;  %6527 = vmatmul.mubr.msk.bf16.vlgmr.msra.gmra.mrb[32].mxu1 %vm1635_vm0, %v7093_v27 }
  0x67   : > { %2414 = vmatpush1.bf16.msra.mxu0 %v6306_v34  ;;  %2457 = vmatpush1.bf16.msra.mxu1 %v6308_v35  ;;  %v342_v34 = vld [vmem:[%s7071_s28 + $0x498] sm:$0xff] }
  0x68   : > { %2415 = vmatprep.subr.bf16.mxu0 %v6427_v36  ;;  %2458 = vmatprep.subr.bf16.mxu1 %v6429_v37  ;;  %v402_v35 = vld [vmem:[%s7071_s28 + $0x678] sm:$0xff]  ;;  %v6322_v36 = vcombine.low %v221_v23, %v281_v24  ;;  %v6324_v37 = vcombine.low %v222_v25, %v282_v26  ;;  %v6455_v23 = vcombine.high %v347_v17, %v407_v18  ;;  %v229_v25 = vld [vmem:[%s7071_s28 + $0x110] sm:$0xff] }
  0x69   : > { %2445 = vmatprep.mubr.bf16.mxu0 %v6989_v0  ;;  %2488 = vmatprep.mubr.bf16.mxu1 %v6989_v0  ;;  %v6445_v39 = vcombine.high %v342_v34, %v402_v35  ;;  %v289_v26 = vld [vmem:[%s7071_s28 + $0x2f0] sm:$0xff] }
  0x6b   : > { %2416 = vmatpush1.bf16.msra.mxu0 %v6426_v42  ;;  %2459 = vmatpush1.bf16.msra.mxu1 %v6428_v43  ;;  %v224_v42 = vld [vmem:[%s7071_s28 + $0xe8] sm:$0xff] }
  0x6c   : > { %2499 = vmatprep.subr.bf16.mxu0 %v6311_v44  ;;  %2542 = vmatprep.subr.bf16.mxu1 %v6313_v45  ;;  %v284_v43 = vld [vmem:[%s7071_s28 + $0x2c8] sm:$0xff]  ;;  %v6442_v44 = vcombine.low %v341_v32, %v401_v33  ;;  %v6444_v45 = vcombine.low %v342_v34, %v402_v35  ;;  %v6339_v32 = vcombine.high %v229_v25, %v289_v26  ;;  %v349_v34 = vld [vmem:[%s7071_s28 + $0x4d0] sm:$0xff] }
  0x6d   : > { %v6329_v47 = vcombine.high %v224_v42, %v284_v43  ;;  %v409_v35 = vld [vmem:[%s7071_s28 + $0x6b0] sm:$0xff] }
  0x6e   : > { %6528 = vmatmul.mubr.msk.bf16.vlgmr.msra.gmra.mrb[36].mxu0 %vm1635_vm0, %v7093_v27  ;;  %6529 = vmatmul.mubr.msk.bf16.vlgmr.msra.gmra.mrb[36].mxu1 %vm1635_vm0, %v7093_v27 }
  0x6f   : > { %2500 = vmatpush1.bf16.msra.mxu0 %v6310_v50  ;;  %2543 = vmatpush1.bf16.msra.mxu1 %v6312_v51  ;;  %v344_v50 = vld [vmem:[%s7071_s28 + $0x4a8] sm:$0xff] }
  0x70   : > { %2501 = vmatprep.subr.bf16.mxu0 %v6431_v52  ;;  %2544 = vmatprep.subr.bf16.mxu1 %v6433_v53  ;;  %v404_v51 = vld [vmem:[%s7071_s28 + $0x688] sm:$0xff]  ;;  %v6326_v52 = vcombine.low %v223_v40, %v283_v41  ;;  %v6328_v53 = vcombine.low %v224_v42, %v284_v43  ;;  %v6459_v40 = vcombine.high %v349_v34, %v409_v35  ;;  %v231_v42 = vld [vmem:[%s7071_s28 + $0x120] sm:$0xff] }
  0x71   : > { %2531 = vmatprep.mubr.bf16.mxu0 %v6989_v0  ;;  %2574 = vmatprep.mubr.bf16.mxu1 %v6989_v0  ;;  %v6449_v55 = vcombine.high %v344_v50, %v404_v51  ;;  %v291_v43 = vld [vmem:[%s7071_s28 + $0x300] sm:$0xff] }
  0x73   : > { %2502 = vmatpush1.bf16.msra.mxu0 %v6430_v58  ;;  %2545 = vmatpush1.bf16.msra.mxu1 %v6432_v59  ;;  %v226_v58 = vld [vmem:[%s7071_s28 + $0xf8] sm:$0xff] }
  0x74   : > { %2585 = vmatprep.subr.bf16.mxu0 %v6315_v60  ;;  %2628 = vmatprep.subr.bf16.mxu1 %v6317_v61  ;;  %v286_v59 = vld [vmem:[%s7071_s28 + $0x2d8] sm:$0xff]  ;;  %v6446_v60 = vcombine.low %v343_v48, %v403_v49  ;;  %v6448_v61 = vcombine.low %v344_v50, %v404_v51  ;;  %v6343_v48 = vcombine.high %v231_v42, %v291_v43  ;;  %v351_v50 = vld [vmem:[%s7071_s28 + $0x4e0] sm:$0xff] }
  0x75   : > { %v6333_v63 = vcombine.high %v226_v58, %v286_v59  ;;  %v411_v51 = vld [vmem:[%s7071_s28 + $0x6c0] sm:$0xff] }
  0x76   : > { %6530 = vmatmul.mubr.msk.bf16.vlgmr.msra.gmra.mrb[40].mxu0 %vm1635_vm0, %v7093_v27  ;;  %6531 = vmatmul.mubr.msk.bf16.vlgmr.msra.gmra.mrb[40].mxu1 %vm1635_vm0, %v7093_v27 }
  0x77   : > { %2586 = vmatpush1.bf16.msra.mxu0 %v6314_v3  ;;  %2629 = vmatpush1.bf16.msra.mxu1 %v6316_v4  ;;  %v346_v3 = vld [vmem:[%s7071_s28 + $0x4b8] sm:$0xff] }
  0x78   : > { %2587 = vmatprep.subr.bf16.mxu0 %v6435_v5  ;;  %2630 = vmatprep.subr.bf16.mxu1 %v6437_v6  ;;  %v406_v4 = vld [vmem:[%s7071_s28 + $0x698] sm:$0xff]  ;;  %v6330_v5 = vcombine.low %v225_v56, %v285_v57  ;;  %v6332_v6 = vcombine.low %v226_v58, %v286_v59  ;;  %v6463_v56 = vcombine.high %v351_v50, %v411_v51  ;;  %v233_v58 = vld [vmem:[%s7071_s28 + $0x130] sm:$0xff] }
  0x79   : > { %2617 = vmatprep.mubr.bf16.mxu0 %v6989_v0  ;;  %2660 = vmatprep.mubr.bf16.mxu1 %v6989_v0  ;;  %v6453_v8 = vcombine.high %v346_v3, %v406_v4  ;;  %v293_v59 = vld [vmem:[%s7071_s28 + $0x310] sm:$0xff] }
  0x7b   : > { %2588 = vmatpush1.bf16.msra.mxu0 %v6434_v11  ;;  %2631 = vmatpush1.bf16.msra.mxu1 %v6436_v12  ;;  %v228_v11 = vld [vmem:[%s7071_s28 + $0x108] sm:$0xff] }
  0x7c   : > { %2671 = vmatprep.subr.bf16.mxu0 %v6319_v13  ;;  %2714 = vmatprep.subr.bf16.mxu1 %v6321_v14  ;;  %v288_v12 = vld [vmem:[%s7071_s28 + $0x2e8] sm:$0xff]  ;;  %v6450_v13 = vcombine.low %v345_v1, %v405_v2  ;;  %v6452_v14 = vcombine.low %v346_v3, %v406_v4  ;;  %v6347_v1 = vcombine.high %v233_v58, %v293_v59  ;;  %v353_v3 = vld [vmem:[%s7071_s28 + $0x4f0] sm:$0xff] }
  0x7d   : > { %v6337_v16 = vcombine.high %v228_v11, %v288_v12  ;;  %v413_v4 = vld [vmem:[%s7071_s28 + $0x6d0] sm:$0xff] }
  0x7e   : > { %6532 = vmatmul.mubr.msk.bf16.vlgmr.msra.gmra.mrb[44].mxu0 %vm1635_vm0, %v7093_v27  ;;  %6533 = vmatmul.mubr.msk.bf16.vlgmr.msra.gmra.mrb[44].mxu1 %vm1635_vm0, %v7093_v27 }
  0x7f   : > { %2672 = vmatpush1.bf16.msra.mxu0 %v6318_v19  ;;  %2715 = vmatpush1.bf16.msra.mxu1 %v6320_v20  ;;  %v348_v19 = vld [vmem:[%s7071_s28 + $0x4c8] sm:$0xff] }
  0x80   : > { %2673 = vmatprep.subr.bf16.mxu0 %v6439_v21  ;;  %2716 = vmatprep.subr.bf16.mxu1 %v6441_v22  ;;  %v408_v20 = vld [vmem:[%s7071_s28 + $0x6a8] sm:$0xff]  ;;  %v6334_v21 = vcombine.low %v227_v9, %v287_v10  ;;  %v6336_v22 = vcombine.low %v228_v11, %v288_v12  ;;  %v6467_v9 = vcombine.high %v353_v3, %v413_v4  ;;  %v235_v11 = vld [vmem:[%s7071_s28 + $0x140] sm:$0xff] }
  0x81   : > { %2703 = vmatprep.mubr.bf16.mxu0 %v6989_v0  ;;  %2746 = vmatprep.mubr.bf16.mxu1 %v6989_v0  ;;  %v6457_v24 = vcombine.high %v348_v19, %v408_v20  ;;  %v295_v12 = vld [vmem:[%s7071_s28 + $0x320] sm:$0xff] }
  0x83   : > { %2674 = vmatpush1.bf16.msra.mxu0 %v6438_v28  ;;  %2717 = vmatpush1.bf16.msra.mxu1 %v6440_v29  ;;  %v230_v28 = vld [vmem:[%s7071_s28 + $0x118] sm:$0xff] }
  0x84   : > { %2757 = vmatprep.subr.bf16.mxu0 %v6323_v30  ;;  %2800 = vmatprep.subr.bf16.mxu1 %v6325_v31  ;;  %v290_v29 = vld [vmem:[%s7071_s28 + $0x2f8] sm:$0xff]  ;;  %v6454_v30 = vcombine.low %v347_v17, %v407_v18  ;;  %v6456_v31 = vcombine.low %v348_v19, %v408_v20  ;;  %v6351_v17 = vcombine.high %v235_v11, %v295_v12  ;;  %v355_v19 = vld [vmem:[%s7071_s28 + $0x500] sm:$0xff] }
  0x85   : > { %v6341_v33 = vcombine.high %v230_v28, %v290_v29  ;;  %v415_v20 = vld [vmem:[%s7071_s28 + $0x6e0] sm:$0xff] }
  0x86   : > { %6534 = vmatmul.mubr.msk.bf16.vlgmr.msra.gmra.mrb[48].mxu0 %vm1635_vm0, %v7093_v27  ;;  %6535 = vmatmul.mubr.msk.bf16.vlgmr.msra.gmra.mrb[48].mxu1 %vm1635_vm0, %v7093_v27 }
  0x87   : > { %2758 = vmatpush1.bf16.msra.mxu0 %v6322_v36  ;;  %2801 = vmatpush1.bf16.msra.mxu1 %v6324_v37  ;;  %v350_v36 = vld [vmem:[%s7071_s28 + $0x4d8] sm:$0xff] }
  0x88   : > { %2759 = vmatprep.subr.bf16.mxu0 %v6443_v38  ;;  %2802 = vmatprep.subr.bf16.mxu1 %v6445_v39  ;;  %v410_v37 = vld [vmem:[%s7071_s28 + $0x6b8] sm:$0xff]  ;;  %v6338_v38 = vcombine.low %v229_v25, %v289_v26  ;;  %v6340_v39 = vcombine.low %v230_v28, %v290_v29  ;;  %v6471_v25 = vcombine.high %v355_v19, %v415_v20  ;;  %v237_v28 = vld [vmem:[%s7071_s28 + $0x150] sm:$0xff] }
  0x89   : > { %2789 = vmatprep.mubr.bf16.mxu0 %v6989_v0  ;;  %2832 = vmatprep.mubr.bf16.mxu1 %v6989_v0  ;;  %v6461_v41 = vcombine.high %v350_v36, %v410_v37  ;;  %v297_v29 = vld [vmem:[%s7071_s28 + $0x330] sm:$0xff] }
  0x8b   : > { %2760 = vmatpush1.bf16.msra.mxu0 %v6442_v44  ;;  %2803 = vmatpush1.bf16.msra.mxu1 %v6444_v45  ;;  %v232_v44 = vld [vmem:[%s7071_s28 + $0x128] sm:$0xff] }
  0x8c   : > { %2843 = vmatprep.subr.bf16.mxu0 %v6327_v46  ;;  %2886 = vmatprep.subr.bf16.mxu1 %v6329_v47  ;;  %v292_v45 = vld [vmem:[%s7071_s28 + $0x308] sm:$0xff]  ;;  %v6458_v46 = vcombine.low %v349_v34, %v409_v35  ;;  %v6460_v47 = vcombine.low %v350_v36, %v410_v37  ;;  %v6355_v34 = vcombine.high %v237_v28, %v297_v29  ;;  %v357_v36 = vld [vmem:[%s7071_s28 + $0x510] sm:$0xff] }
  0x8d   : > { %v6345_v49 = vcombine.high %v232_v44, %v292_v45  ;;  %v417_v37 = vld [vmem:[%s7071_s28 + $0x6f0] sm:$0xff] }
  0x8e   : > { %6536 = vmatmul.mubr.msk.bf16.vlgmr.msra.gmra.mrb[52].mxu0 %vm1635_vm0, %v7093_v27  ;;  %6537 = vmatmul.mubr.msk.bf16.vlgmr.msra.gmra.mrb[52].mxu1 %vm1635_vm0, %v7093_v27 }
  0x8f   : > { %2844 = vmatpush1.bf16.msra.mxu0 %v6326_v52  ;;  %2887 = vmatpush1.bf16.msra.mxu1 %v6328_v53  ;;  %v352_v52 = vld [vmem:[%s7071_s28 + $0x4e8] sm:$0xff] }
  0x90   : > { %2845 = vmatprep.subr.bf16.mxu0 %v6447_v54  ;;  %2888 = vmatprep.subr.bf16.mxu1 %v6449_v55  ;;  %v412_v53 = vld [vmem:[%s7071_s28 + $0x6c8] sm:$0xff]  ;;  %v6342_v54 = vcombine.low %v231_v42, %v291_v43  ;;  %v6344_v55 = vcombine.low %v232_v44, %v292_v45  ;;  %v6475_v42 = vcombine.high %v357_v36, %v417_v37  ;;  %v239_v44 = vld [vmem:[%s7071_s28 + $0x160] sm:$0xff] }
  0x91   : > { %2875 = vmatprep.mubr.bf16.mxu0 %v6989_v0  ;;  %2918 = vmatprep.mubr.bf16.mxu1 %v6989_v0  ;;  %v6465_v57 = vcombine.high %v352_v52, %v412_v53  ;;  %v299_v45 = vld [vmem:[%s7071_s28 + $0x340] sm:$0xff] }
  0x93   : > { %2846 = vmatpush1.bf16.msra.mxu0 %v6446_v60  ;;  %2889 = vmatpush1.bf16.msra.mxu1 %v6448_v61  ;;  %v234_v60 = vld [vmem:[%s7071_s28 + $0x138] sm:$0xff] }
  0x94   : > { %2929 = vmatprep.subr.bf16.mxu0 %v6331_v62  ;;  %2972 = vmatprep.subr.bf16.mxu1 %v6333_v63  ;;  %v294_v61 = vld [vmem:[%s7071_s28 + $0x318] sm:$0xff]  ;;  %v6462_v62 = vcombine.low %v351_v50, %v411_v51  ;;  %v6464_v63 = vcombine.low %v352_v52, %v412_v53  ;;  %v6359_v50 = vcombine.high %v239_v44, %v299_v45  ;;  %v359_v52 = vld [vmem:[%s7071_s28 + $0x520] sm:$0xff] }
  0x95   : > { %v6349_v2 = vcombine.high %v234_v60, %v294_v61  ;;  %v419_v53 = vld [vmem:[%s7071_s28 + $0x700] sm:$0xff] }
  0x96   : > { %6538 = vmatmul.mubr.msk.bf16.vlgmr.msra.gmra.mrb[56].mxu0 %vm1635_vm0, %v7093_v27  ;;  %6539 = vmatmul.mubr.msk.bf16.vlgmr.msra.gmra.mrb[56].mxu1 %vm1635_vm0, %v7093_v27 }
  0x97   : > { %2930 = vmatpush1.bf16.msra.mxu0 %v6330_v5  ;;  %2973 = vmatpush1.bf16.msra.mxu1 %v6332_v6  ;;  %v354_v5 = vld [vmem:[%s7071_s28 + $0x4f8] sm:$0xff] }
  0x98   : > { %2931 = vmatprep.subr.bf16.mxu0 %v6451_v7  ;;  %2974 = vmatprep.subr.bf16.mxu1 %v6453_v8  ;;  %v414_v6 = vld [vmem:[%s7071_s28 + $0x6d8] sm:$0xff]  ;;  %v6346_v7 = vcombine.low %v233_v58, %v293_v59  ;;  %v6348_v8 = vcombine.low %v234_v60, %v294_v61  ;;  %v6479_v58 = vcombine.high %v359_v52, %v419_v53  ;;  %v241_v60 = vld [vmem:[%s7071_s28 + $0x170] sm:$0xff] }
  0x99   : > { %2961 = vmatprep.mubr.bf16.mxu0 %v6989_v0  ;;  %3004 = vmatprep.mubr.bf16.mxu1 %v6989_v0  ;;  %v6469_v10 = vcombine.high %v354_v5, %v414_v6  ;;  %v301_v61 = vld [vmem:[%s7071_s28 + $0x350] sm:$0xff] }
  0x9b   : > { %2932 = vmatpush1.bf16.msra.mxu0 %v6450_v13  ;;  %2975 = vmatpush1.bf16.msra.mxu1 %v6452_v14  ;;  %v236_v13 = vld [vmem:[%s7071_s28 + $0x148] sm:$0xff] }
  0x9c   : > { %3015 = vmatprep.subr.bf16.mxu0 %v6335_v15  ;;  %3058 = vmatprep.subr.bf16.mxu1 %v6337_v16  ;;  %v296_v14 = vld [vmem:[%s7071_s28 + $0x328] sm:$0xff]  ;;  %v6466_v15 = vcombine.low %v353_v3, %v413_v4  ;;  %v6468_v16 = vcombine.low %v354_v5, %v414_v6  ;;  %v6363_v3 = vcombine.high %v241_v60, %v301_v61  ;;  %v361_v5 = vld [vmem:[%s7071_s28 + $0x530] sm:$0xff] }
  0x9d   : > { %v6353_v18 = vcombine.high %v236_v13, %v296_v14  ;;  %v421_v6 = vld [vmem:[%s7071_s28 + $0x710] sm:$0xff] }
  0x9e   : > { %6540 = vmatmul.mubr.msk.bf16.vlgmr.msra.gmra.mrb[60].mxu0 %vm1635_vm0, %v7093_v27  ;;  %6541 = vmatmul.mubr.msk.bf16.vlgmr.msra.gmra.mrb[60].mxu1 %vm1635_vm0, %v7093_v27 }
  0x9f   : > { %3016 = vmatpush1.bf16.msra.mxu0 %v6334_v21  ;;  %3059 = vmatpush1.bf16.msra.mxu1 %v6336_v22  ;;  %v356_v21 = vld [vmem:[%s7071_s28 + $0x508] sm:$0xff] }
  0xa0   : > { %3017 = vmatprep.subr.bf16.mxu0 %v6455_v23  ;;  %3060 = vmatprep.subr.bf16.mxu1 %v6457_v24  ;;  %v416_v22 = vld [vmem:[%s7071_s28 + $0x6e8] sm:$0xff]  ;;  %v6350_v23 = vcombine.low %v235_v11, %v295_v12  ;;  %v6352_v24 = vcombine.low %v236_v13, %v296_v14  ;;  %v6483_v11 = vcombine.high %v361_v5, %v421_v6  ;;  %v243_v13 = vld [vmem:[%s7071_s28 + $0x180] sm:$0xff] }
  0xa1   : > { %3047 = vmatprep.mubr.bf16.mxu0 %v6989_v0  ;;  %3090 = vmatprep.mubr.bf16.mxu1 %v6989_v0  ;;  %v6473_v26 = vcombine.high %v356_v21, %v416_v22  ;;  %v303_v14 = vld [vmem:[%s7071_s28 + $0x360] sm:$0xff] }
  0xa3   : > { %3018 = vmatpush1.bf16.msra.mxu0 %v6454_v30  ;;  %3061 = vmatpush1.bf16.msra.mxu1 %v6456_v31  ;;  %v238_v30 = vld [vmem:[%s7071_s28 + $0x158] sm:$0xff] }
  0xa4   : > { %3101 = vmatprep.subr.bf16.mxu0 %v6339_v32  ;;  %3144 = vmatprep.subr.bf16.mxu1 %v6341_v33  ;;  %v298_v31 = vld [vmem:[%s7071_s28 + $0x338] sm:$0xff]  ;;  %v6470_v32 = vcombine.low %v355_v19, %v415_v20  ;;  %v6472_v33 = vcombine.low %v356_v21, %v416_v22  ;;  %v6367_v19 = vcombine.high %v243_v13, %v303_v14  ;;  %v363_v21 = vld [vmem:[%s7071_s28 + $0x540] sm:$0xff] }
  0xa5   : > { %v6357_v35 = vcombine.high %v238_v30, %v298_v31  ;;  %v423_v22 = vld [vmem:[%s7071_s28 + $0x720] sm:$0xff] }
  0xa6   : > { %6542 = vmatmul.mubr.msk.bf16.vlgmr.msra.gmra.mrb[64].mxu0 %vm1635_vm0, %v7093_v27  ;;  %6543 = vmatmul.mubr.msk.bf16.vlgmr.msra.gmra.mrb[64].mxu1 %vm1635_vm0, %v7093_v27 }
  0xa7   : > { %3102 = vmatpush1.bf16.msra.mxu0 %v6338_v38  ;;  %3145 = vmatpush1.bf16.msra.mxu1 %v6340_v39  ;;  %v358_v38 = vld [vmem:[%s7071_s28 + $0x518] sm:$0xff] }
  0xa8   : > { %3103 = vmatprep.subr.bf16.mxu0 %v6459_v40  ;;  %3146 = vmatprep.subr.bf16.mxu1 %v6461_v41  ;;  %v418_v39 = vld [vmem:[%s7071_s28 + $0x6f8] sm:$0xff]  ;;  %v6354_v40 = vcombine.low %v237_v28, %v297_v29  ;;  %v6356_v41 = vcombine.low %v238_v30, %v298_v31  ;;  %v6487_v28 = vcombine.high %v363_v21, %v423_v22  ;;  %v245_v30 = vld [vmem:[%s7071_s28 + $0x190] sm:$0xff] }
  0xa9   : > { %3133 = vmatprep.mubr.bf16.mxu0 %v6989_v0  ;;  %3176 = vmatprep.mubr.bf16.mxu1 %v6989_v0  ;;  %v6477_v43 = vcombine.high %v358_v38, %v418_v39  ;;  %v305_v31 = vld [vmem:[%s7071_s28 + $0x370] sm:$0xff] }
  0xab   : > { %3104 = vmatpush1.bf16.msra.mxu0 %v6458_v46  ;;  %3147 = vmatpush1.bf16.msra.mxu1 %v6460_v47  ;;  %v240_v46 = vld [vmem:[%s7071_s28 + $0x168] sm:$0xff] }
  0xac   : > { %3187 = vmatprep.subr.bf16.mxu0 %v6343_v48  ;;  %3230 = vmatprep.subr.bf16.mxu1 %v6345_v49  ;;  %v300_v47 = vld [vmem:[%s7071_s28 + $0x348] sm:$0xff]  ;;  %v6474_v48 = vcombine.low %v357_v36, %v417_v37  ;;  %v6476_v49 = vcombine.low %v358_v38, %v418_v39  ;;  %v6371_v36 = vcombine.high %v245_v30, %v305_v31  ;;  %v365_v38 = vld [vmem:[%s7071_s28 + $0x550] sm:$0xff] }
  0xad   : > { %v6361_v51 = vcombine.high %v240_v46, %v300_v47  ;;  %v425_v39 = vld [vmem:[%s7071_s28 + $0x730] sm:$0xff] }
  0xae   : > { %6544 = vmatmul.mubr.msk.bf16.vlgmr.msra.gmra.mrb[68].mxu0 %vm1635_vm0, %v7093_v27  ;;  %6545 = vmatmul.mubr.msk.bf16.vlgmr.msra.gmra.mrb[68].mxu1 %vm1635_vm0, %v7093_v27 }
  0xaf   : > { %3188 = vmatpush1.bf16.msra.mxu0 %v6342_v54  ;;  %3231 = vmatpush1.bf16.msra.mxu1 %v6344_v55  ;;  %v360_v54 = vld [vmem:[%s7071_s28 + $0x528] sm:$0xff] }
  0xb0   : > { %3189 = vmatprep.subr.bf16.mxu0 %v6463_v56  ;;  %3232 = vmatprep.subr.bf16.mxu1 %v6465_v57  ;;  %v420_v55 = vld [vmem:[%s7071_s28 + $0x708] sm:$0xff]  ;;  %v6358_v56 = vcombine.low %v239_v44, %v299_v45  ;;  %v6360_v57 = vcombine.low %v240_v46, %v300_v47  ;;  %v6491_v44 = vcombine.high %v365_v38, %v425_v39  ;;  %v247_v46 = vld [vmem:[%s7071_s28 + $0x1a0] sm:$0xff] }
  0xb1   : > { %3219 = vmatprep.mubr.bf16.mxu0 %v6989_v0  ;;  %3262 = vmatprep.mubr.bf16.mxu1 %v6989_v0  ;;  %v6481_v59 = vcombine.high %v360_v54, %v420_v55  ;;  %v307_v47 = vld [vmem:[%s7071_s28 + $0x380] sm:$0xff] }
  0xb3   : > { %3190 = vmatpush1.bf16.msra.mxu0 %v6462_v62  ;;  %3233 = vmatpush1.bf16.msra.mxu1 %v6464_v63  ;;  %v242_v62 = vld [vmem:[%s7071_s28 + $0x178] sm:$0xff] }
  0xb4   : > { %3273 = vmatprep.subr.bf16.mxu0 %v6347_v1  ;;  %3316 = vmatprep.subr.bf16.mxu1 %v6349_v2  ;;  %v302_v63 = vld [vmem:[%s7071_s28 + $0x358] sm:$0xff]  ;;  %v6478_v1 = vcombine.low %v359_v52, %v419_v53  ;;  %v6480_v2 = vcombine.low %v360_v54, %v420_v55  ;;  %v6375_v52 = vcombine.high %v247_v46, %v307_v47  ;;  %v367_v54 = vld [vmem:[%s7071_s28 + $0x560] sm:$0xff] }
  0xb5   : > { %v6365_v4 = vcombine.high %v242_v62, %v302_v63  ;;  %v427_v55 = vld [vmem:[%s7071_s28 + $0x740] sm:$0xff] }
  0xb6   : > { %6546 = vmatmul.mubr.msk.bf16.vlgmr.msra.gmra.mrb[72].mxu0 %vm1635_vm0, %v7093_v27  ;;  %6547 = vmatmul.mubr.msk.bf16.vlgmr.msra.gmra.mrb[72].mxu1 %vm1635_vm0, %v7093_v27 }
  0xb7   : > { %3274 = vmatpush1.bf16.msra.mxu0 %v6346_v7  ;;  %3317 = vmatpush1.bf16.msra.mxu1 %v6348_v8  ;;  %v362_v7 = vld [vmem:[%s7071_s28 + $0x538] sm:$0xff] }
  0xb8   : > { %3275 = vmatprep.subr.bf16.mxu0 %v6467_v9  ;;  %3318 = vmatprep.subr.bf16.mxu1 %v6469_v10  ;;  %v422_v8 = vld [vmem:[%s7071_s28 + $0x718] sm:$0xff]  ;;  %v6362_v9 = vcombine.low %v241_v60, %v301_v61  ;;  %v6364_v10 = vcombine.low %v242_v62, %v302_v63  ;;  %v6495_v61 = vcombine.high %v367_v54, %v427_v55  ;;  %v249_v63 = vld [vmem:[%s7071_s28 + $0x1b0] sm:$0xff] }
  0xb9   : > { %3305 = vmatprep.mubr.bf16.mxu0 %v6989_v0  ;;  %3348 = vmatprep.mubr.bf16.mxu1 %v6989_v0  ;;  %v6485_v12 = vcombine.high %v362_v7, %v422_v8 }
  0xbb   : > { %3276 = vmatpush1.bf16.msra.mxu0 %v6466_v15  ;;  %3319 = vmatpush1.bf16.msra.mxu1 %v6468_v16  ;;  %v244_v15 = vld [vmem:[%s7071_s28 + $0x188] sm:$0xff] }
  0xbc   : > { %3359 = vmatprep.subr.bf16.mxu0 %v6351_v17  ;;  %3402 = vmatprep.subr.bf16.mxu1 %v6353_v18  ;;  %v304_v16 = vld [vmem:[%s7071_s28 + $0x368] sm:$0xff]  ;;  %v6482_v17 = vcombine.low %v361_v5, %v421_v6  ;;  %v6484_v18 = vcombine.low %v362_v7, %v422_v8  ;;  %v6494_v5 = vcombine.low %v367_v54, %v427_v55 }
  0xbd   : > { %v6369_v20 = vcombine.high %v244_v15, %v304_v16 }
  0xbe   : > { %6548 = vmatmul.mubr.msk.bf16.vlgmr.msra.gmra.mrb[76].mxu0 %vm1635_vm0, %v7093_v27  ;;  %6549 = vmatmul.mubr.msk.bf16.vlgmr.msra.gmra.mrb[76].mxu1 %vm1635_vm0, %v7093_v27 }
  0xbf   : > { %3360 = vmatpush1.bf16.msra.mxu0 %v6350_v23  ;;  %3403 = vmatpush1.bf16.msra.mxu1 %v6352_v24  ;;  %v364_v23 = vld [vmem:[%s7071_s28 + $0x548] sm:$0xff] }
  0xc0   : > { %3361 = vmatprep.subr.bf16.mxu0 %v6471_v25  ;;  %3404 = vmatprep.subr.bf16.mxu1 %v6473_v26  ;;  %v424_v24 = vld [vmem:[%s7071_s28 + $0x728] sm:$0xff]  ;;  %v6366_v25 = vcombine.low %v243_v13, %v303_v14  ;;  %v6368_v26 = vcombine.low %v244_v15, %v304_v16  ;;  %v430_v13 = vld [vmem:[%s7071_s28 + $0x758] sm:$0xff]  ;;  %v7473_v15 = vld [vmem:[%s7461_s9] sm:$0xff] }
  0xc1   : > { %3391 = vmatprep.mubr.bf16.mxu0 %v6989_v0  ;;  %3434 = vmatprep.mubr.bf16.mxu1 %v6989_v0  ;;  %v6489_v29 = vcombine.high %v364_v23, %v424_v24 }
  0xc3   : > { %3362 = vmatpush1.bf16.msra.mxu0 %v6470_v32  ;;  %3405 = vmatpush1.bf16.msra.mxu1 %v6472_v33  ;;  %v246_v32 = vld [vmem:[%s7071_s28 + $0x198] sm:$0xff] }
  0xc4   : > { %3445 = vmatprep.subr.bf16.mxu0 %v6355_v34  ;;  %3488 = vmatprep.subr.bf16.mxu1 %v6357_v35  ;;  %v306_v33 = vld [vmem:[%s7071_s28 + $0x378] sm:$0xff]  ;;  %v6486_v34 = vcombine.low %v363_v21, %v423_v22  ;;  %v6488_v35 = vcombine.low %v364_v23, %v424_v24  ;;  %v7486_v22 = vld [vmem:[%s7071_s28 + $0x1c0] sm:$0xff] }
  0xc5   : > { %v6373_v37 = vcombine.high %v246_v32, %v306_v33  ;;  %v7489_v23 = vld [vmem:[%s7071_s28 + $0x3a0] sm:$0xff] }
  0xc6   : > { %6550 = vmatmul.mubr.msk.bf16.vlgmr.msra.gmra.mrb[80].mxu0 %vm1635_vm0, %v7093_v27  ;;  %6551 = vmatmul.mubr.msk.bf16.vlgmr.msra.gmra.mrb[80].mxu1 %vm1635_vm0, %v7093_v27 }
  0xc7   : > { %3446 = vmatpush1.bf16.msra.mxu0 %v6354_v40  ;;  %3489 = vmatpush1.bf16.msra.mxu1 %v6356_v41  ;;  %v366_v40 = vld [vmem:[%s7071_s28 + $0x558] sm:$0xff] }
  0xc8   : > { %3447 = vmatprep.subr.bf16.mxu0 %v6475_v42  ;;  %3490 = vmatprep.subr.bf16.mxu1 %v6477_v43  ;;  %v426_v41 = vld [vmem:[%s7071_s28 + $0x738] sm:$0xff]  ;;  %v6370_v42 = vcombine.low %v245_v30, %v305_v31  ;;  %v6372_v43 = vcombine.low %v246_v32, %v306_v33 }
  0xc9   : > { %3477 = vmatprep.mubr.bf16.mxu0 %v6989_v0  ;;  %3520 = vmatprep.mubr.bf16.mxu1 %v6989_v0  ;;  %v6493_v45 = vcombine.high %v366_v40, %v426_v41 }
  0xcb   : > { %3448 = vmatpush1.bf16.msra.mxu0 %v6474_v48  ;;  %3491 = vmatpush1.bf16.msra.mxu1 %v6476_v49  ;;  %v248_v48 = vld [vmem:[%s7071_s28 + $0x1a8] sm:$0xff] }
  0xcc   : > { %3531 = vmatprep.subr.bf16.mxu0 %v6359_v50  ;;  %3574 = vmatprep.subr.bf16.mxu1 %v6361_v51  ;;  %v308_v49 = vld [vmem:[%s7071_s28 + $0x388] sm:$0xff]  ;;  %v6490_v50 = vcombine.low %v365_v38, %v425_v39  ;;  %v6492_v51 = vcombine.low %v366_v40, %v426_v41  ;;  %v7524_v38 = vld [vmem:[%s7071_s28 + $0x580] sm:$0xff] }
  0xcd   : > { %v6377_v53 = vcombine.high %v248_v48, %v308_v49  ;;  %v6376_v60 = vcombine.low %v248_v48, %v308_v49  ;;  %v7527_v39 = vld [vmem:[%s7071_s28 + $0x760] sm:$0xff] }
  0xce   : > { %6552 = vmatmul.mubr.msk.bf16.vlgmr.msra.gmra.mrb[84].mxu0 %vm1635_vm0, %v7093_v27  ;;  %6553 = vmatmul.mubr.msk.bf16.vlgmr.msra.gmra.mrb[84].mxu1 %vm1635_vm0, %v7093_v27 }
  0xcf   : > { %3532 = vmatpush1.bf16.msra.mxu0 %v6358_v56  ;;  %3575 = vmatpush1.bf16.msra.mxu1 %v6360_v57  ;;  %v368_v56 = vld [vmem:[%s7071_s28 + $0x568] sm:$0xff] }
  0xd0   : > { %3533 = vmatprep.subr.bf16.mxu0 %v6479_v58  ;;  %3576 = vmatprep.subr.bf16.mxu1 %v6481_v59  ;;  %v428_v57 = vld [vmem:[%s7071_s28 + $0x748] sm:$0xff]  ;;  %v4249_v58 = vlaneseq  ;;  %v6374_v59 = vcombine.low %v247_v46, %v307_v47 }
  0xd1   : > { %3563 = vmatprep.mubr.bf16.mxu0 %v6989_v0  ;;  %3606 = vmatprep.mubr.bf16.mxu1 %v6989_v0  ;;  %v6497_v62 = vcombine.high %v368_v56, %v428_v57  ;;  %v6496_v6 = vcombine.low %v368_v56, %v428_v57  ;;  %v7539_v46 = vld [vmem:[%s7071_s28 + $0x588] sm:$0xff] }
  0xd2   : > { %v7542_v47 = vld [vmem:[%s7071_s28 + $0x768] sm:$0xff] }
  0xd3   : > { %3534 = vmatpush1.bf16.msra.mxu0 %v6478_v1  ;;  %3577 = vmatpush1.bf16.msra.mxu1 %v6480_v2  ;;  %v309_v1 = vld [vmem:[%s7071_s28 + $0x390] sm:$0xff]  ;;  %v250_v2 = vld [vmem:[%s7071_s28 + $0x1b8] sm:$0xff] }
  0xd4   : > { %3617 = vmatprep.subr.bf16.mxu0 %v6363_v3  ;;  %3660 = vmatprep.subr.bf16.mxu1 %v6365_v4  ;;  %v310_v3 = vld [vmem:[%s7071_s28 + $0x398] sm:$0xff]  ;;  %v7454_v4 = vshrl.u32 %v4249_v58, 7  ;;  %v6379_v7 = vcombine.high %v249_v63, %v309_v1  ;;  %v6378_v14 = vcombine.low %v249_v63, %v309_v1  ;;  %v6503_v58 = vcombine.high %v7524_v38, %v7527_v39  ;;  %v7554_v1 = vld [vmem:[%s7071_s28 + $0x1d0] sm:$0xff] }
  0xd5   : > { %v6381_v8 = vcombine.high %v250_v2, %v310_v3  ;;  %v6505_v63 = vcombine.high %v7539_v46, %v7542_v47 }
  0xd6   : > { %6554 = vmatmul.mubr.msk.bf16.vlgmr.msra.gmra.mrb[88].mxu0 %vm1635_vm0, %v7093_v27  ;;  %6555 = vmatmul.mubr.msk.bf16.vlgmr.msra.gmra.mrb[88].mxu1 %vm1635_vm0, %v7093_v27  ;;  %v7476_v16 = vsub.s32 2, %v7454_v4  ;;  %v7508_v31 = vsub.s32 4, %v7454_v4 }
  0xd7   : > { %3618 = vmatpush1.bf16.msra.mxu0 %v6362_v9  ;;  %3661 = vmatpush1.bf16.msra.mxu1 %v6364_v10  ;;  %v369_v9 = vld [vmem:[%s7071_s28 + $0x570] sm:$0xff] }
  0xd8   : > { %3619 = vmatprep.subr.bf16.mxu0 %v6483_v11  ;;  %3662 = vmatprep.subr.bf16.mxu1 %v6485_v12  ;;  %v429_v10 = vld [vmem:[%s7071_s28 + $0x750] sm:$0xff]  ;;  %v7468_v11 = vsub.s32 0, %v7454_v4  ;;  %v370_v12 = vld [vmem:[%s7071_s28 + $0x578] sm:$0xff] }
  0xd9   : > { %3649 = vmatprep.mubr.bf16.mxu0 %v6989_v0  ;;  %3692 = vmatprep.mubr.bf16.mxu1 %v6989_v0  ;;  %v6501_v21 = vcombine.high %v370_v12, %v430_v13  ;;  %v6498_v30 = vcombine.low %v369_v9, %v429_v10  ;;  %v6500_v33 = vcombine.low %v370_v12, %v430_v13 }
  0xda   : > { %v4252_v24 = vrot.slane %v7473_v15, %v7468_v11  ;;  %v6502_v12 = vcombine.low %v7524_v38, %v7527_v39 }
  0xdb   : > { %3620 = vmatpush1.bf16.msra.mxu0 %v6482_v17  ;;  %3663 = vmatpush1.bf16.msra.mxu1 %v6484_v18  ;;  %v7479_v17 = vsub.s32 1, %v7454_v4  ;;  %v6380_v18 = vcombine.low %v250_v2, %v310_v3  ;;  %v7557_v2 = vld [vmem:[%s7071_s28 + $0x3b0] sm:$0xff] }
  0xdc   : > { %3703 = vmatprep.subr.bf16.mxu0 %v6367_v19  ;;  %3746 = vmatprep.subr.bf16.mxu1 %v6369_v20  ;;  %v7482_v19 = vsub.s32 3, %v7454_v4  ;;  %v6499_v20 = vcombine.high %v369_v9, %v429_v10 }
  0xde   : > { %6556 = vmatmul.mubr.msk.bf16.vlgmr.msra.gmra.mrb[92].mxu0 %vm1635_vm0, %v7093_v27  ;;  %6557 = vmatmul.mubr.msk.bf16.vlgmr.msra.gmra.mrb[92].mxu1 %vm1635_vm0, %v7093_v27  ;;  %v4264_v32 = vrot.slane %v7473_v15, %v7482_v19 }
  0xdf   : > { %3704 = vmatpush1.bf16.msra.mxu0 %v6366_v25  ;;  %3747 = vmatpush1.bf16.msra.mxu1 %v6368_v26  ;;  %v7496_v25 = vld [vmem:[%s7071_s28 + $0x1c8] sm:$0xff] }
  0xe0   : > { %3705 = vmatprep.subr.bf16.mxu0 %v6487_v28  ;;  %3748 = vmatprep.subr.bf16.mxu1 %v6489_v29  ;;  %v7499_v26 = vld [vmem:[%s7071_s28 + $0x3a8] sm:$0xff]  ;;  %v4260_v28 = vrot.slane %v7473_v15, %v7476_v16  ;;  %v4256_v29 = vrot.slane %v7473_v15, %v7479_v17 }
  0xe1   : > { %3735 = vmatprep.mubr.bf16.mxu0 %v6989_v0  ;;  %3778 = vmatprep.mubr.bf16.mxu1 %v6989_v0 }
  0xe3   : > { %3706 = vmatpush1.bf16.msra.mxu0 %v6486_v34  ;;  %3749 = vmatpush1.bf16.msra.mxu1 %v6488_v35  ;;  %v6383_v34 = vcombine.high %v7486_v22, %v7489_v23 }
  0xe4   : > { %3789 = vmatprep.subr.bf16.mxu0 %v6371_v36  ;;  %3832 = vmatprep.subr.bf16.mxu1 %v6373_v37  ;;  %v6382_v36 = vcombine.low %v7486_v22, %v7489_v23  ;;  %v6385_v37 = vcombine.high %v7496_v25, %v7499_v26  ;;  %v433_v22 = vld [vmem:[%s7071_s28 + $0x770] sm:$0xff] }
  0xe6   : > { %6558 = vmatmul.mubr.msk.bf16.vlgmr.msra.gmra.mrb[96].mxu0 %vm1635_vm0, %v7093_v27  ;;  %6559 = vmatmul.mubr.msk.bf16.vlgmr.msra.gmra.mrb[96].mxu1 %vm1635_vm0, %v7093_v27 }
  0xe7   : > { %3790 = vmatpush1.bf16.msra.mxu0 %v6370_v42  ;;  %3833 = vmatpush1.bf16.msra.mxu1 %v6372_v43  ;;  %v6384_v43 = vcombine.low %v7496_v25, %v7499_v26  ;;  %v374_v26 = vld [vmem:[%s7071_s28 + $0x598] sm:$0xff] }
  0xe8   : > { %3791 = vmatprep.subr.bf16.mxu0 %v6491_v44  ;;  %3834 = vmatprep.subr.bf16.mxu1 %v6493_v45  ;;  %v7533_v44 = vsub.s32 6, %v7454_v4  ;;  %v7536_v45 = vsub.s32 5, %v7454_v4 }
  0xe9   : > { %3821 = vmatprep.mubr.bf16.mxu0 %v6989_v0  ;;  %3864 = vmatprep.mubr.bf16.mxu1 %v6989_v0 }
  0xeb   : > { %3792 = vmatpush1.bf16.msra.mxu0 %v6490_v50  ;;  %3835 = vmatpush1.bf16.msra.mxu1 %v6492_v51 }
  0xec   : > { %3875 = vmatprep.subr.bf16.mxu0 %v6375_v52  ;;  %3918 = vmatprep.subr.bf16.mxu1 %v6377_v53  ;;  %v4268_v52 = vrot.slane %v7473_v15, %v7508_v31  ;;  %v7547_v53 = vsub.s32 7, %v7454_v4 }
  0xee   : > { %6560 = vmatmul.mubr.msk.bf16.vlgmr.msra.gmra.mrb[100].mxu0 %vm1635_vm0, %v7093_v27  ;;  %6561 = vmatmul.mubr.msk.bf16.vlgmr.msra.gmra.mrb[100].mxu1 %vm1635_vm0, %v7093_v27  ;;  %v4280_v10 = vrot.slane %v7473_v15, %v7547_v53 }
  0xef   : > { %3876 = vmatpush1.bf16.msra.mxu0 %v6374_v59  ;;  %3919 = vmatpush1.bf16.msra.mxu1 %v6376_v60 }
  0xf0   : > { %3877 = vmatprep.subr.bf16.mxu0 %v6495_v61  ;;  %3920 = vmatprep.subr.bf16.mxu1 %v6497_v62 }
  0xf1   : > { %3907 = vmatprep.mubr.bf16.mxu0 %v6989_v0  ;;  %3950 = vmatprep.mubr.bf16.mxu1 %v6989_v0 }
  0xf3   : > { %3878 = vmatpush1.bf16.msra.mxu0 %v6494_v5  ;;  %3921 = vmatpush1.bf16.msra.mxu1 %v6496_v6  ;;  %v4276_v5 = vrot.slane %v7473_v15, %v7533_v44  ;;  %v4272_v6 = vrot.slane %v7473_v15, %v7536_v45 }
  0xf4   : > { %3961 = vmatprep.subr.bf16.mxu0 %v6379_v7  ;;  %4004 = vmatprep.subr.bf16.mxu1 %v6381_v8  ;;  %v7566_v7 = vld [vmem:[%s7071_s28 + $0x1d8] sm:$0xff] }
  0xf5   : > { %v314_v8 = vld [vmem:[%s7071_s28 + $0x3b8] sm:$0xff] }
  0xf6   : > { %6562 = vmatmul.mubr.msk.bf16.vlgmr.msra.gmra.mrb[104].mxu0 %vm1635_vm0, %v7093_v27  ;;  %6563 = vmatmul.mubr.msk.bf16.vlgmr.msra.gmra.mrb[104].mxu1 %vm1635_vm0, %v7093_v27  ;;  %v6389_v15 = vcombine.high %v7566_v7, %v314_v8 }
  0xf7   : > { %3962 = vmatpush1.bf16.msra.mxu0 %v6378_v14  ;;  %4005 = vmatpush1.bf16.msra.mxu1 %v6380_v18  ;;  %v6504_v14 = vcombine.low %v7539_v46, %v7542_v47  ;;  %v6387_v18 = vcombine.high %v7554_v1, %v7557_v2 }
  0xf8   : > { %3963 = vmatprep.subr.bf16.mxu0 %v6499_v20  ;;  %4006 = vmatprep.subr.bf16.mxu1 %v6501_v21  ;;  %v373_v21 = vld [vmem:[%s7071_s28 + $0x590] sm:$0xff] }
  0xf9   : > { %v1673_v35 = vpop.f32.mrb[0].mxu0  ;;  %3993 = vmatprep.mubr.bf16.mxu0 %v6989_v0  ;;  %v1716_v41 = vpop.f32.mrb[0].mxu1  ;;  %4036 = vmatprep.mubr.bf16.mxu1 %v6989_v0 }
  0xfa   : > { %v4849_v40 = vadd.f32 %v4252_v24, %v1673_v35  ;;  %v1675_v42 = vpop.f32.mrb[1].mxu0  ;;  %v4851_v48 = vadd.f32 %v4260_v28, %v1716_v41  ;;  %v1718_v50 = vpop.f32.mrb[1].mxu1  ;;  %v6388_v35 = vcombine.low %v7566_v7, %v314_v8  ;;  %v6507_v41 = vcombine.high %v373_v21, %v433_v22 }
  0xfb   : > { %v4850_v49 = vadd.f32 %v4256_v29, %v1675_v42  ;;  %v1677_v51 = vpop.f32.mrb[2].mxu0  ;;  %3964 = vmatpush1.bf16.msra.mxu0 %v6498_v30  ;;  %v4852_v54 = vadd.f32 %v4264_v32, %v1718_v50  ;;  %v1720_v56 = vpop.f32.mrb[2].mxu1  ;;  %4007 = vmatpush1.bf16.msra.mxu1 %v6500_v33 }
  0xfc   : > { %v5509_v55 = vadd.f32 %v4252_v24, %v1677_v51  ;;  %v1679_v57 = vpop.f32.mrb[3].mxu0  ;;  %4047 = vmatprep.subr.bf16.mxu0 %v6383_v34  ;;  %v5511_v60 = vadd.f32 %v4260_v28, %v1720_v56  ;;  %v1722_v62 = vpop.f32.mrb[3].mxu1  ;;  %4090 = vmatprep.subr.bf16.mxu1 %v6385_v37  ;;  %v434_v28 = vld [vmem:[%s7071_s28 + $0x778] sm:$0xff]  ;;  %v6386_v34 = vcombine.low %v7554_v1, %v7557_v2 }
  0xfd   : > { %v6758_v59 = vpack.c.bf16 %v4850_v49, %v4849_v40  ;;  %v5510_v61 = vadd.f32 %v4256_v29, %v1679_v57  ;;  %v6759_v3 = vpack.c.bf16 %v4852_v54, %v4851_v48  ;;  %v5512_v4 = vadd.f32 %v4264_v32, %v1722_v62 }
  0xfe   : > { %6564 = vmatmul.mubr.msk.bf16.vlgmr.msra.gmra.mrb[108].mxu0 %vm1635_vm0, %v7093_v27  ;;  %6565 = vmatmul.mubr.msk.bf16.vlgmr.msra.gmra.mrb[108].mxu1 %vm1635_vm0, %v7093_v27  ;;  %v6509_v48 = vcombine.high %v374_v26, %v434_v28  ;;  %v6506_v56 = vcombine.low %v373_v21, %v433_v22 }
  0xff   : > { %5449 = vst [vmem:[%s7570_s17] sm:$0xff] %v6758_v59  ;;  %v6818_v9 = vpack.c.bf16 %v5510_v61, %v5509_v55  ;;  %4048 = vmatpush1.bf16.msra.mxu0 %v6382_v36  ;;  %5450 = vst [vmem:[%s7570_s17 + $0x8] sm:$0xff] %v6759_v3  ;;  %v6819_v13 = vpack.c.bf16 %v5512_v4, %v5511_v60  ;;  %4091 = vmatpush1.bf16.msra.mxu1 %v6384_v43  ;;  %v7597_v36 = vld [vmem:[%s7461_s9 + $0x8] sm:$0xff] }
 0x100   : > { %4049 = vmatprep.subr.bf16.mxu0 %v6503_v58  ;;  %4092 = vmatprep.subr.bf16.mxu1 %v6505_v63  ;;  %v4284_v51 = vrot.slane %v7597_v36, %v7468_v11  ;;  %v4288_v55 = vrot.slane %v7597_v36, %v7479_v17  ;;  %v4296_v58 = vrot.slane %v7597_v36, %v7482_v19 }
 0x101   : > { %6690 = vst [vmem:[%s7570_s17 + $0x1e0] sm:$0xff] %v6818_v9  ;;  %v1759_v20 = vpop.f32.mrb[4].mxu0  ;;  %4079 = vmatprep.mubr.bf16.mxu0 %v6989_v0  ;;  %6691 = vst [vmem:[%s7570_s17 + $0x1e8] sm:$0xff] %v6819_v13  ;;  %v1802_v24 = vpop.f32.mrb[4].mxu1  ;;  %4122 = vmatprep.mubr.bf16.mxu1 %v6989_v0  ;;  %v6508_v59 = vcombine.low %v374_v26, %v434_v28  ;;  %v4304_v21 = vrot.slane %v7597_v36, %v7536_v45 }
 0x102   : > { %v4853_v23 = vadd.f32 %v4268_v52, %v1759_v20  ;;  %v1761_v25 = vpop.f32.mrb[5].mxu0  ;;  %v4855_v29 = vadd.f32 %v4276_v5, %v1802_v24  ;;  %v1804_v32 = vpop.f32.mrb[5].mxu1 }
 0x103   : > { %v4854_v30 = vadd.f32 %v4272_v6, %v1761_v25  ;;  %v1763_v33 = vpop.f32.mrb[6].mxu0  ;;  %4050 = vmatpush1.bf16.msra.mxu0 %v6502_v12  ;;  %v4856_v37 = vadd.f32 %v4280_v10, %v1804_v32  ;;  %v1806_v39 = vpop.f32.mrb[6].mxu1  ;;  %4093 = vmatpush1.bf16.msra.mxu1 %v6504_v14 }
 0x104   : > { %v5513_v38 = vadd.f32 %v4268_v52, %v1763_v33  ;;  %v1765_v40 = vpop.f32.mrb[7].mxu0  ;;  %4133 = vmatprep.subr.bf16.mxu0 %v6387_v18  ;;  %v5515_v43 = vadd.f32 %v4276_v5, %v1806_v39  ;;  %v1808_v47 = vpop.f32.mrb[7].mxu1  ;;  %4176 = vmatprep.subr.bf16.mxu1 %v6389_v15  ;;  %v4292_v52 = vrot.slane %v7597_v36, %v7476_v16  ;;  %v4221_v33 = vld [vmem:[%s7461_s9 + $0x10] sm:$0xff] }
 0x105   : > { %v6760_v42 = vpack.c.bf16 %v4854_v30, %v4853_v23  ;;  %v5514_v46 = vadd.f32 %v4272_v6, %v1765_v40  ;;  %v6761_v49 = vpack.c.bf16 %v4856_v37, %v4855_v29  ;;  %v5516_v50 = vadd.f32 %v4280_v10, %v1808_v47 }
 0x106   : > { %6566 = vmatmul.mubr.msk.bf16.vlgmr.msra.gmra.mrb[112].mxu0 %vm1635_vm0, %v7093_v27  ;;  %6567 = vmatmul.mubr.msk.bf16.vlgmr.msra.gmra.mrb[112].mxu1 %vm1635_vm0, %v7093_v27  ;;  %v4300_v18 = vrot.slane %v7597_v36, %v7508_v31  ;;  %v4308_v15 = vrot.slane %v7597_v36, %v7533_v44  ;;  %v4312_v23 = vrot.slane %v7597_v36, %v7547_v53 }
 0x107   : > { %5451 = vst [vmem:[%s7570_s17 + $0x10] sm:$0xff] %v6760_v42  ;;  %v6820_v54 = vpack.c.bf16 %v5514_v46, %v5513_v38  ;;  %4134 = vmatpush1.bf16.msra.mxu0 %v6386_v34  ;;  %5452 = vst [vmem:[%s7570_s17 + $0x18] sm:$0xff] %v6761_v49  ;;  %v6821_v57 = vpack.c.bf16 %v5516_v50, %v5515_v43  ;;  %4177 = vmatpush1.bf16.msra.mxu1 %v6388_v35 }
 0x108   : > { %4135 = vmatprep.subr.bf16.mxu0 %v6507_v41  ;;  %4178 = vmatprep.subr.bf16.mxu1 %v6509_v48  ;;  %v4316_v46 = vrot.slane %v4221_v33, %v7468_v11  ;;  %v4324_v48 = vrot.slane %v4221_v33, %v7476_v16  ;;  %v4320_v49 = vrot.slane %v4221_v33, %v7479_v17 }
 0x109   : > { %6692 = vst [vmem:[%s7570_s17 + $0x1f0] sm:$0xff] %v6820_v54  ;;  %v1845_v60 = vpop.f32.mrb[8].mxu0  ;;  %4165 = vmatprep.mubr.bf16.mxu0 %v6989_v0  ;;  %6693 = vst [vmem:[%s7570_s17 + $0x1f8] sm:$0xff] %v6821_v57  ;;  %v1888_v62 = vpop.f32.mrb[8].mxu1  ;;  %4208 = vmatprep.mubr.bf16.mxu1 %v6989_v0 }
 0x10a   : > { %v4857_v61 = vadd.f32 %v4284_v51, %v1845_v60  ;;  %v1847_v63 = vpop.f32.mrb[9].mxu0  ;;  %v4859_v1 = vadd.f32 %v4292_v52, %v1888_v62  ;;  %v1890_v3 = vpop.f32.mrb[9].mxu1 }
 0x10b   : > { %v4858_v2 = vadd.f32 %v4288_v55, %v1847_v63  ;;  %v1849_v4 = vpop.f32.mrb[10].mxu0  ;;  %4136 = vmatpush1.bf16.msra.mxu0 %v6506_v56  ;;  %v4860_v5 = vadd.f32 %v4296_v58, %v1890_v3  ;;  %v1892_v7 = vpop.f32.mrb[10].mxu1  ;;  %4179 = vmatpush1.bf16.msra.mxu1 %v6508_v59 }
 0x10c   : > { %v5517_v6 = vadd.f32 %v4284_v51, %v1849_v4  ;;  %v1851_v8 = vpop.f32.mrb[11].mxu0  ;;  %v5519_v10 = vadd.f32 %v4292_v52, %v1892_v7  ;;  %v1894_v13 = vpop.f32.mrb[11].mxu1  ;;  %v4328_v51 = vrot.slane %v4221_v33, %v7482_v19 }
 0x10d   : > { %v6762_v9 = vpack.c.bf16 %v4858_v2, %v4857_v61  ;;  %v5518_v12 = vadd.f32 %v4288_v55, %v1851_v8  ;;  %v6763_v14 = vpack.c.bf16 %v4860_v5, %v4859_v1  ;;  %v5520_v0 = vadd.f32 %v4296_v58, %v1894_v13 }
 0x10e   : > { %6568 = vmatmul.mubr.msk.bf16.vlgmr.msra.gmra.mrb[116].mxu0 %vm1635_vm0, %v7093_v27  ;;  %6569 = vmatmul.mubr.msk.bf16.vlgmr.msra.gmra.mrb[116].mxu1 %vm1635_vm0, %v7093_v27  ;;  %v4332_v8 = vrot.slane %v4221_v33, %v7508_v31 }
 0x10f   : > { %5453 = vst [vmem:[%s7570_s17 + $0x20] sm:$0xff] %v6762_v9  ;;  %v6822_v20 = vpack.c.bf16 %v5518_v12, %v5517_v6  ;;  %5454 = vst [vmem:[%s7570_s17 + $0x28] sm:$0xff] %v6763_v14  ;;  %v6823_v22 = vpack.c.bf16 %v5520_v0, %v5519_v10  ;;  %v4340_v10 = vrot.slane %v4221_v33, %v7533_v44 }
 0x110   : > { %v4336_v12 = vrot.slane %v4221_v33, %v7536_v45  ;;  %v4344_v14 = vrot.slane %v4221_v33, %v7547_v53 }
 0x111   : > { %6694 = vst [vmem:[%s7570_s17 + $0x200] sm:$0xff] %v6822_v20  ;;  %v1931_v24 = vpop.f32.mrb[12].mxu0  ;;  %6695 = vst [vmem:[%s7570_s17 + $0x208] sm:$0xff] %v6823_v22  ;;  %v1974_v26 = vpop.f32.mrb[12].mxu1 }
 0x112   : > { %v4861_v25 = vadd.f32 %v4300_v18, %v1931_v24  ;;  %v1933_v28 = vpop.f32.mrb[13].mxu0  ;;  %v4863_v29 = vadd.f32 %v4308_v15, %v1974_v26  ;;  %v1976_v30 = vpop.f32.mrb[13].mxu1 }
 0x113   : > { %v4862_v27 = vadd.f32 %v4304_v21, %v1933_v28  ;;  %v1935_v32 = vpop.f32.mrb[14].mxu0  ;;  %v4864_v34 = vadd.f32 %v4312_v23, %v1976_v30  ;;  %v1978_v37 = vpop.f32.mrb[14].mxu1 }
 0x114   : > { %v5521_v35 = vadd.f32 %v4300_v18, %v1935_v32  ;;  %v1937_v38 = vpop.f32.mrb[15].mxu0  ;;  %v5523_v36 = vadd.f32 %v4308_v15, %v1978_v37  ;;  %v1980_v41 = vpop.f32.mrb[15].mxu1 }
 0x115   : > { %v6764_v39 = vpack.c.bf16 %v4862_v27, %v4861_v25  ;;  %v5522_v40 = vadd.f32 %v4304_v21, %v1937_v38  ;;  %v6765_v42 = vpack.c.bf16 %v4864_v34, %v4863_v29  ;;  %v5524_v43 = vadd.f32 %v4312_v23, %v1980_v41  ;;  %v4222_v25 = vld [vmem:[%s7461_s9 + $0x18] sm:$0xff] }
 0x116   : > { %v4348_v38 = vrot.slane %v4222_v25, %v7468_v11 }
 0x117   : > { %5455 = vst [vmem:[%s7570_s17 + $0x30] sm:$0xff] %v6764_v39  ;;  %v6824_v47 = vpack.c.bf16 %v5522_v40, %v5521_v35  ;;  %5456 = vst [vmem:[%s7570_s17 + $0x38] sm:$0xff] %v6765_v42  ;;  %v6825_v50 = vpack.c.bf16 %v5524_v43, %v5523_v36  ;;  %v4356_v36 = vrot.slane %v4222_v25, %v7476_v16 }
 0x118   : > { %v4352_v40 = vrot.slane %v4222_v25, %v7479_v17  ;;  %v4360_v42 = vrot.slane %v4222_v25, %v7482_v19 }
 0x119   : > { %6696 = vst [vmem:[%s7570_s17 + $0x210] sm:$0xff] %v6824_v47  ;;  %v2017_v52 = vpop.f32.mrb[16].mxu0  ;;  %6697 = vst [vmem:[%s7570_s17 + $0x218] sm:$0xff] %v6825_v50  ;;  %v2060_v55 = vpop.f32.mrb[16].mxu1 }
 0x11a   : > { %v4865_v54 = vadd.f32 %v4316_v46, %v2017_v52  ;;  %v2019_v56 = vpop.f32.mrb[17].mxu0  ;;  %v4867_v57 = vadd.f32 %v4324_v48, %v2060_v55  ;;  %v2062_v59 = vpop.f32.mrb[17].mxu1 }
 0x11b   : > { %v4866_v58 = vadd.f32 %v4320_v49, %v2019_v56  ;;  %v2021_v60 = vpop.f32.mrb[18].mxu0  ;;  %v4868_v61 = vadd.f32 %v4328_v51, %v2062_v59  ;;  %v2064_v63 = vpop.f32.mrb[18].mxu1 }
 0x11c   : > { %v5525_v62 = vadd.f32 %v4316_v46, %v2021_v60  ;;  %v2023_v1 = vpop.f32.mrb[19].mxu0  ;;  %v5527_v3 = vadd.f32 %v4324_v48, %v2064_v63  ;;  %v2066_v5 = vpop.f32.mrb[19].mxu1 }
 0x11d   : > { %v6766_v2 = vpack.c.bf16 %v4866_v58, %v4865_v54  ;;  %v5526_v4 = vadd.f32 %v4320_v49, %v2023_v1  ;;  %v6767_v6 = vpack.c.bf16 %v4868_v61, %v4867_v57  ;;  %v5528_v7 = vadd.f32 %v4328_v51, %v2066_v5 }
 0x11e   : > { %v4364_v1 = vrot.slane %v4222_v25, %v7508_v31 }
 0x11f   : > { %5457 = vst [vmem:[%s7570_s17 + $0x40] sm:$0xff] %v6766_v2  ;;  %v6826_v9 = vpack.c.bf16 %v5526_v4, %v5525_v62  ;;  %5458 = vst [vmem:[%s7570_s17 + $0x48] sm:$0xff] %v6767_v6  ;;  %v6827_v13 = vpack.c.bf16 %v5528_v7, %v5527_v3  ;;  %v4372_v3 = vrot.slane %v4222_v25, %v7533_v44 }
 0x120   : > { %v4368_v4 = vrot.slane %v4222_v25, %v7536_v45  ;;  %v4376_v6 = vrot.slane %v4222_v25, %v7547_v53 }
 0x121   : > { %6698 = vst [vmem:[%s7570_s17 + $0x220] sm:$0xff] %v6826_v9  ;;  %v2103_v0 = vpop.f32.mrb[20].mxu0  ;;  %6699 = vst [vmem:[%s7570_s17 + $0x228] sm:$0xff] %v6827_v13  ;;  %v2146_v20 = vpop.f32.mrb[20].mxu1 }
 0x122   : > { %v4869_v18 = vadd.f32 %v4332_v8, %v2103_v0  ;;  %v2105_v15 = vpop.f32.mrb[21].mxu0  ;;  %v4871_v21 = vadd.f32 %v4340_v10, %v2146_v20  ;;  %v2148_v23 = vpop.f32.mrb[21].mxu1 }
 0x123   : > { %v4870_v22 = vadd.f32 %v4336_v12, %v2105_v15  ;;  %v2107_v24 = vpop.f32.mrb[22].mxu0  ;;  %v4872_v26 = vadd.f32 %v4344_v14, %v2148_v23  ;;  %v2150_v29 = vpop.f32.mrb[22].mxu1 }
 0x124   : > { %v5529_v28 = vadd.f32 %v4332_v8, %v2107_v24  ;;  %v2109_v27 = vpop.f32.mrb[23].mxu0  ;;  %v5531_v32 = vadd.f32 %v4340_v10, %v2150_v29  ;;  %v2152_v34 = vpop.f32.mrb[23].mxu1 }
 0x125   : > { %v6768_v30 = vpack.c.bf16 %v4870_v22, %v4869_v18  ;;  %v5530_v33 = vadd.f32 %v4336_v12, %v2109_v27  ;;  %v6769_v35 = vpack.c.bf16 %v4872_v26, %v4871_v21  ;;  %v5532_v37 = vadd.f32 %v4344_v14, %v2152_v34  ;;  %v4223_v18 = vld [vmem:[%s7461_s9 + $0x20] sm:$0xff] }
 0x126   : > { %v4380_v27 = vrot.slane %v4223_v18, %v7468_v11 }
 0x127   : > { %5459 = vst [vmem:[%s7570_s17 + $0x50] sm:$0xff] %v6768_v30  ;;  %v6828_v39 = vpack.c.bf16 %v5530_v33, %v5529_v28  ;;  %5460 = vst [vmem:[%s7570_s17 + $0x58] sm:$0xff] %v6769_v35  ;;  %v6829_v41 = vpack.c.bf16 %v5532_v37, %v5531_v32  ;;  %v4388_v32 = vrot.slane %v4223_v18, %v7476_v16 }
 0x128   : > { %v4384_v33 = vrot.slane %v4223_v18, %v7479_v17  ;;  %v4392_v35 = vrot.slane %v4223_v18, %v7482_v19 }
 0x129   : > { %6700 = vst [vmem:[%s7570_s17 + $0x230] sm:$0xff] %v6828_v39  ;;  %v2189_v43 = vpop.f32.mrb[24].mxu0  ;;  %6701 = vst [vmem:[%s7570_s17 + $0x238] sm:$0xff] %v6829_v41  ;;  %v2232_v47 = vpop.f32.mrb[24].mxu1 }
 0x12a   : > { %v4873_v46 = vadd.f32 %v4348_v38, %v2189_v43  ;;  %v2191_v48 = vpop.f32.mrb[25].mxu0  ;;  %v4875_v49 = vadd.f32 %v4356_v36, %v2232_v47  ;;  %v2234_v51 = vpop.f32.mrb[25].mxu1 }
 0x12b   : > { %v4874_v50 = vadd.f32 %v4352_v40, %v2191_v48  ;;  %v2193_v52 = vpop.f32.mrb[26].mxu0  ;;  %v4876_v54 = vadd.f32 %v4360_v42, %v2234_v51  ;;  %v2236_v56 = vpop.f32.mrb[26].mxu1 }
 0x12c   : > { %v5533_v55 = vadd.f32 %v4348_v38, %v2193_v52  ;;  %v2195_v57 = vpop.f32.mrb[27].mxu0  ;;  %v5535_v59 = vadd.f32 %v4356_v36, %v2236_v56  ;;  %v2238_v61 = vpop.f32.mrb[27].mxu1 }
 0x12d   : > { %v6770_v58 = vpack.c.bf16 %v4874_v50, %v4873_v46  ;;  %v5534_v60 = vadd.f32 %v4352_v40, %v2195_v57  ;;  %v6771_v62 = vpack.c.bf16 %v4876_v54, %v4875_v49  ;;  %v5536_v63 = vadd.f32 %v4360_v42, %v2238_v61 }
 0x12e   : > { %v4396_v57 = vrot.slane %v4223_v18, %v7508_v31 }
 0x12f   : > { %5461 = vst [vmem:[%s7570_s17 + $0x60] sm:$0xff] %v6770_v58  ;;  %v6830_v2 = vpack.c.bf16 %v5534_v60, %v5533_v55  ;;  %5462 = vst [vmem:[%s7570_s17 + $0x68] sm:$0xff] %v6771_v62  ;;  %v6831_v5 = vpack.c.bf16 %v5536_v63, %v5535_v59  ;;  %v4404_v59 = vrot.slane %v4223_v18, %v7533_v44 }
 0x130   : > { %v4400_v60 = vrot.slane %v4223_v18, %v7536_v45  ;;  %v4408_v62 = vrot.slane %v4223_v18, %v7547_v53 }
 0x131   : > { %6702 = vst [vmem:[%s7570_s17 + $0x240] sm:$0xff] %v6830_v2  ;;  %v2275_v7 = vpop.f32.mrb[28].mxu0  ;;  %6703 = vst [vmem:[%s7570_s17 + $0x248] sm:$0xff] %v6831_v5  ;;  %v2318_v9 = vpop.f32.mrb[28].mxu1 }
 0x132   : > { %v4877_v8 = vadd.f32 %v4364_v1, %v2275_v7  ;;  %v2277_v10 = vpop.f32.mrb[29].mxu0  ;;  %v4879_v12 = vadd.f32 %v4372_v3, %v2318_v9  ;;  %v2320_v14 = vpop.f32.mrb[29].mxu1 }
 0x133   : > { %v4878_v13 = vadd.f32 %v4368_v4, %v2277_v10  ;;  %v2279_v0 = vpop.f32.mrb[30].mxu0  ;;  %v4880_v20 = vadd.f32 %v4376_v6, %v2320_v14  ;;  %v2322_v21 = vpop.f32.mrb[30].mxu1 }
 0x134   : > { %v5537_v15 = vadd.f32 %v4364_v1, %v2279_v0  ;;  %v2281_v22 = vpop.f32.mrb[31].mxu0  ;;  %v5539_v24 = vadd.f32 %v4372_v3, %v2322_v21  ;;  %v2324_v26 = vpop.f32.mrb[31].mxu1 }
 0x135   : > { %v6772_v23 = vpack.c.bf16 %v4878_v13, %v4877_v8  ;;  %v5538_v25 = vadd.f32 %v4368_v4, %v2281_v22  ;;  %v6773_v28 = vpack.c.bf16 %v4880_v20, %v4879_v12  ;;  %v5540_v29 = vadd.f32 %v4376_v6, %v2324_v26  ;;  %v4224_v8 = vld [vmem:[%s7461_s9 + $0x28] sm:$0xff] }
 0x136   : > { %v4412_v22 = vrot.slane %v4224_v8, %v7468_v11 }
 0x137   : > { %5463 = vst [vmem:[%s7570_s17 + $0x70] sm:$0xff] %v6772_v23  ;;  %v6832_v30 = vpack.c.bf16 %v5538_v25, %v5537_v15  ;;  %5464 = vst [vmem:[%s7570_s17 + $0x78] sm:$0xff] %v6773_v28  ;;  %v6833_v34 = vpack.c.bf16 %v5540_v29, %v5539_v24  ;;  %v4420_v24 = vrot.slane %v4224_v8, %v7476_v16 }
 0x138   : > { %v4416_v25 = vrot.slane %v4224_v8, %v7479_v17  ;;  %v4424_v28 = vrot.slane %v4224_v8, %v7482_v19 }
 0x139   : > { %6704 = vst [vmem:[%s7570_s17 + $0x250] sm:$0xff] %v6832_v30  ;;  %v2361_v37 = vpop.f32.mrb[32].mxu0  ;;  %6705 = vst [vmem:[%s7570_s17 + $0x258] sm:$0xff] %v6833_v34  ;;  %v2404_v39 = vpop.f32.mrb[32].mxu1 }
 0x13a   : > { %v4881_v38 = vadd.f32 %v4380_v27, %v2361_v37  ;;  %v2363_v36 = vpop.f32.mrb[33].mxu0  ;;  %v4883_v40 = vadd.f32 %v4388_v32, %v2404_v39  ;;  %v2406_v42 = vpop.f32.mrb[33].mxu1 }
 0x13b   : > { %v4882_v41 = vadd.f32 %v4384_v33, %v2363_v36  ;;  %v2365_v43 = vpop.f32.mrb[34].mxu0  ;;  %v4884_v46 = vadd.f32 %v4392_v35, %v2406_v42  ;;  %v2408_v48 = vpop.f32.mrb[34].mxu1 }
 0x13c   : > { %v5541_v47 = vadd.f32 %v4380_v27, %v2365_v43  ;;  %v2367_v49 = vpop.f32.mrb[35].mxu0  ;;  %v5543_v51 = vadd.f32 %v4388_v32, %v2408_v48  ;;  %v2410_v54 = vpop.f32.mrb[35].mxu1 }
 0x13d   : > { %v6774_v50 = vpack.c.bf16 %v4882_v41, %v4881_v38  ;;  %v5542_v52 = vadd.f32 %v4384_v33, %v2367_v49  ;;  %v6775_v55 = vpack.c.bf16 %v4884_v46, %v4883_v40  ;;  %v5544_v56 = vadd.f32 %v4392_v35, %v2410_v54 }
 0x13e   : > { %v4428_v49 = vrot.slane %v4224_v8, %v7508_v31 }
 0x13f   : > { %5465 = vst [vmem:[%s7570_s17 + $0x80] sm:$0xff] %v6774_v50  ;;  %v6834_v58 = vpack.c.bf16 %v5542_v52, %v5541_v47  ;;  %5466 = vst [vmem:[%s7570_s17 + $0x88] sm:$0xff] %v6775_v55  ;;  %v6835_v61 = vpack.c.bf16 %v5544_v56, %v5543_v51  ;;  %v4436_v51 = vrot.slane %v4224_v8, %v7533_v44 }
 0x140   : > { %v4432_v52 = vrot.slane %v4224_v8, %v7536_v45  ;;  %v4440_v55 = vrot.slane %v4224_v8, %v7547_v53 }
 0x141   : > { %6706 = vst [vmem:[%s7570_s17 + $0x260] sm:$0xff] %v6834_v58  ;;  %v2447_v63 = vpop.f32.mrb[36].mxu0  ;;  %6707 = vst [vmem:[%s7570_s17 + $0x268] sm:$0xff] %v6835_v61  ;;  %v2490_v2 = vpop.f32.mrb[36].mxu1 }
 0x142   : > { %v4885_v1 = vadd.f32 %v4396_v57, %v2447_v63  ;;  %v2449_v3 = vpop.f32.mrb[37].mxu0  ;;  %v4887_v4 = vadd.f32 %v4404_v59, %v2490_v2  ;;  %v2492_v6 = vpop.f32.mrb[37].mxu1 }
 0x143   : > { %v4886_v5 = vadd.f32 %v4400_v60, %v2449_v3  ;;  %v2451_v7 = vpop.f32.mrb[38].mxu0  ;;  %v4888_v9 = vadd.f32 %v4408_v62, %v2492_v6  ;;  %v2494_v12 = vpop.f32.mrb[38].mxu1 }
 0x144   : > { %v5545_v10 = vadd.f32 %v4396_v57, %v2451_v7  ;;  %v2453_v13 = vpop.f32.mrb[39].mxu0  ;;  %v5547_v0 = vadd.f32 %v4404_v59, %v2494_v12  ;;  %v2496_v20 = vpop.f32.mrb[39].mxu1 }
 0x145   : > { %v6776_v14 = vpack.c.bf16 %v4886_v5, %v4885_v1  ;;  %v5546_v18 = vadd.f32 %v4400_v60, %v2453_v13  ;;  %v6777_v15 = vpack.c.bf16 %v4888_v9, %v4887_v4  ;;  %v5548_v21 = vadd.f32 %v4408_v62, %v2496_v20  ;;  %v4225_v1 = vld [vmem:[%s7461_s9 + $0x30] sm:$0xff] }
 0x146   : > { %v4444_v13 = vrot.slane %v4225_v1, %v7468_v11 }
 0x147   : > { %5467 = vst [vmem:[%s7570_s17 + $0x90] sm:$0xff] %v6776_v14  ;;  %v6836_v23 = vpack.c.bf16 %v5546_v18, %v5545_v10  ;;  %5468 = vst [vmem:[%s7570_s17 + $0x98] sm:$0xff] %v6777_v15  ;;  %v6837_v26 = vpack.c.bf16 %v5548_v21, %v5547_v0  ;;  %v4452_v0 = vrot.slane %v4225_v1, %v7476_v16 }
 0x148   : > { %v4448_v18 = vrot.slane %v4225_v1, %v7479_v17  ;;  %v4456_v15 = vrot.slane %v4225_v1, %v7482_v19 }
 0x149   : > { %6708 = vst [vmem:[%s7570_s17 + $0x270] sm:$0xff] %v6836_v23  ;;  %v2533_v29 = vpop.f32.mrb[40].mxu0  ;;  %6709 = vst [vmem:[%s7570_s17 + $0x278] sm:$0xff] %v6837_v26  ;;  %v2576_v30 = vpop.f32.mrb[40].mxu1 }
 0x14a   : > { %v4889_v27 = vadd.f32 %v4412_v22, %v2533_v29  ;;  %v2535_v32 = vpop.f32.mrb[41].mxu0  ;;  %v4891_v33 = vadd.f32 %v4420_v24, %v2576_v30  ;;  %v2578_v35 = vpop.f32.mrb[41].mxu1 }
 0x14b   : > { %v4890_v34 = vadd.f32 %v4416_v25, %v2535_v32  ;;  %v2537_v37 = vpop.f32.mrb[42].mxu0  ;;  %v4892_v38 = vadd.f32 %v4424_v28, %v2578_v35  ;;  %v2580_v36 = vpop.f32.mrb[42].mxu1 }
 0x14c   : > { %v5549_v39 = vadd.f32 %v4412_v22, %v2537_v37  ;;  %v2539_v40 = vpop.f32.mrb[43].mxu0  ;;  %v5551_v42 = vadd.f32 %v4420_v24, %v2580_v36  ;;  %v2582_v46 = vpop.f32.mrb[43].mxu1 }
 0x14d   : > { %v6778_v41 = vpack.c.bf16 %v4890_v34, %v4889_v27  ;;  %v5550_v43 = vadd.f32 %v4416_v25, %v2539_v40  ;;  %v6779_v47 = vpack.c.bf16 %v4892_v38, %v4891_v33  ;;  %v5552_v48 = vadd.f32 %v4424_v28, %v2582_v46 }
 0x14e   : > { %v4460_v40 = vrot.slane %v4225_v1, %v7508_v31 }
 0x14f   : > { %5469 = vst [vmem:[%s7570_s17 + $0xa0] sm:$0xff] %v6778_v41  ;;  %v6838_v50 = vpack.c.bf16 %v5550_v43, %v5549_v39  ;;  %5470 = vst [vmem:[%s7570_s17 + $0xa8] sm:$0xff] %v6779_v47  ;;  %v6839_v54 = vpack.c.bf16 %v5552_v48, %v5551_v42  ;;  %v4468_v42 = vrot.slane %v4225_v1, %v7533_v44 }
 0x150   : > { %v4464_v43 = vrot.slane %v4225_v1, %v7536_v45  ;;  %v4472_v47 = vrot.slane %v4225_v1, %v7547_v53 }
 0x151   : > { %6710 = vst [vmem:[%s7570_s17 + $0x280] sm:$0xff] %v6838_v50  ;;  %v2619_v56 = vpop.f32.mrb[44].mxu0  ;;  %6711 = vst [vmem:[%s7570_s17 + $0x288] sm:$0xff] %v6839_v54  ;;  %v2662_v58 = vpop.f32.mrb[44].mxu1 }
 0x152   : > { %v4893_v57 = vadd.f32 %v4428_v49, %v2619_v56  ;;  %v2621_v59 = vpop.f32.mrb[45].mxu0  ;;  %v4895_v60 = vadd.f32 %v4436_v51, %v2662_v58  ;;  %v2664_v62 = vpop.f32.mrb[45].mxu1 }
 0x153   : > { %v4894_v61 = vadd.f32 %v4432_v52, %v2621_v59  ;;  %v2623_v63 = vpop.f32.mrb[46].mxu0  ;;  %v4896_v2 = vadd.f32 %v4440_v55, %v2664_v62  ;;  %v2666_v4 = vpop.f32.mrb[46].mxu1 }
 0x154   : > { %v5553_v3 = vadd.f32 %v4428_v49, %v2623_v63  ;;  %v2625_v5 = vpop.f32.mrb[47].mxu0  ;;  %v5555_v7 = vadd.f32 %v4436_v51, %v2666_v4  ;;  %v2668_v9 = vpop.f32.mrb[47].mxu1 }
 0x155   : > { %v6780_v6 = vpack.c.bf16 %v4894_v61, %v4893_v57  ;;  %v5554_v8 = vadd.f32 %v4432_v52, %v2625_v5  ;;  %v6781_v10 = vpack.c.bf16 %v4896_v2, %v4895_v60  ;;  %v5556_v12 = vadd.f32 %v4440_v55, %v2668_v9  ;;  %v4226_v57 = vld [vmem:[%s7461_s9 + $0x38] sm:$0xff] }
 0x156   : > { %v4476_v5 = vrot.slane %v4226_v57, %v7468_v11 }
 0x157   : > { %5471 = vst [vmem:[%s7570_s17 + $0xb0] sm:$0xff] %v6780_v6  ;;  %v6840_v14 = vpack.c.bf16 %v5554_v8, %v5553_v3  ;;  %5472 = vst [vmem:[%s7570_s17 + $0xb8] sm:$0xff] %v6781_v10  ;;  %v6841_v20 = vpack.c.bf16 %v5556_v12, %v5555_v7  ;;  %v4484_v7 = vrot.slane %v4226_v57, %v7476_v16 }
 0x158   : > { %v4480_v8 = vrot.slane %v4226_v57, %v7479_v17  ;;  %v4488_v10 = vrot.slane %v4226_v57, %v7482_v19 }
 0x159   : > { %6712 = vst [vmem:[%s7570_s17 + $0x290] sm:$0xff] %v6840_v14  ;;  %v2705_v21 = vpop.f32.mrb[48].mxu0  ;;  %6713 = vst [vmem:[%s7570_s17 + $0x298] sm:$0xff] %v6841_v20  ;;  %v2748_v23 = vpop.f32.mrb[48].mxu1 }
 0x15a   : > { %v4897_v22 = vadd.f32 %v4444_v13, %v2705_v21  ;;  %v2707_v24 = vpop.f32.mrb[49].mxu0  ;;  %v4899_v25 = vadd.f32 %v4452_v0, %v2748_v23  ;;  %v2750_v28 = vpop.f32.mrb[49].mxu1 }
 0x15b   : > { %v4898_v26 = vadd.f32 %v4448_v18, %v2707_v24  ;;  %v2709_v29 = vpop.f32.mrb[50].mxu0  ;;  %v4900_v27 = vadd.f32 %v4456_v15, %v2750_v28  ;;  %v2752_v32 = vpop.f32.mrb[50].mxu1 }
 0x15c   : > { %v5557_v30 = vadd.f32 %v4444_v13, %v2709_v29  ;;  %v2711_v33 = vpop.f32.mrb[51].mxu0  ;;  %v5559_v35 = vadd.f32 %v4452_v0, %v2752_v32  ;;  %v2754_v38 = vpop.f32.mrb[51].mxu1 }
 0x15d   : > { %v6782_v34 = vpack.c.bf16 %v4898_v26, %v4897_v22  ;;  %v5558_v37 = vadd.f32 %v4448_v18, %v2711_v33  ;;  %v6783_v39 = vpack.c.bf16 %v4900_v27, %v4899_v25  ;;  %v5560_v36 = vadd.f32 %v4456_v15, %v2754_v38 }
 0x15e   : > { %v4492_v33 = vrot.slane %v4226_v57, %v7508_v31 }
 0x15f   : > { %5473 = vst [vmem:[%s7570_s17 + $0xc0] sm:$0xff] %v6782_v34  ;;  %v6842_v41 = vpack.c.bf16 %v5558_v37, %v5557_v30  ;;  %5474 = vst [vmem:[%s7570_s17 + $0xc8] sm:$0xff] %v6783_v39  ;;  %v6843_v46 = vpack.c.bf16 %v5560_v36, %v5559_v35  ;;  %v4500_v35 = vrot.slane %v4226_v57, %v7533_v44 }
 0x160   : > { %v4496_v37 = vrot.slane %v4226_v57, %v7536_v45  ;;  %v4504_v39 = vrot.slane %v4226_v57, %v7547_v53 }
 0x161   : > { %6714 = vst [vmem:[%s7570_s17 + $0x2a0] sm:$0xff] %v6842_v41  ;;  %v2791_v48 = vpop.f32.mrb[52].mxu0  ;;  %6715 = vst [vmem:[%s7570_s17 + $0x2a8] sm:$0xff] %v6843_v46  ;;  %v2834_v50 = vpop.f32.mrb[52].mxu1 }
 0x162   : > { %v4901_v49 = vadd.f32 %v4460_v40, %v2791_v48  ;;  %v2793_v51 = vpop.f32.mrb[53].mxu0  ;;  %v4903_v52 = vadd.f32 %v4468_v42, %v2834_v50  ;;  %v2836_v55 = vpop.f32.mrb[53].mxu1 }
 0x163   : > { %v4902_v54 = vadd.f32 %v4464_v43, %v2793_v51  ;;  %v2795_v56 = vpop.f32.mrb[54].mxu0  ;;  %v4904_v58 = vadd.f32 %v4472_v47, %v2836_v55  ;;  %v2838_v60 = vpop.f32.mrb[54].mxu1 }
 0x164   : > { %v5561_v59 = vadd.f32 %v4460_v40, %v2795_v56  ;;  %v2797_v61 = vpop.f32.mrb[55].mxu0  ;;  %v5563_v63 = vadd.f32 %v4468_v42, %v2838_v60  ;;  %v2840_v2 = vpop.f32.mrb[55].mxu1 }
 0x165   : > { %v6784_v62 = vpack.c.bf16 %v4902_v54, %v4901_v49  ;;  %v5562_v1 = vadd.f32 %v4464_v43, %v2797_v61  ;;  %v6785_v3 = vpack.c.bf16 %v4904_v58, %v4903_v52  ;;  %v5564_v4 = vadd.f32 %v4472_v47, %v2840_v2  ;;  %v4227_v49 = vld [vmem:[%s7461_s9 + $0x40] sm:$0xff] }
 0x166   : > { %v4508_v61 = vrot.slane %v4227_v49, %v7468_v11 }
 0x167   : > { %5475 = vst [vmem:[%s7570_s17 + $0xd0] sm:$0xff] %v6784_v62  ;;  %v6844_v6 = vpack.c.bf16 %v5562_v1, %v5561_v59  ;;  %5476 = vst [vmem:[%s7570_s17 + $0xd8] sm:$0xff] %v6785_v3  ;;  %v6845_v9 = vpack.c.bf16 %v5564_v4, %v5563_v63  ;;  %v4516_v63 = vrot.slane %v4227_v49, %v7476_v16 }
 0x168   : > { %v4512_v1 = vrot.slane %v4227_v49, %v7479_v17  ;;  %v4520_v3 = vrot.slane %v4227_v49, %v7482_v19 }
 0x169   : > { %6716 = vst [vmem:[%s7570_s17 + $0x2b0] sm:$0xff] %v6844_v6  ;;  %v2877_v12 = vpop.f32.mrb[56].mxu0  ;;  %6717 = vst [vmem:[%s7570_s17 + $0x2b8] sm:$0xff] %v6845_v9  ;;  %v2920_v14 = vpop.f32.mrb[56].mxu1 }
 0x16a   : > { %v4905_v13 = vadd.f32 %v4476_v5, %v2877_v12  ;;  %v2879_v0 = vpop.f32.mrb[57].mxu0  ;;  %v4907_v18 = vadd.f32 %v4484_v7, %v2920_v14  ;;  %v2922_v15 = vpop.f32.mrb[57].mxu1 }
 0x16b   : > { %v4906_v20 = vadd.f32 %v4480_v8, %v2879_v0  ;;  %v2881_v21 = vpop.f32.mrb[58].mxu0  ;;  %v4908_v22 = vadd.f32 %v4488_v10, %v2922_v15  ;;  %v2924_v24 = vpop.f32.mrb[58].mxu1 }
 0x16c   : > { %v5565_v23 = vadd.f32 %v4476_v5, %v2881_v21  ;;  %v2883_v25 = vpop.f32.mrb[59].mxu0  ;;  %v5567_v28 = vadd.f32 %v4484_v7, %v2924_v24  ;;  %v2926_v27 = vpop.f32.mrb[59].mxu1 }
 0x16d   : > { %v6786_v26 = vpack.c.bf16 %v4906_v20, %v4905_v13  ;;  %v5566_v29 = vadd.f32 %v4480_v8, %v2883_v25  ;;  %v6787_v30 = vpack.c.bf16 %v4908_v22, %v4907_v18  ;;  %v5568_v32 = vadd.f32 %v4488_v10, %v2926_v27 }
 0x16e   : > { %v4524_v25 = vrot.slane %v4227_v49, %v7508_v31 }
 0x16f   : > { %5477 = vst [vmem:[%s7570_s17 + $0xe0] sm:$0xff] %v6786_v26  ;;  %v6846_v34 = vpack.c.bf16 %v5566_v29, %v5565_v23  ;;  %5478 = vst [vmem:[%s7570_s17 + $0xe8] sm:$0xff] %v6787_v30  ;;  %v6847_v38 = vpack.c.bf16 %v5568_v32, %v5567_v28  ;;  %v4532_v28 = vrot.slane %v4227_v49, %v7533_v44 }
 0x170   : > { %v4528_v29 = vrot.slane %v4227_v49, %v7536_v45  ;;  %v4536_v30 = vrot.slane %v4227_v49, %v7547_v53 }
 0x171   : > { %6718 = vst [vmem:[%s7570_s17 + $0x2c0] sm:$0xff] %v6846_v34  ;;  %v2963_v36 = vpop.f32.mrb[60].mxu0  ;;  %6719 = vst [vmem:[%s7570_s17 + $0x2c8] sm:$0xff] %v6847_v38  ;;  %v3006_v41 = vpop.f32.mrb[60].mxu1 }
 0x172   : > { %v4909_v40 = vadd.f32 %v4492_v33, %v2963_v36  ;;  %v2965_v42 = vpop.f32.mrb[61].mxu0  ;;  %v4911_v43 = vadd.f32 %v4500_v35, %v3006_v41  ;;  %v3008_v47 = vpop.f32.mrb[61].mxu1 }
 0x173   : > { %v4910_v46 = vadd.f32 %v4496_v37, %v2965_v42  ;;  %v2967_v48 = vpop.f32.mrb[62].mxu0  ;;  %v4912_v50 = vadd.f32 %v4504_v39, %v3008_v47  ;;  %v3010_v52 = vpop.f32.mrb[62].mxu1 }
 0x174   : > { %v5569_v51 = vadd.f32 %v4492_v33, %v2967_v48  ;;  %v2969_v54 = vpop.f32.mrb[63].mxu0  ;;  %v5571_v56 = vadd.f32 %v4500_v35, %v3010_v52  ;;  %v3012_v58 = vpop.f32.mrb[63].mxu1 }
 0x175   : > { %v6788_v55 = vpack.c.bf16 %v4910_v46, %v4909_v40  ;;  %v5570_v57 = vadd.f32 %v4496_v37, %v2969_v54  ;;  %v6789_v59 = vpack.c.bf16 %v4912_v50, %v4911_v43  ;;  %v5572_v60 = vadd.f32 %v4504_v39, %v3012_v58  ;;  %v4228_v40 = vld [vmem:[%s7461_s9 + $0x48] sm:$0xff] }
 0x176   : > { %v4540_v54 = vrot.slane %v4228_v40, %v7468_v11 }
 0x177   : > { %5479 = vst [vmem:[%s7570_s17 + $0xf0] sm:$0xff] %v6788_v55  ;;  %v6848_v62 = vpack.c.bf16 %v5570_v57, %v5569_v51  ;;  %5480 = vst [vmem:[%s7570_s17 + $0xf8] sm:$0xff] %v6789_v59  ;;  %v6849_v2 = vpack.c.bf16 %v5572_v60, %v5571_v56  ;;  %v4548_v56 = vrot.slane %v4228_v40, %v7476_v16 }
 0x178   : > { %v4544_v57 = vrot.slane %v4228_v40, %v7479_v17  ;;  %v4552_v59 = vrot.slane %v4228_v40, %v7482_v19 }
 0x179   : > { %6720 = vst [vmem:[%s7570_s17 + $0x2d0] sm:$0xff] %v6848_v62  ;;  %v3049_v4 = vpop.f32.mrb[64].mxu0  ;;  %6721 = vst [vmem:[%s7570_s17 + $0x2d8] sm:$0xff] %v6849_v2  ;;  %v3092_v6 = vpop.f32.mrb[64].mxu1 }
 0x17a   : > { %v4913_v5 = vadd.f32 %v4508_v61, %v3049_v4  ;;  %v3051_v7 = vpop.f32.mrb[65].mxu0  ;;  %v4915_v8 = vadd.f32 %v4516_v63, %v3092_v6  ;;  %v3094_v10 = vpop.f32.mrb[65].mxu1 }
 0x17b   : > { %v4914_v9 = vadd.f32 %v4512_v1, %v3051_v7  ;;  %v3053_v12 = vpop.f32.mrb[66].mxu0  ;;  %v4916_v13 = vadd.f32 %v4520_v3, %v3094_v10  ;;  %v3096_v0 = vpop.f32.mrb[66].mxu1 }
 0x17c   : > { %v5573_v14 = vadd.f32 %v4508_v61, %v3053_v12  ;;  %v3055_v18 = vpop.f32.mrb[67].mxu0  ;;  %v5575_v15 = vadd.f32 %v4516_v63, %v3096_v0  ;;  %v3098_v22 = vpop.f32.mrb[67].mxu1 }
 0x17d   : > { %v6790_v20 = vpack.c.bf16 %v4914_v9, %v4913_v5  ;;  %v5574_v21 = vadd.f32 %v4512_v1, %v3055_v18  ;;  %v6791_v23 = vpack.c.bf16 %v4916_v13, %v4915_v8  ;;  %v5576_v24 = vadd.f32 %v4520_v3, %v3098_v22 }
 0x17e   : > { %v4556_v18 = vrot.slane %v4228_v40, %v7508_v31 }
 0x17f   : > { %5481 = vst [vmem:[%s7570_s17 + $0x100] sm:$0xff] %v6790_v20  ;;  %v6850_v26 = vpack.c.bf16 %v5574_v21, %v5573_v14  ;;  %5482 = vst [vmem:[%s7570_s17 + $0x108] sm:$0xff] %v6791_v23  ;;  %v6851_v27 = vpack.c.bf16 %v5576_v24, %v5575_v15  ;;  %v4564_v15 = vrot.slane %v4228_v40, %v7533_v44 }
 0x180   : > { %v4560_v21 = vrot.slane %v4228_v40, %v7536_v45  ;;  %v4568_v23 = vrot.slane %v4228_v40, %v7547_v53 }
 0x181   : > { %6722 = vst [vmem:[%s7570_s17 + $0x2e0] sm:$0xff] %v6850_v26  ;;  %v3135_v32 = vpop.f32.mrb[68].mxu0  ;;  %6723 = vst [vmem:[%s7570_s17 + $0x2e8] sm:$0xff] %v6851_v27  ;;  %v3178_v34 = vpop.f32.mrb[68].mxu1 }
 0x182   : > { %v4917_v33 = vadd.f32 %v4524_v25, %v3135_v32  ;;  %v3137_v35 = vpop.f32.mrb[69].mxu0  ;;  %v4919_v37 = vadd.f32 %v4532_v28, %v3178_v34  ;;  %v3180_v39 = vpop.f32.mrb[69].mxu1 }
 0x183   : > { %v4918_v38 = vadd.f32 %v4528_v29, %v3137_v35  ;;  %v3139_v36 = vpop.f32.mrb[70].mxu0  ;;  %v4920_v41 = vadd.f32 %v4536_v30, %v3180_v39  ;;  %v3182_v43 = vpop.f32.mrb[70].mxu1 }
 0x184   : > { %v5577_v42 = vadd.f32 %v4524_v25, %v3139_v36  ;;  %v3141_v46 = vpop.f32.mrb[71].mxu0  ;;  %v5579_v48 = vadd.f32 %v4532_v28, %v3182_v43  ;;  %v3184_v50 = vpop.f32.mrb[71].mxu1 }
 0x185   : > { %v6792_v47 = vpack.c.bf16 %v4918_v38, %v4917_v33  ;;  %v5578_v49 = vadd.f32 %v4528_v29, %v3141_v46  ;;  %v6793_v51 = vpack.c.bf16 %v4920_v41, %v4919_v37  ;;  %v5580_v52 = vadd.f32 %v4536_v30, %v3184_v50  ;;  %v4229_v33 = vld [vmem:[%s7461_s9 + $0x50] sm:$0xff] }
 0x186   : > { %v4572_v46 = vrot.slane %v4229_v33, %v7468_v11 }
 0x187   : > { %5483 = vst [vmem:[%s7570_s17 + $0x110] sm:$0xff] %v6792_v47  ;;  %v6852_v55 = vpack.c.bf16 %v5578_v49, %v5577_v42  ;;  %5484 = vst [vmem:[%s7570_s17 + $0x118] sm:$0xff] %v6793_v51  ;;  %v6853_v58 = vpack.c.bf16 %v5580_v52, %v5579_v48  ;;  %v4580_v48 = vrot.slane %v4229_v33, %v7476_v16 }
 0x188   : > { %v4576_v49 = vrot.slane %v4229_v33, %v7479_v17  ;;  %v4584_v51 = vrot.slane %v4229_v33, %v7482_v19 }
 0x189   : > { %6724 = vst [vmem:[%s7570_s17 + $0x2f0] sm:$0xff] %v6852_v55  ;;  %v3221_v60 = vpop.f32.mrb[72].mxu0  ;;  %6725 = vst [vmem:[%s7570_s17 + $0x2f8] sm:$0xff] %v6853_v58  ;;  %v3264_v62 = vpop.f32.mrb[72].mxu1 }
 0x18a   : > { %v4921_v61 = vadd.f32 %v4540_v54, %v3221_v60  ;;  %v3223_v63 = vpop.f32.mrb[73].mxu0  ;;  %v4923_v1 = vadd.f32 %v4548_v56, %v3264_v62  ;;  %v3266_v3 = vpop.f32.mrb[73].mxu1 }
 0x18b   : > { %v4922_v2 = vadd.f32 %v4544_v57, %v3223_v63  ;;  %v3225_v4 = vpop.f32.mrb[74].mxu0  ;;  %v4924_v5 = vadd.f32 %v4552_v59, %v3266_v3  ;;  %v3268_v7 = vpop.f32.mrb[74].mxu1 }
 0x18c   : > { %v5581_v6 = vadd.f32 %v4540_v54, %v3225_v4  ;;  %v3227_v8 = vpop.f32.mrb[75].mxu0  ;;  %v5583_v10 = vadd.f32 %v4548_v56, %v3268_v7  ;;  %v3270_v13 = vpop.f32.mrb[75].mxu1 }
 0x18d   : > { %v6794_v9 = vpack.c.bf16 %v4922_v2, %v4921_v61  ;;  %v5582_v12 = vadd.f32 %v4544_v57, %v3227_v8  ;;  %v6795_v14 = vpack.c.bf16 %v4924_v5, %v4923_v1  ;;  %v5584_v0 = vadd.f32 %v4552_v59, %v3270_v13 }
 0x18e   : > { %v4588_v8 = vrot.slane %v4229_v33, %v7508_v31 }
 0x18f   : > { %5485 = vst [vmem:[%s7570_s17 + $0x120] sm:$0xff] %v6794_v9  ;;  %v6854_v20 = vpack.c.bf16 %v5582_v12, %v5581_v6  ;;  %5486 = vst [vmem:[%s7570_s17 + $0x128] sm:$0xff] %v6795_v14  ;;  %v6855_v22 = vpack.c.bf16 %v5584_v0, %v5583_v10  ;;  %v4596_v10 = vrot.slane %v4229_v33, %v7533_v44 }
 0x190   : > { %v4592_v12 = vrot.slane %v4229_v33, %v7536_v45  ;;  %v4600_v14 = vrot.slane %v4229_v33, %v7547_v53 }
 0x191   : > { %6726 = vst [vmem:[%s7570_s17 + $0x300] sm:$0xff] %v6854_v20  ;;  %v3307_v24 = vpop.f32.mrb[76].mxu0  ;;  %6727 = vst [vmem:[%s7570_s17 + $0x308] sm:$0xff] %v6855_v22  ;;  %v3350_v26 = vpop.f32.mrb[76].mxu1 }
 0x192   : > { %v4925_v25 = vadd.f32 %v4556_v18, %v3307_v24  ;;  %v3309_v28 = vpop.f32.mrb[77].mxu0  ;;  %v4927_v29 = vadd.f32 %v4564_v15, %v3350_v26  ;;  %v3352_v30 = vpop.f32.mrb[77].mxu1 }
 0x193   : > { %v4926_v27 = vadd.f32 %v4560_v21, %v3309_v28  ;;  %v3311_v32 = vpop.f32.mrb[78].mxu0  ;;  %v4928_v34 = vadd.f32 %v4568_v23, %v3352_v30  ;;  %v3354_v37 = vpop.f32.mrb[78].mxu1 }
 0x194   : > { %v5585_v35 = vadd.f32 %v4556_v18, %v3311_v32  ;;  %v3313_v38 = vpop.f32.mrb[79].mxu0  ;;  %v5587_v36 = vadd.f32 %v4564_v15, %v3354_v37  ;;  %v3356_v41 = vpop.f32.mrb[79].mxu1 }
 0x195   : > { %v6796_v39 = vpack.c.bf16 %v4926_v27, %v4925_v25  ;;  %v5586_v40 = vadd.f32 %v4560_v21, %v3313_v38  ;;  %v6797_v42 = vpack.c.bf16 %v4928_v34, %v4927_v29  ;;  %v5588_v43 = vadd.f32 %v4568_v23, %v3356_v41  ;;  %v4230_v25 = vld [vmem:[%s7461_s9 + $0x58] sm:$0xff] }
 0x196   : > { %v4604_v38 = vrot.slane %v4230_v25, %v7468_v11 }
 0x197   : > { %5487 = vst [vmem:[%s7570_s17 + $0x130] sm:$0xff] %v6796_v39  ;;  %v6856_v47 = vpack.c.bf16 %v5586_v40, %v5585_v35  ;;  %5488 = vst [vmem:[%s7570_s17 + $0x138] sm:$0xff] %v6797_v42  ;;  %v6857_v50 = vpack.c.bf16 %v5588_v43, %v5587_v36  ;;  %v4612_v36 = vrot.slane %v4230_v25, %v7476_v16 }
 0x198   : > { %v4608_v40 = vrot.slane %v4230_v25, %v7479_v17  ;;  %v4616_v42 = vrot.slane %v4230_v25, %v7482_v19 }
 0x199   : > { %6728 = vst [vmem:[%s7570_s17 + $0x310] sm:$0xff] %v6856_v47  ;;  %v3393_v52 = vpop.f32.mrb[80].mxu0  ;;  %6729 = vst [vmem:[%s7570_s17 + $0x318] sm:$0xff] %v6857_v50  ;;  %v3436_v55 = vpop.f32.mrb[80].mxu1 }
 0x19a   : > { %v4929_v54 = vadd.f32 %v4572_v46, %v3393_v52  ;;  %v3395_v56 = vpop.f32.mrb[81].mxu0  ;;  %v4931_v57 = vadd.f32 %v4580_v48, %v3436_v55  ;;  %v3438_v59 = vpop.f32.mrb[81].mxu1 }
 0x19b   : > { %v4930_v58 = vadd.f32 %v4576_v49, %v3395_v56  ;;  %v3397_v60 = vpop.f32.mrb[82].mxu0  ;;  %v4932_v61 = vadd.f32 %v4584_v51, %v3438_v59  ;;  %v3440_v63 = vpop.f32.mrb[82].mxu1 }
 0x19c   : > { %v5589_v62 = vadd.f32 %v4572_v46, %v3397_v60  ;;  %v3399_v1 = vpop.f32.mrb[83].mxu0  ;;  %v5591_v3 = vadd.f32 %v4580_v48, %v3440_v63  ;;  %v3442_v5 = vpop.f32.mrb[83].mxu1 }
 0x19d   : > { %v6798_v2 = vpack.c.bf16 %v4930_v58, %v4929_v54  ;;  %v5590_v4 = vadd.f32 %v4576_v49, %v3399_v1  ;;  %v6799_v6 = vpack.c.bf16 %v4932_v61, %v4931_v57  ;;  %v5592_v7 = vadd.f32 %v4584_v51, %v3442_v5 }
 0x19e   : > { %v4620_v1 = vrot.slane %v4230_v25, %v7508_v31 }
 0x19f   : > { %5489 = vst [vmem:[%s7570_s17 + $0x140] sm:$0xff] %v6798_v2  ;;  %v6858_v9 = vpack.c.bf16 %v5590_v4, %v5589_v62  ;;  %5490 = vst [vmem:[%s7570_s17 + $0x148] sm:$0xff] %v6799_v6  ;;  %v6859_v13 = vpack.c.bf16 %v5592_v7, %v5591_v3  ;;  %v4628_v3 = vrot.slane %v4230_v25, %v7533_v44 }
 0x1a0   : > { %v4624_v4 = vrot.slane %v4230_v25, %v7536_v45  ;;  %v4632_v6 = vrot.slane %v4230_v25, %v7547_v53 }
 0x1a1   : > { %6730 = vst [vmem:[%s7570_s17 + $0x320] sm:$0xff] %v6858_v9  ;;  %v3479_v0 = vpop.f32.mrb[84].mxu0  ;;  %6731 = vst [vmem:[%s7570_s17 + $0x328] sm:$0xff] %v6859_v13  ;;  %v3522_v20 = vpop.f32.mrb[84].mxu1 }
 0x1a2   : > { %v4933_v18 = vadd.f32 %v4588_v8, %v3479_v0  ;;  %v3481_v15 = vpop.f32.mrb[85].mxu0  ;;  %v4935_v21 = vadd.f32 %v4596_v10, %v3522_v20  ;;  %v3524_v23 = vpop.f32.mrb[85].mxu1 }
 0x1a3   : > { %v4934_v22 = vadd.f32 %v4592_v12, %v3481_v15  ;;  %v3483_v24 = vpop.f32.mrb[86].mxu0  ;;  %v4936_v26 = vadd.f32 %v4600_v14, %v3524_v23  ;;  %v3526_v29 = vpop.f32.mrb[86].mxu1 }
 0x1a4   : > { %v5593_v28 = vadd.f32 %v4588_v8, %v3483_v24  ;;  %v3485_v27 = vpop.f32.mrb[87].mxu0  ;;  %v5595_v32 = vadd.f32 %v4596_v10, %v3526_v29  ;;  %v3528_v34 = vpop.f32.mrb[87].mxu1 }
 0x1a5   : > { %v6800_v30 = vpack.c.bf16 %v4934_v22, %v4933_v18  ;;  %v5594_v33 = vadd.f32 %v4592_v12, %v3485_v27  ;;  %v6801_v35 = vpack.c.bf16 %v4936_v26, %v4935_v21  ;;  %v5596_v37 = vadd.f32 %v4600_v14, %v3528_v34  ;;  %v4231_v18 = vld [vmem:[%s7461_s9 + $0x60] sm:$0xff] }
 0x1a6   : > { %v4636_v27 = vrot.slane %v4231_v18, %v7468_v11 }
 0x1a7   : > { %5491 = vst [vmem:[%s7570_s17 + $0x150] sm:$0xff] %v6800_v30  ;;  %v6860_v39 = vpack.c.bf16 %v5594_v33, %v5593_v28  ;;  %5492 = vst [vmem:[%s7570_s17 + $0x158] sm:$0xff] %v6801_v35  ;;  %v6861_v41 = vpack.c.bf16 %v5596_v37, %v5595_v32  ;;  %v4644_v32 = vrot.slane %v4231_v18, %v7476_v16 }
 0x1a8   : > { %v4640_v33 = vrot.slane %v4231_v18, %v7479_v17  ;;  %v4648_v35 = vrot.slane %v4231_v18, %v7482_v19 }
 0x1a9   : > { %6732 = vst [vmem:[%s7570_s17 + $0x330] sm:$0xff] %v6860_v39  ;;  %v3565_v43 = vpop.f32.mrb[88].mxu0  ;;  %6733 = vst [vmem:[%s7570_s17 + $0x338] sm:$0xff] %v6861_v41  ;;  %v3608_v47 = vpop.f32.mrb[88].mxu1 }
 0x1aa   : > { %v4937_v46 = vadd.f32 %v4604_v38, %v3565_v43  ;;  %v3567_v48 = vpop.f32.mrb[89].mxu0  ;;  %v4939_v49 = vadd.f32 %v4612_v36, %v3608_v47  ;;  %v3610_v51 = vpop.f32.mrb[89].mxu1 }
 0x1ab   : > { %v4938_v50 = vadd.f32 %v4608_v40, %v3567_v48  ;;  %v3569_v52 = vpop.f32.mrb[90].mxu0  ;;  %v4940_v54 = vadd.f32 %v4616_v42, %v3610_v51  ;;  %v3612_v56 = vpop.f32.mrb[90].mxu1 }
 0x1ac   : > { %v5597_v55 = vadd.f32 %v4604_v38, %v3569_v52  ;;  %v3571_v57 = vpop.f32.mrb[91].mxu0  ;;  %v5599_v59 = vadd.f32 %v4612_v36, %v3612_v56  ;;  %v3614_v61 = vpop.f32.mrb[91].mxu1 }
 0x1ad   : > { %v6802_v58 = vpack.c.bf16 %v4938_v50, %v4937_v46  ;;  %v5598_v60 = vadd.f32 %v4608_v40, %v3571_v57  ;;  %v6803_v62 = vpack.c.bf16 %v4940_v54, %v4939_v49  ;;  %v5600_v63 = vadd.f32 %v4616_v42, %v3614_v61 }
 0x1ae   : > { %v4652_v57 = vrot.slane %v4231_v18, %v7508_v31 }
 0x1af   : > { %5493 = vst [vmem:[%s7570_s17 + $0x160] sm:$0xff] %v6802_v58  ;;  %v6862_v2 = vpack.c.bf16 %v5598_v60, %v5597_v55  ;;  %5494 = vst [vmem:[%s7570_s17 + $0x168] sm:$0xff] %v6803_v62  ;;  %v6863_v5 = vpack.c.bf16 %v5600_v63, %v5599_v59  ;;  %v4660_v59 = vrot.slane %v4231_v18, %v7533_v44 }
 0x1b0   : > { %v4656_v60 = vrot.slane %v4231_v18, %v7536_v45  ;;  %v4664_v62 = vrot.slane %v4231_v18, %v7547_v53 }
 0x1b1   : > { %6734 = vst [vmem:[%s7570_s17 + $0x340] sm:$0xff] %v6862_v2  ;;  %v3651_v7 = vpop.f32.mrb[92].mxu0  ;;  %6735 = vst [vmem:[%s7570_s17 + $0x348] sm:$0xff] %v6863_v5  ;;  %v3694_v9 = vpop.f32.mrb[92].mxu1 }
 0x1b2   : > { %v4941_v8 = vadd.f32 %v4620_v1, %v3651_v7  ;;  %v3653_v10 = vpop.f32.mrb[93].mxu0  ;;  %v4943_v12 = vadd.f32 %v4628_v3, %v3694_v9  ;;  %v3696_v14 = vpop.f32.mrb[93].mxu1 }
 0x1b3   : > { %v4942_v13 = vadd.f32 %v4624_v4, %v3653_v10  ;;  %v3655_v0 = vpop.f32.mrb[94].mxu0  ;;  %v4944_v20 = vadd.f32 %v4632_v6, %v3696_v14  ;;  %v3698_v21 = vpop.f32.mrb[94].mxu1 }
 0x1b4   : > { %v5601_v15 = vadd.f32 %v4620_v1, %v3655_v0  ;;  %v3657_v22 = vpop.f32.mrb[95].mxu0  ;;  %v5603_v24 = vadd.f32 %v4628_v3, %v3698_v21  ;;  %v3700_v26 = vpop.f32.mrb[95].mxu1 }
 0x1b5   : > { %v6804_v23 = vpack.c.bf16 %v4942_v13, %v4941_v8  ;;  %v5602_v25 = vadd.f32 %v4624_v4, %v3657_v22  ;;  %v6805_v28 = vpack.c.bf16 %v4944_v20, %v4943_v12  ;;  %v5604_v29 = vadd.f32 %v4632_v6, %v3700_v26  ;;  %v4232_v8 = vld [vmem:[%s7461_s9 + $0x68] sm:$0xff] }
 0x1b6   : > { %v4668_v22 = vrot.slane %v4232_v8, %v7468_v11 }
 0x1b7   : > { %5495 = vst [vmem:[%s7570_s17 + $0x170] sm:$0xff] %v6804_v23  ;;  %v6864_v30 = vpack.c.bf16 %v5602_v25, %v5601_v15  ;;  %5496 = vst [vmem:[%s7570_s17 + $0x178] sm:$0xff] %v6805_v28  ;;  %v6865_v34 = vpack.c.bf16 %v5604_v29, %v5603_v24  ;;  %v4676_v24 = vrot.slane %v4232_v8, %v7476_v16 }
 0x1b8   : > { %v4672_v25 = vrot.slane %v4232_v8, %v7479_v17  ;;  %v4680_v28 = vrot.slane %v4232_v8, %v7482_v19 }
 0x1b9   : > { %6736 = vst [vmem:[%s7570_s17 + $0x350] sm:$0xff] %v6864_v30  ;;  %v3737_v37 = vpop.f32.mrb[96].mxu0  ;;  %6737 = vst [vmem:[%s7570_s17 + $0x358] sm:$0xff] %v6865_v34  ;;  %v3780_v39 = vpop.f32.mrb[96].mxu1 }
 0x1ba   : > { %v4945_v38 = vadd.f32 %v4636_v27, %v3737_v37  ;;  %v3739_v36 = vpop.f32.mrb[97].mxu0  ;;  %v4947_v40 = vadd.f32 %v4644_v32, %v3780_v39  ;;  %v3782_v42 = vpop.f32.mrb[97].mxu1 }
 0x1bb   : > { %v4946_v41 = vadd.f32 %v4640_v33, %v3739_v36  ;;  %v3741_v43 = vpop.f32.mrb[98].mxu0  ;;  %v4948_v46 = vadd.f32 %v4648_v35, %v3782_v42  ;;  %v3784_v48 = vpop.f32.mrb[98].mxu1 }
 0x1bc   : > { %v5605_v47 = vadd.f32 %v4636_v27, %v3741_v43  ;;  %v3743_v49 = vpop.f32.mrb[99].mxu0  ;;  %v5607_v51 = vadd.f32 %v4644_v32, %v3784_v48  ;;  %v3786_v54 = vpop.f32.mrb[99].mxu1 }
 0x1bd   : > { %v6806_v50 = vpack.c.bf16 %v4946_v41, %v4945_v38  ;;  %v5606_v52 = vadd.f32 %v4640_v33, %v3743_v49  ;;  %v6807_v55 = vpack.c.bf16 %v4948_v46, %v4947_v40  ;;  %v5608_v56 = vadd.f32 %v4648_v35, %v3786_v54 }
 0x1be   : > { %v4684_v49 = vrot.slane %v4232_v8, %v7508_v31 }
 0x1bf   : > { %5497 = vst [vmem:[%s7570_s17 + $0x180] sm:$0xff] %v6806_v50  ;;  %v6866_v58 = vpack.c.bf16 %v5606_v52, %v5605_v47  ;;  %5498 = vst [vmem:[%s7570_s17 + $0x188] sm:$0xff] %v6807_v55  ;;  %v6867_v61 = vpack.c.bf16 %v5608_v56, %v5607_v51  ;;  %v4692_v51 = vrot.slane %v4232_v8, %v7533_v44 }
 0x1c0   : > { %v4688_v52 = vrot.slane %v4232_v8, %v7536_v45  ;;  %v4696_v55 = vrot.slane %v4232_v8, %v7547_v53 }
 0x1c1   : > { %6738 = vst [vmem:[%s7570_s17 + $0x360] sm:$0xff] %v6866_v58  ;;  %v3823_v63 = vpop.f32.mrb[100].mxu0  ;;  %6739 = vst [vmem:[%s7570_s17 + $0x368] sm:$0xff] %v6867_v61  ;;  %v3866_v2 = vpop.f32.mrb[100].mxu1 }
 0x1c2   : > { %v4949_v1 = vadd.f32 %v4652_v57, %v3823_v63  ;;  %v3825_v3 = vpop.f32.mrb[101].mxu0  ;;  %v4951_v4 = vadd.f32 %v4660_v59, %v3866_v2  ;;  %v3868_v6 = vpop.f32.mrb[101].mxu1 }
 0x1c3   : > { %v4950_v5 = vadd.f32 %v4656_v60, %v3825_v3  ;;  %v3827_v7 = vpop.f32.mrb[102].mxu0  ;;  %v4952_v9 = vadd.f32 %v4664_v62, %v3868_v6  ;;  %v3870_v12 = vpop.f32.mrb[102].mxu1 }
 0x1c4   : > { %v5609_v10 = vadd.f32 %v4652_v57, %v3827_v7  ;;  %v3829_v13 = vpop.f32.mrb[103].mxu0  ;;  %v5611_v0 = vadd.f32 %v4660_v59, %v3870_v12  ;;  %v3872_v20 = vpop.f32.mrb[103].mxu1 }
 0x1c5   : > { %v6808_v14 = vpack.c.bf16 %v4950_v5, %v4949_v1  ;;  %v5610_v18 = vadd.f32 %v4656_v60, %v3829_v13  ;;  %v6809_v15 = vpack.c.bf16 %v4952_v9, %v4951_v4  ;;  %v5612_v21 = vadd.f32 %v4664_v62, %v3872_v20  ;;  %v4233_v1 = vld [vmem:[%s7461_s9 + $0x70] sm:$0xff] }
 0x1c6   : > { %v4700_v13 = vrot.slane %v4233_v1, %v7468_v11 }
 0x1c7   : > { %5499 = vst [vmem:[%s7570_s17 + $0x190] sm:$0xff] %v6808_v14  ;;  %v6868_v23 = vpack.c.bf16 %v5610_v18, %v5609_v10  ;;  %5500 = vst [vmem:[%s7570_s17 + $0x198] sm:$0xff] %v6809_v15  ;;  %v6869_v26 = vpack.c.bf16 %v5612_v21, %v5611_v0  ;;  %v4708_v0 = vrot.slane %v4233_v1, %v7476_v16 }
 0x1c8   : > { %v4704_v18 = vrot.slane %v4233_v1, %v7479_v17  ;;  %v4712_v15 = vrot.slane %v4233_v1, %v7482_v19 }
 0x1c9   : > { %6740 = vst [vmem:[%s7570_s17 + $0x370] sm:$0xff] %v6868_v23  ;;  %v3909_v29 = vpop.f32.mrb[104].mxu0  ;;  %6741 = vst [vmem:[%s7570_s17 + $0x378] sm:$0xff] %v6869_v26  ;;  %v3952_v30 = vpop.f32.mrb[104].mxu1 }
 0x1ca   : > { %v4953_v27 = vadd.f32 %v4668_v22, %v3909_v29  ;;  %v3911_v32 = vpop.f32.mrb[105].mxu0  ;;  %v4955_v33 = vadd.f32 %v4676_v24, %v3952_v30  ;;  %v3954_v35 = vpop.f32.mrb[105].mxu1 }
 0x1cb   : > { %v4954_v34 = vadd.f32 %v4672_v25, %v3911_v32  ;;  %v3913_v37 = vpop.f32.mrb[106].mxu0  ;;  %v4956_v38 = vadd.f32 %v4680_v28, %v3954_v35  ;;  %v3956_v36 = vpop.f32.mrb[106].mxu1 }
 0x1cc   : > { %v5613_v39 = vadd.f32 %v4668_v22, %v3913_v37  ;;  %v3915_v40 = vpop.f32.mrb[107].mxu0  ;;  %v5615_v42 = vadd.f32 %v4676_v24, %v3956_v36  ;;  %v3958_v46 = vpop.f32.mrb[107].mxu1  ;;  %v4716_v37 = vrot.slane %v4233_v1, %v7508_v31  ;;  %v4720_v36 = vrot.slane %v4233_v1, %v7536_v45 }
 0x1cd   : > { %v6810_v41 = vpack.c.bf16 %v4954_v34, %v4953_v27  ;;  %v5614_v43 = vadd.f32 %v4672_v25, %v3915_v40  ;;  %v6811_v47 = vpack.c.bf16 %v4956_v38, %v4955_v33  ;;  %v5616_v48 = vadd.f32 %v4680_v28, %v3958_v46 }
 0x1cf   : > { %5501 = vst [vmem:[%s7570_s17 + $0x1a0] sm:$0xff] %v6810_v41  ;;  %v6870_v50 = vpack.c.bf16 %v5614_v43, %v5613_v39  ;;  %5502 = vst [vmem:[%s7570_s17 + $0x1a8] sm:$0xff] %v6811_v47  ;;  %v6871_v54 = vpack.c.bf16 %v5616_v48, %v5615_v42  ;;  %v4724_v39 = vrot.slane %v4233_v1, %v7533_v44 }
 0x1d0   : > { %v4728_v41 = vrot.slane %v4233_v1, %v7547_v53 }
 0x1d1   : > { %6742 = vst [vmem:[%s7570_s17 + $0x380] sm:$0xff] %v6870_v50  ;;  %v3995_v56 = vpop.f32.mrb[108].mxu0  ;;  %6743 = vst [vmem:[%s7570_s17 + $0x388] sm:$0xff] %v6871_v54  ;;  %v4038_v58 = vpop.f32.mrb[108].mxu1 }
 0x1d2   : > { %v4957_v57 = vadd.f32 %v4684_v49, %v3995_v56  ;;  %v3997_v59 = vpop.f32.mrb[109].mxu0  ;;  %v4959_v60 = vadd.f32 %v4692_v51, %v4038_v58  ;;  %v4040_v62 = vpop.f32.mrb[109].mxu1 }
 0x1d3   : > { %v4958_v61 = vadd.f32 %v4688_v52, %v3997_v59  ;;  %v3999_v63 = vpop.f32.mrb[110].mxu0  ;;  %v4960_v2 = vadd.f32 %v4696_v55, %v4040_v62  ;;  %v4042_v4 = vpop.f32.mrb[110].mxu1 }
 0x1d4   : > { %v5617_v3 = vadd.f32 %v4684_v49, %v3999_v63  ;;  %v4001_v5 = vpop.f32.mrb[111].mxu0  ;;  %v5619_v7 = vadd.f32 %v4692_v51, %v4042_v4  ;;  %v4044_v9 = vpop.f32.mrb[111].mxu1 }
 0x1d5   : > { %v6812_v6 = vpack.c.bf16 %v4958_v61, %v4957_v57  ;;  %v5618_v8 = vadd.f32 %v4688_v52, %v4001_v5  ;;  %v6813_v10 = vpack.c.bf16 %v4960_v2, %v4959_v60  ;;  %v5620_v12 = vadd.f32 %v4696_v55, %v4044_v9 }
 0x1d7   : > { %5503 = vst [vmem:[%s7570_s17 + $0x1b0] sm:$0xff] %v6812_v6  ;;  %v6872_v14 = vpack.c.bf16 %v5618_v8, %v5617_v3  ;;  %5504 = vst [vmem:[%s7570_s17 + $0x1b8] sm:$0xff] %v6813_v10  ;;  %v6873_v20 = vpack.c.bf16 %v5620_v12, %v5619_v7 }
 0x1d9   : > { %6744 = vst [vmem:[%s7570_s17 + $0x390] sm:$0xff] %v6872_v14  ;;  %v4081_v21 = vpop.f32.mrb[112].mxu0  ;;  %6745 = vst [vmem:[%s7570_s17 + $0x398] sm:$0xff] %v6873_v20  ;;  %v4124_v23 = vpop.f32.mrb[112].mxu1 }
 0x1da   : > { %v4961_v22 = vadd.f32 %v4700_v13, %v4081_v21  ;;  %v4083_v24 = vpop.f32.mrb[113].mxu0  ;;  %v4963_v25 = vadd.f32 %v4708_v0, %v4124_v23  ;;  %v4126_v11 = vpop.f32.mrb[113].mxu1 }
 0x1db   : > { %v4962_v26 = vadd.f32 %v4704_v18, %v4083_v24  ;;  %v4085_v28 = vpop.f32.mrb[114].mxu0  ;;  %v4964_v29 = vadd.f32 %v4712_v15, %v4126_v11  ;;  %v4128_v27 = vpop.f32.mrb[114].mxu1 }
 0x1dc   : > { %v5621_v16 = vadd.f32 %v4700_v13, %v4085_v28  ;;  %v4087_v17 = vpop.f32.mrb[115].mxu0  ;;  %v5623_v19 = vadd.f32 %v4708_v0, %v4128_v27  ;;  %v4130_v33 = vpop.f32.mrb[115].mxu1 }
 0x1dd   : > { %v6814_v30 = vpack.c.bf16 %v4962_v26, %v4961_v22  ;;  %v5622_v32 = vadd.f32 %v4704_v18, %v4087_v17  ;;  %v6815_v34 = vpack.c.bf16 %v4964_v29, %v4963_v25  ;;  %v5624_v35 = vadd.f32 %v4712_v15, %v4130_v33 }
 0x1df   : > { %5505 = vst [vmem:[%s7570_s17 + $0x1c0] sm:$0xff] %v6814_v30  ;;  %v6874_v38 = vpack.c.bf16 %v5622_v32, %v5621_v16  ;;  %5506 = vst [vmem:[%s7570_s17 + $0x1c8] sm:$0xff] %v6815_v34  ;;  %v6875_v40 = vpack.c.bf16 %v5624_v35, %v5623_v19 }
 0x1e1   : > { %6746 = vst [vmem:[%s7570_s17 + $0x3a0] sm:$0xff] %v6874_v38  ;;  %v4167_v42 = vpop.f32.mrb[116].mxu0  ;;  %6747 = vst [vmem:[%s7570_s17 + $0x3a8] sm:$0xff] %v6875_v40  ;;  %v4210_v46 = vpop.f32.mrb[116].mxu1 }
 0x1e2   : > { %v4965_v43 = vadd.f32 %v4716_v37, %v4167_v42  ;;  %v4169_v47 = vpop.f32.mrb[117].mxu0  ;;  %v4967_v48 = vadd.f32 %v4724_v39, %v4210_v46  ;;  %v4212_v49 = vpop.f32.mrb[117].mxu1 }
 0x1e3   : > { %v4966_v31 = vadd.f32 %v4720_v36, %v4169_v47  ;;  %v4171_v50 = vpop.f32.mrb[118].mxu0  ;;  %v4968_v44 = vadd.f32 %v4728_v41, %v4212_v49  ;;  %v4214_v51 = vpop.f32.mrb[118].mxu1  ;;  %6177 = sbr.rel (!%p7051_p5) target bundleno = 519 (0x207), region = 36 }
 0x1e4   : > { %v5625_v45 = vadd.f32 %v4716_v37, %v4171_v50  ;;  %v4173_v52 = vpop.f32.mrb[119].mxu0  ;;  %v5627_v54 = vadd.f32 %v4724_v39, %v4214_v51  ;;  %v4216_v56 = vpop.f32.mrb[119].mxu1 }
 0x1e5   : > { %v6816_v53 = vpack.c.bf16 %v4966_v31, %v4965_v43  ;;  %v5626_v55 = vadd.f32 %v4720_v36, %v4173_v52  ;;  %v6817_v57 = vpack.c.bf16 %v4968_v44, %v4967_v48  ;;  %v5628_v58 = vadd.f32 %v4728_v41, %v4216_v56 }
 0x1e7   : > { %5507 = vst [vmem:[%s7570_s17 + $0x1d0] sm:$0xff] %v6816_v53  ;;  %v6876_v59 = vpack.c.bf16 %v5626_v55, %v5625_v45  ;;  %5508 = vst [vmem:[%s7570_s17 + $0x1d8] sm:$0xff] %v6817_v57  ;;  %v6877_v60 = vpack.c.bf16 %v5628_v58, %v5627_v54 }
 0x1e9   : > { %6748 = vst [vmem:[%s7570_s17 + $0x3b0] sm:$0xff] %v6876_v59  ;;  %6749 = vst [vmem:[%s7570_s17 + $0x3b8] sm:$0xff] %v6877_v60 }
 0x1ea   : > { %s7938_s24 = smov (!%p6180_p11, %s6179_s24), 120 }
 0x1eb   : > { %s7868_s25 = sshll.u32 %s7938_s24, 7 }
 0x1ec   : > { %s6184_s26 = ssub.s32 15360, %s7868_s25 }
 0x1ed   : > { %6185 = vsyncadd %s7860_s19, %s6184_s26  ;;  %p6751_p12 = scmp.ne.s32.totalorder %s7868_s25, 0  ;;  %s6878_s22 = smul.u32 7680, %s7034_s16 }
 0x1ee   : > { %s6753_s27 = sshll.u32 %s7938_s24, 2  ;;  %s6191_s28 = sshll.u32 %s7570_s17, 4  ;;  %s7881_s28 = int_to_ptr.vmem [resolvable:$true] %s6191_s28 }
 0x1ef   : > { %s7879_s4 = scalar_lea.hbm %s7930_s3, %s6878_s22  ;;  %s6925_s5 = scalar_lea.vmem %s7881_s28, %s7868_s25 }
 0x1f0   : > { %p6926_p13 = scmp.ne.s32.totalorder %s7881_s28, %s6925_s5  ;;  %s6990_s6 = smov [#allocation2]  }
 0x1f1   : > { %s6929_s7 = sshll.u32 %s6990_s6, 4  ;;  %s6930_s7 = int_to_ptr.vmem [resolvable:$false] %s6929_s7 }
 0x1f2   : > { %p6927_p0 = pnand %p6926_p13, %p6751_p12  ;;  %s6931_s16 = scalar_lea.vmem %s6930_s7, 30720 }
 0x1f3   : > { %p6932_p2 = scmp.lt.s32.totalorder %s7881_s28, %s6930_s7  ;;  %p6933_p3 = scmp.lt.s32.totalorder %s6931_s16, %s6925_s5 }
 0x1f4   : > { %p6928_p1 = pneg %p6927_p0 }
 0x1f5   : > { %p6934_p4 = por %p6933_p3, %p6932_p2 }
 0x1f7   : > { %p6935_p5 = pnand %p6934_p4, %p6928_p1 }
 0x1f9   : > { %6938 = shalt.err (!%p6935_p5)
}
 0x1fa   : > { %s6939_s8 = scalar_lea.hbm %s7879_s4, %s7868_s25  ;;  %s6943_s11 = scalar_lea.hbm %s7930_s3, 30080 }
 0x1fb   : > { %p6940_p7 = scmp.ne.s32.totalorder %s7879_s4, %s6939_s8  ;;  %p6944_p10 = scmp.lt.u32.totalorder %s7879_s4, %s7930_s3 }
 0x1fc   : > { %p6945_p11 = scmp.lt.u32.totalorder %s6943_s11, %s6939_s8  ;;  %p6947_p0 = scmp.lt.u32.totalorder %s6939_s8, %s7879_s4 }
 0x1fd   : > { %p6941_p8 = pnand %p6940_p7, %p6751_p12 }
 0x1fe   : > { %p6946_p13 = por %p6945_p11, %p6944_p10 }
 0x1ff   : > { %p6942_p9 = pneg %p6941_p8 }
 0x200   : > { %p6948_p1 = por %p6947_p0, %p6946_p13 }
 0x202   : > { %p6949_p2 = pnand %p6948_p1, %p6942_p9 }
 0x204   : > { %6952 = shalt.err (!%p6949_p2)
}
 0x205   : > { %s6991_s26 = smov 7680   ;;  %s6992_s22 = smov 15040  }
 0x206   : > { %6197 = dma.vmem_to_hbm [thread:$0]  (%p6751_p12), %s7881_s28, %s7868_s25, %s7879_s4, %s7860_s19, %s6991_s26, %s6992_s22, %s6753_s27  }
 0x207 PF: > { %p6889_p3 = scmp.ge.s32.totalorder %s6987_s15, 2  ;;  %s6206_s29 = sand.u32 1, %s6975_s12  }
 0x208   : > { %s6207_s30 = scalar_lea.sflag [#allocation3], %s6206_s29 }
 0x209   : > { %p6886_p4 = pnand %p6889_p3, %p7055_p6 }
 0x20b   : > { %6970 = dma.done.wait (!%p6886_p4), %s6207_s30, 15360  }
 0x20c   : > { %6972 = vsyncadd (!%p6886_p4), %s6207_s30, 4294951936  ;;  %p13_p5 = scmp.ge.s32.totalorder %s7038_s18, 4   ;;  %s7933_s12 = smov %s6979_s13 }
 0x20d   : > { %s7934_s13 = smov %s6983_s14  ;;  %s7935_s14 = smov %s7049_s21 }
 0x20e   : > { %s7936_s15 = smov %s7038_s18  ;;  %15 = sbr.rel (!%p13_p5) target bundleno = 3 (0x3), region = 71 }
 0x215   :  { %6212 = vsyncpa [#allocation3], 1 }
 0x216   :  { %6214 = vsyncpa [#allocation3 + $0x1], 1 }

</bundles_post_ra>
